<compile_context>
chip_gen: v5e
topology: v5e:2x2
jax: 0.10.0
libtpu: 0.0.40
codegen_flags: <defaults>
</compile_context>

<pallas_src>
import functools
import math

import jax
import jax.numpy as jnp
from jax.experimental import pallas as pl
from jax.experimental.pallas import tpu as pltpu  # noqa: F401  (TPU backend assumed)

_EPS = 1e-5


def _gn_silu(f, ga, gamma, beta):
    """GroupNorm (biased var, eps=1e-5, per-channel affine) + SiLU.

    f: (C, HW) f32; ga: (C, C) block-diagonal group-averaging matrix
    (ga[c, c'] = 1/channels_per_group if same group else 0); gamma/beta: (C, 1).
    """
    gmu = jnp.mean(jnp.dot(ga, f, preferred_element_type=jnp.float32),
                   axis=1, keepdims=True)                      # (C, 1) group mean
    d = f - gmu
    gvar = jnp.mean(jnp.dot(ga, d * d, preferred_element_type=jnp.float32),
                    axis=1, keepdims=True)                     # (C, 1) group var
    y = d * jax.lax.rsqrt(gvar + _EPS) * gamma + beta
    return y * jax.nn.sigmoid(y)                               # SiLU


def sd_residual_kernel(x_ref, mask_ref, ga_in_ref, ga_out_ref, p_in_ref,
                       p_out_ref, w1_ref, w2_ref, wr_ref, o_ref, *, width):
    # x_ref   : (N, Cin, HW)    flattened input latent
    # mask_ref: (9, 1, HW)      per-tap validity masks ("same" zero padding)
    # ga_*    : (C, C)          group-averaging matrices for GroupNorm1/2
    # p_in    : (Cin, 2)        [gamma1, beta1]
    # p_out   : (Cout, 5)       [gamma2, beta2, conv1_b, conv2_b, skip_b]
    # w1_ref  : (9, Cout, Cin)  conv1 weights, tap-major (t = ky*3 + kx)
    # w2_ref  : (9, Cout, Cout) conv2 weights, tap-major
    # wr_ref  : (Cout, Cin)     1x1 skip projection (identity matrix if in==out)
    # o_ref   : (N, Cout, HW)
    n, _, hw = x_ref.shape
    cout = o_ref.shape[1]

    gamma1, beta1 = p_in_ref[:, 0:1], p_in_ref[:, 1:2]
    gamma2, beta2 = p_out_ref[:, 0:1], p_out_ref[:, 1:2]
    b1, b2, br = p_out_ref[:, 2:3], p_out_ref[:, 3:4], p_out_ref[:, 4:5]
    ga_in = ga_in_ref[...]
    ga_out = ga_out_ref[...]

    def conv3x3(f, w_taps_ref, bias):
        # f: (C_in, HW). Shift the flat spatial axis per tap, zero the taps
        # that fall outside the image, and accumulate 9 small MXU matmuls.
        acc = jnp.zeros((cout, hw), jnp.float32)
        for t in range(9):
            dy, dx = t // 3 - 1, t % 3 - 1
            off = dy * width + dx
            shifted = f if off == 0 else jnp.roll(f, -off, axis=1)
            patch = shifted * mask_ref[t]                      # (C_in, HW)
            acc = acc + jnp.dot(w_taps_ref[t], patch,
                                preferred_element_type=jnp.float32)
        return acc + bias

    for i in range(n):                                         # N is tiny: static unroll
        x_i = x_ref[i]                                         # (Cin, HW)
        f = _gn_silu(x_i, ga_in, gamma1, beta1)
        f = conv3x3(f, w1_ref, b1)                             # (Cout, HW)
        f = _gn_silu(f, ga_out, gamma2, beta2)
        f = conv3x3(f, w2_ref, b2)                             # (Cout, HW)
        skip = jnp.dot(wr_ref[...], x_i,
                       preferred_element_type=jnp.float32) + br
        o_ref[i] = (f + skip).astype(o_ref.dtype)


def _group_avg_matrix(channels, num_groups, dtype=jnp.float32):
    cpg = channels // num_groups
    idx = jnp.arange(channels)
    same = (idx[:, None] // cpg) == (idx[None, :] // cpg)
    return same.astype(dtype) / cpg


def _tap_masks(h, w, dtype=jnp.float32):
    ys = jnp.arange(h)[:, None]
    xs = jnp.arange(w)[None, :]
    rows = []
    for t in range(9):
        dy, dx = t // 3 - 1, t % 3 - 1
        valid = ((ys + dy >= 0) & (ys + dy < h) &
                 (xs + dx >= 0) & (xs + dx < w))
        rows.append(valid.astype(dtype).reshape(1, h * w))
    return jnp.stack(rows, axis=0)                             # (9, 1, H*W)


def sd_residual_forward(latent, params, num_groups):
    """latent: (N, Cin, H, W). params: SDResidualBlock parameters (see below)."""
    n, cin, h, w = latent.shape
    cout = params["conv1_w"].shape[0]
    hw = h * w
    f32 = jnp.float32

    x_flat = latent.astype(f32).reshape(n, cin, hw)

    # Conv weights OIHW -> tap-major (9, Cout, Cin), tap index t = ky*3 + kx.
    w1 = jnp.transpose(params["conv1_w"].astype(f32), (2, 3, 0, 1)).reshape(9, cout, cin)
    w2 = jnp.transpose(params["conv2_w"].astype(f32), (2, 3, 0, 1)).reshape(9, cout, cout)

    if "res_w" in params:                   # 1x1 projection skip (in_ch != out_ch)
        wr = params["res_w"].astype(f32).reshape(cout, cin)
        br = params["res_b"].astype(f32)
    else:                                   # identity skip (in_ch == out_ch)
        wr = jnp.eye(cout, dtype=f32)
        br = jnp.zeros((cout,), f32)

    p_in = jnp.stack([params["gn1_w"], params["gn1_b"]], axis=1).astype(f32)
    p_out = jnp.stack([params["gn2_w"], params["gn2_b"],
                       params["conv1_b"], params["conv2_b"], br], axis=1).astype(f32)

    out = pl.pallas_call(
        functools.partial(sd_residual_kernel, width=w),
        out_shape=jax.ShapeDtypeStruct((n, cout, hw), latent.dtype),
        # No grid: single invocation, whole (KB-scale) operands as VMEM blocks.
    )(x_flat, _tap_masks(h, w), _group_avg_matrix(cin, num_groups),
      _group_avg_matrix(cout, num_groups), p_in, p_out, w1, w2, wr)
    return out.reshape(n, cout, h, w)


# ----------------------------- pure-JAX reference -----------------------------
def _ref_group_norm(x, gamma, beta, num_groups, eps=_EPS):
    n, c, h, w = x.shape
    xg = x.reshape(n, num_groups, c // num_groups, h, w)
    mu = jnp.mean(xg, axis=(2, 3, 4), keepdims=True)
    var = jnp.mean((xg - mu) ** 2, axis=(2, 3, 4), keepdims=True)
    xn = ((xg - mu) * jax.lax.rsqrt(var + eps)).reshape(n, c, h, w)
    return xn * gamma[None, :, None, None] + beta[None, :, None, None]


def _ref_conv(x, w, b, padding):
    y = jax.lax.conv_general_dilated(
        x, w, window_strides=(1, 1), padding=padding,
        dimension_numbers=("NCHW", "OIHW", "NCHW"),
        precision=jax.lax.Precision.HIGHEST)
    return y + b[None, :, None, None]


def ref_sd_residual(latent, params, num_groups):
    silu = lambda t: t * jax.nn.sigmoid(t)
    f = silu(_ref_group_norm(latent, params["gn1_w"], params["gn1_b"], num_groups))
    f = _ref_conv(f, params["conv1_w"], params["conv1_b"], [(1, 1), (1, 1)])
    f = silu(_ref_group_norm(f, params["gn2_w"], params["gn2_b"], num_groups))
    f = _ref_conv(f, params["conv2_w"], params["conv2_b"], [(1, 1), (1, 1)])
    if "res_w" in params:
        skip = _ref_conv(latent, params["res_w"], params["res_b"], [(0, 0), (0, 0)])
    else:
        skip = latent
    return f + skip


if __name__ == "__main__":
    N, Cin, Cout, H, W, G = 2, 4, 8, 16, 16, 2
    key = jax.random.PRNGKey(0)
    ks = jax.random.split(key, 10)

    latent = jax.random.normal(ks[0], (N, Cin, H, W), jnp.float32)

    def conv_init(kw, kb, shape):
        fan_in = shape[1] * shape[2] * shape[3]
        bound = 1.0 / math.sqrt(fan_in)
        wt = jax.random.uniform(kw, shape, jnp.float32, -bound, bound)
        bs = jax.random.uniform(kb, (shape[0],), jnp.float32, -bound, bound)
        return wt, bs

    conv1_w, conv1_b = conv_init(ks[1], ks[2], (Cout, Cin, 3, 3))
    conv2_w, conv2_b = conv_init(ks[3], ks[4], (Cout, Cout, 3, 3))
    res_w, res_b = conv_init(ks[5], ks[6], (Cout, Cin, 1, 1))   # in_ch != out_ch path

    params = dict(
        gn1_w=1.0 + 0.1 * jax.random.normal(ks[7], (Cin,), jnp.float32),
        gn1_b=0.1 * jax.random.normal(ks[8], (Cin,), jnp.float32),
        gn2_w=1.0 + 0.1 * jax.random.normal(ks[9], (Cout,), jnp.float32),
        gn2_b=jnp.zeros((Cout,), jnp.float32),
        conv1_w=conv1_w, conv1_b=conv1_b,
        conv2_w=conv2_w, conv2_b=conv2_b,
        res_w=res_w, res_b=res_b,
    )

    out = sd_residual_forward(latent, params, num_groups=G)
    out = jax.block_until_ready(out)

    ref = ref_sd_residual(latent, params, num_groups=G)
    assert out.shape == (N, Cout, H, W)
    err = float(jnp.max(jnp.abs(out - ref)))
    if err < 2e-3:
        print("KERNEL_OK")
    else:
        print(f"MISMATCH max_abs_err={err}")
</pallas_src>

<mosaic_0001>
module attributes {stable_mosaic.version = 11 : i64} {
  func.func @sd_residual_kernel(%arg0: memref<2x4x256xf32, #tpu.memory_space<vmem>>, %arg1: memref<9x1x256xf32, #tpu.memory_space<vmem>>, %arg2: memref<4x4xf32, #tpu.memory_space<vmem>>, %arg3: memref<8x8xf32, #tpu.memory_space<vmem>>, %arg4: memref<4x2xf32, #tpu.memory_space<vmem>>, %arg5: memref<8x5xf32, #tpu.memory_space<vmem>>, %arg6: memref<9x8x4xf32, #tpu.memory_space<vmem>>, %arg7: memref<9x8x8xf32, #tpu.memory_space<vmem>>, %arg8: memref<8x4xf32, #tpu.memory_space<vmem>>, %arg9: memref<2x8x256xf32, #tpu.memory_space<vmem>>) attributes {dimension_semantics = [], scalar_prefetch = 0 : i64, scratch_operands = 0 : i64, tpu.core_type = #tpu.core_type<tc>} {
    %c0 = arith.constant 0 : index
    %c0_0 = arith.constant 0 : index
    %0 = vector.load %arg4[%c0, %c0_0] : memref<4x2xf32, #tpu.memory_space<vmem>>, vector<4x1xf32>
    %c0_1 = arith.constant 0 : index
    %c1 = arith.constant 1 : index
    %1 = vector.load %arg4[%c0_1, %c1] : memref<4x2xf32, #tpu.memory_space<vmem>>, vector<4x1xf32>
    %c0_2 = arith.constant 0 : index
    %c0_3 = arith.constant 0 : index
    %2 = vector.load %arg5[%c0_2, %c0_3] : memref<8x5xf32, #tpu.memory_space<vmem>>, vector<8x1xf32>
    %c0_4 = arith.constant 0 : index
    %c1_5 = arith.constant 1 : index
    %3 = vector.load %arg5[%c0_4, %c1_5] : memref<8x5xf32, #tpu.memory_space<vmem>>, vector<8x1xf32>
    %c0_6 = arith.constant 0 : index
    %c2 = arith.constant 2 : index
    %4 = vector.load %arg5[%c0_6, %c2] : memref<8x5xf32, #tpu.memory_space<vmem>>, vector<8x1xf32>
    %c0_7 = arith.constant 0 : index
    %c3 = arith.constant 3 : index
    %5 = vector.load %arg5[%c0_7, %c3] : memref<8x5xf32, #tpu.memory_space<vmem>>, vector<8x1xf32>
    %c0_8 = arith.constant 0 : index
    %c4 = arith.constant 4 : index
    %6 = vector.load %arg5[%c0_8, %c4] : memref<8x5xf32, #tpu.memory_space<vmem>>, vector<8x1xf32>
    %c0_9 = arith.constant 0 : index
    %c0_10 = arith.constant 0 : index
    %7 = vector.load %arg2[%c0_9, %c0_10] : memref<4x4xf32, #tpu.memory_space<vmem>>, vector<4x4xf32>
    %c0_11 = arith.constant 0 : index
    %c0_12 = arith.constant 0 : index
    %8 = vector.load %arg3[%c0_11, %c0_12] : memref<8x8xf32, #tpu.memory_space<vmem>>, vector<8x8xf32>
    %c0_13 = arith.constant 0 : index
    %c0_14 = arith.constant 0 : index
    %c0_15 = arith.constant 0 : index
    %9 = vector.load %arg0[%c0_13, %c0_14, %c0_15] : memref<2x4x256xf32, #tpu.memory_space<vmem>>, vector<1x4x256xf32>
    %10 = vector.shape_cast %9 : vector<1x4x256xf32> to vector<4x256xf32>
    %cst = arith.constant dense<0.000000e+00> : vector<4x256xf32>
    %11 = tpu.matmul %7, %10, %cst {dimension_numbers = #tpu.dot_dimension_numbers<[1], [0], [0], [1], [0, 0, 1, 1], [], []>} : vector<4x4xf32>, vector<4x256xf32>, vector<4x256xf32> -> vector<4x256xf32>
    %cst_16 = arith.constant dense<0.000000e+00> : vector<4xf32>
    %12 = vector.multi_reduction <add>, %11, %cst_16 [1] : vector<4x256xf32> to vector<4xf32>
    %13 = vector.shape_cast %12 : vector<4xf32> to vector<4x1xf32>
    %cst_17 = arith.constant 2.560000e+02 : f32
    %14 = vector.broadcast %cst_17 : f32 to vector<4x1xf32>
    %15 = arith.divf %13, %14 : vector<4x1xf32>
    %16 = vector.broadcast %15 : vector<4x1xf32> to vector<4x256xf32>
    %17 = arith.subf %10, %16 : vector<4x256xf32>
    %18 = arith.mulf %17, %17 : vector<4x256xf32>
    %cst_18 = arith.constant dense<0.000000e+00> : vector<4x256xf32>
    %19 = tpu.matmul %7, %18, %cst_18 {dimension_numbers = #tpu.dot_dimension_numbers<[1], [0], [0], [1], [0, 0, 1, 1], [], []>} : vector<4x4xf32>, vector<4x256xf32>, vector<4x256xf32> -> vector<4x256xf32>
    %cst_19 = arith.constant dense<0.000000e+00> : vector<4xf32>
    %20 = vector.multi_reduction <add>, %19, %cst_19 [1] : vector<4x256xf32> to vector<4xf32>
    %21 = vector.shape_cast %20 : vector<4xf32> to vector<4x1xf32>
    %cst_20 = arith.constant 2.560000e+02 : f32
    %22 = vector.broadcast %cst_20 : f32 to vector<4x1xf32>
    %23 = arith.divf %21, %22 : vector<4x1xf32>
    %cst_21 = arith.constant 9.99999974E-6 : f32
    %24 = vector.broadcast %cst_21 : f32 to vector<4x1xf32>
    %25 = arith.addf %23, %24 : vector<4x1xf32>
    %26 = math.rsqrt %25 : vector<4x1xf32>
    %27 = vector.broadcast %26 : vector<4x1xf32> to vector<4x256xf32>
    %28 = arith.mulf %17, %27 : vector<4x256xf32>
    %29 = vector.broadcast %0 : vector<4x1xf32> to vector<4x256xf32>
    %30 = arith.mulf %28, %29 : vector<4x256xf32>
    %31 = vector.broadcast %1 : vector<4x1xf32> to vector<4x256xf32>
    %32 = arith.addf %30, %31 : vector<4x256xf32>
    %33 = arith.negf %32 : vector<4x256xf32>
    %34 = math.exp %33 : vector<4x256xf32>
    %cst_22 = arith.constant 1.000000e+00 : f32
    %35 = vector.broadcast %cst_22 : f32 to vector<4x256xf32>
    %36 = arith.addf %35, %34 : vector<4x256xf32>
    %37 = arith.divf %35, %36 : vector<4x256xf32>
    %38 = arith.mulf %32, %37 : vector<4x256xf32>
    %cst_23 = arith.constant 0.000000e+00 : f32
    %39 = vector.broadcast %cst_23 : f32 to vector<8x256xf32>
    %40 = vector.extract_strided_slice %38 {offsets = [0, 239], sizes = [4, 17], strides = [1, 1]} : vector<4x256xf32> to vector<4x17xf32>
    %41 = vector.extract_strided_slice %38 {offsets = [0, 0], sizes = [4, 239], strides = [1, 1]} : vector<4x256xf32> to vector<4x239xf32>
    %42 = tpu.concatenate %40, %41 in 1 : vector<4x17xf32>, vector<4x239xf32> -> vector<4x256xf32>
    %c0_24 = arith.constant 0 : index
    %c0_25 = arith.constant 0 : index
    %c0_26 = arith.constant 0 : index
    %43 = vector.load %arg1[%c0_24, %c0_25, %c0_26] : memref<9x1x256xf32, #tpu.memory_space<vmem>>, vector<1x1x256xf32>
    %44 = vector.shape_cast %43 : vector<1x1x256xf32> to vector<1x256xf32>
    %45 = vector.broadcast %44 : vector<1x256xf32> to vector<4x256xf32>
    %46 = arith.mulf %42, %45 : vector<4x256xf32>
    %c0_27 = arith.constant 0 : index
    %c0_28 = arith.constant 0 : index
    %c0_29 = arith.constant 0 : index
    %47 = vector.load %arg6[%c0_27, %c0_28, %c0_29] : memref<9x8x4xf32, #tpu.memory_space<vmem>>, vector<1x8x4xf32>
    %48 = vector.shape_cast %47 : vector<1x8x4xf32> to vector<8x4xf32>
    %cst_30 = arith.constant dense<0.000000e+00> : vector<8x256xf32>
    %49 = tpu.matmul %48, %46, %cst_30 {dimension_numbers = #tpu.dot_dimension_numbers<[1], [0], [0], [1], [0, 0, 1, 1], [], []>} : vector<8x4xf32>, vector<4x256xf32>, vector<8x256xf32> -> vector<8x256xf32>
    %50 = arith.addf %39, %49 : vector<8x256xf32>
    %51 = vector.extract_strided_slice %38 {offsets = [0, 240], sizes = [4, 16], strides = [1, 1]} : vector<4x256xf32> to vector<4x16xf32>
    %52 = vector.extract_strided_slice %38 {offsets = [0, 0], sizes = [4, 240], strides = [1, 1]} : vector<4x256xf32> to vector<4x240xf32>
    %53 = tpu.concatenate %51, %52 in 1 : vector<4x16xf32>, vector<4x240xf32> -> vector<4x256xf32>
    %c1_31 = arith.constant 1 : index
    %c0_32 = arith.constant 0 : index
    %c0_33 = arith.constant 0 : index
    %54 = vector.load %arg1[%c1_31, %c0_32, %c0_33] : memref<9x1x256xf32, #tpu.memory_space<vmem>>, vector<1x1x256xf32>
    %55 = vector.shape_cast %54 : vector<1x1x256xf32> to vector<1x256xf32>
    %56 = vector.broadcast %55 : vector<1x256xf32> to vector<4x256xf32>
    %57 = arith.mulf %53, %56 : vector<4x256xf32>
    %c1_34 = arith.constant 1 : index
    %c0_35 = arith.constant 0 : index
    %c0_36 = arith.constant 0 : index
    %58 = vector.load %arg6[%c1_34, %c0_35, %c0_36] : memref<9x8x4xf32, #tpu.memory_space<vmem>>, vector<1x8x4xf32>
    %59 = vector.shape_cast %58 : vector<1x8x4xf32> to vector<8x4xf32>
    %cst_37 = arith.constant dense<0.000000e+00> : vector<8x256xf32>
    %60 = tpu.matmul %59, %57, %cst_37 {dimension_numbers = #tpu.dot_dimension_numbers<[1], [0], [0], [1], [0, 0, 1, 1], [], []>} : vector<8x4xf32>, vector<4x256xf32>, vector<8x256xf32> -> vector<8x256xf32>
    %61 = arith.addf %50, %60 : vector<8x256xf32>
    %62 = vector.extract_strided_slice %38 {offsets = [0, 241], sizes = [4, 15], strides = [1, 1]} : vector<4x256xf32> to vector<4x15xf32>
    %63 = vector.extract_strided_slice %38 {offsets = [0, 0], sizes = [4, 241], strides = [1, 1]} : vector<4x256xf32> to vector<4x241xf32>
    %64 = tpu.concatenate %62, %63 in 1 : vector<4x15xf32>, vector<4x241xf32> -> vector<4x256xf32>
    %c2_38 = arith.constant 2 : index
    %c0_39 = arith.constant 0 : index
    %c0_40 = arith.constant 0 : index
    %65 = vector.load %arg1[%c2_38, %c0_39, %c0_40] : memref<9x1x256xf32, #tpu.memory_space<vmem>>, vector<1x1x256xf32>
    %66 = vector.shape_cast %65 : vector<1x1x256xf32> to vector<1x256xf32>
    %67 = vector.broadcast %66 : vector<1x256xf32> to vector<4x256xf32>
    %68 = arith.mulf %64, %67 : vector<4x256xf32>
    %c2_41 = arith.constant 2 : index
    %c0_42 = arith.constant 0 : index
    %c0_43 = arith.constant 0 : index
    %69 = vector.load %arg6[%c2_41, %c0_42, %c0_43] : memref<9x8x4xf32, #tpu.memory_space<vmem>>, vector<1x8x4xf32>
    %70 = vector.shape_cast %69 : vector<1x8x4xf32> to vector<8x4xf32>
    %cst_44 = arith.constant dense<0.000000e+00> : vector<8x256xf32>
    %71 = tpu.matmul %70, %68, %cst_44 {dimension_numbers = #tpu.dot_dimension_numbers<[1], [0], [0], [1], [0, 0, 1, 1], [], []>} : vector<8x4xf32>, vector<4x256xf32>, vector<8x256xf32> -> vector<8x256xf32>
    %72 = arith.addf %61, %71 : vector<8x256xf32>
    %73 = vector.extract_strided_slice %38 {offsets = [0, 255], sizes = [4, 1], strides = [1, 1]} : vector<4x256xf32> to vector<4x1xf32>
    %74 = vector.extract_strided_slice %38 {offsets = [0, 0], sizes = [4, 255], strides = [1, 1]} : vector<4x256xf32> to vector<4x255xf32>
    %75 = tpu.concatenate %73, %74 in 1 : vector<4x1xf32>, vector<4x255xf32> -> vector<4x256xf32>
    %c3_45 = arith.constant 3 : index
    %c0_46 = arith.constant 0 : index
    %c0_47 = arith.constant 0 : index
    %76 = vector.load %arg1[%c3_45, %c0_46, %c0_47] : memref<9x1x256xf32, #tpu.memory_space<vmem>>, vector<1x1x256xf32>
    %77 = vector.shape_cast %76 : vector<1x1x256xf32> to vector<1x256xf32>
    %78 = vector.broadcast %77 : vector<1x256xf32> to vector<4x256xf32>
    %79 = arith.mulf %75, %78 : vector<4x256xf32>
    %c3_48 = arith.constant 3 : index
    %c0_49 = arith.constant 0 : index
    %c0_50 = arith.constant 0 : index
    %80 = vector.load %arg6[%c3_48, %c0_49, %c0_50] : memref<9x8x4xf32, #tpu.memory_space<vmem>>, vector<1x8x4xf32>
    %81 = vector.shape_cast %80 : vector<1x8x4xf32> to vector<8x4xf32>
    %cst_51 = arith.constant dense<0.000000e+00> : vector<8x256xf32>
    %82 = tpu.matmul %81, %79, %cst_51 {dimension_numbers = #tpu.dot_dimension_numbers<[1], [0], [0], [1], [0, 0, 1, 1], [], []>} : vector<8x4xf32>, vector<4x256xf32>, vector<8x256xf32> -> vector<8x256xf32>
    %83 = arith.addf %72, %82 : vector<8x256xf32>
    %c4_52 = arith.constant 4 : index
    %c0_53 = arith.constant 0 : index
    %c0_54 = arith.constant 0 : index
    %84 = vector.load %arg1[%c4_52, %c0_53, %c0_54] : memref<9x1x256xf32, #tpu.memory_space<vmem>>, vector<1x1x256xf32>
    %85 = vector.shape_cast %84 : vector<1x1x256xf32> to vector<1x256xf32>
    %86 = vector.broadcast %85 : vector<1x256xf32> to vector<4x256xf32>
    %87 = arith.mulf %38, %86 : vector<4x256xf32>
    %c4_55 = arith.constant 4 : index
    %c0_56 = arith.constant 0 : index
    %c0_57 = arith.constant 0 : index
    %88 = vector.load %arg6[%c4_55, %c0_56, %c0_57] : memref<9x8x4xf32, #tpu.memory_space<vmem>>, vector<1x8x4xf32>
    %89 = vector.shape_cast %88 : vector<1x8x4xf32> to vector<8x4xf32>
    %cst_58 = arith.constant dense<0.000000e+00> : vector<8x256xf32>
    %90 = tpu.matmul %89, %87, %cst_58 {dimension_numbers = #tpu.dot_dimension_numbers<[1], [0], [0], [1], [0, 0, 1, 1], [], []>} : vector<8x4xf32>, vector<4x256xf32>, vector<8x256xf32> -> vector<8x256xf32>
    %91 = arith.addf %83, %90 : vector<8x256xf32>
    %92 = vector.extract_strided_slice %38 {offsets = [0, 1], sizes = [4, 255], strides = [1, 1]} : vector<4x256xf32> to vector<4x255xf32>
    %93 = vector.extract_strided_slice %38 {offsets = [0, 0], sizes = [4, 1], strides = [1, 1]} : vector<4x256xf32> to vector<4x1xf32>
    %94 = tpu.concatenate %92, %93 in 1 : vector<4x255xf32>, vector<4x1xf32> -> vector<4x256xf32>
    %c5 = arith.constant 5 : index
    %c0_59 = arith.constant 0 : index
    %c0_60 = arith.constant 0 : index
    %95 = vector.load %arg1[%c5, %c0_59, %c0_60] : memref<9x1x256xf32, #tpu.memory_space<vmem>>, vector<1x1x256xf32>
    %96 = vector.shape_cast %95 : vector<1x1x256xf32> to vector<1x256xf32>
    %97 = vector.broadcast %96 : vector<1x256xf32> to vector<4x256xf32>
    %98 = arith.mulf %94, %97 : vector<4x256xf32>
    %c5_61 = arith.constant 5 : index
    %c0_62 = arith.constant 0 : index
    %c0_63 = arith.constant 0 : index
    %99 = vector.load %arg6[%c5_61, %c0_62, %c0_63] : memref<9x8x4xf32, #tpu.memory_space<vmem>>, vector<1x8x4xf32>
    %100 = vector.shape_cast %99 : vector<1x8x4xf32> to vector<8x4xf32>
    %cst_64 = arith.constant dense<0.000000e+00> : vector<8x256xf32>
    %101 = tpu.matmul %100, %98, %cst_64 {dimension_numbers = #tpu.dot_dimension_numbers<[1], [0], [0], [1], [0, 0, 1, 1], [], []>} : vector<8x4xf32>, vector<4x256xf32>, vector<8x256xf32> -> vector<8x256xf32>
    %102 = arith.addf %91, %101 : vector<8x256xf32>
    %103 = vector.extract_strided_slice %38 {offsets = [0, 15], sizes = [4, 241], strides = [1, 1]} : vector<4x256xf32> to vector<4x241xf32>
    %104 = vector.extract_strided_slice %38 {offsets = [0, 0], sizes = [4, 15], strides = [1, 1]} : vector<4x256xf32> to vector<4x15xf32>
    %105 = tpu.concatenate %103, %104 in 1 : vector<4x241xf32>, vector<4x15xf32> -> vector<4x256xf32>
    %c6 = arith.constant 6 : index
    %c0_65 = arith.constant 0 : index
    %c0_66 = arith.constant 0 : index
    %106 = vector.load %arg1[%c6, %c0_65, %c0_66] : memref<9x1x256xf32, #tpu.memory_space<vmem>>, vector<1x1x256xf32>
    %107 = vector.shape_cast %106 : vector<1x1x256xf32> to vector<1x256xf32>
    %108 = vector.broadcast %107 : vector<1x256xf32> to vector<4x256xf32>
    %109 = arith.mulf %105, %108 : vector<4x256xf32>
    %c6_67 = arith.constant 6 : index
    %c0_68 = arith.constant 0 : index
    %c0_69 = arith.constant 0 : index
    %110 = vector.load %arg6[%c6_67, %c0_68, %c0_69] : memref<9x8x4xf32, #tpu.memory_space<vmem>>, vector<1x8x4xf32>
    %111 = vector.shape_cast %110 : vector<1x8x4xf32> to vector<8x4xf32>
    %cst_70 = arith.constant dense<0.000000e+00> : vector<8x256xf32>
    %112 = tpu.matmul %111, %109, %cst_70 {dimension_numbers = #tpu.dot_dimension_numbers<[1], [0], [0], [1], [0, 0, 1, 1], [], []>} : vector<8x4xf32>, vector<4x256xf32>, vector<8x256xf32> -> vector<8x256xf32>
    %113 = arith.addf %102, %112 : vector<8x256xf32>
    %114 = vector.extract_strided_slice %38 {offsets = [0, 16], sizes = [4, 240], strides = [1, 1]} : vector<4x256xf32> to vector<4x240xf32>
    %115 = vector.extract_strided_slice %38 {offsets = [0, 0], sizes = [4, 16], strides = [1, 1]} : vector<4x256xf32> to vector<4x16xf32>
    %116 = tpu.concatenate %114, %115 in 1 : vector<4x240xf32>, vector<4x16xf32> -> vector<4x256xf32>
    %c7 = arith.constant 7 : index
    %c0_71 = arith.constant 0 : index
    %c0_72 = arith.constant 0 : index
    %117 = vector.load %arg1[%c7, %c0_71, %c0_72] : memref<9x1x256xf32, #tpu.memory_space<vmem>>, vector<1x1x256xf32>
    %118 = vector.shape_cast %117 : vector<1x1x256xf32> to vector<1x256xf32>
    %119 = vector.broadcast %118 : vector<1x256xf32> to vector<4x256xf32>
    %120 = arith.mulf %116, %119 : vector<4x256xf32>
    %c7_73 = arith.constant 7 : index
    %c0_74 = arith.constant 0 : index
    %c0_75 = arith.constant 0 : index
    %121 = vector.load %arg6[%c7_73, %c0_74, %c0_75] : memref<9x8x4xf32, #tpu.memory_space<vmem>>, vector<1x8x4xf32>
    %122 = vector.shape_cast %121 : vector<1x8x4xf32> to vector<8x4xf32>
    %cst_76 = arith.constant dense<0.000000e+00> : vector<8x256xf32>
    %123 = tpu.matmul %122, %120, %cst_76 {dimension_numbers = #tpu.dot_dimension_numbers<[1], [0], [0], [1], [0, 0, 1, 1], [], []>} : vector<8x4xf32>, vector<4x256xf32>, vector<8x256xf32> -> vector<8x256xf32>
    %124 = arith.addf %113, %123 : vector<8x256xf32>
    %125 = vector.extract_strided_slice %38 {offsets = [0, 17], sizes = [4, 239], strides = [1, 1]} : vector<4x256xf32> to vector<4x239xf32>
    %126 = vector.extract_strided_slice %38 {offsets = [0, 0], sizes = [4, 17], strides = [1, 1]} : vector<4x256xf32> to vector<4x17xf32>
    %127 = tpu.concatenate %125, %126 in 1 : vector<4x239xf32>, vector<4x17xf32> -> vector<4x256xf32>
    %c8 = arith.constant 8 : index
    %c0_77 = arith.constant 0 : index
    %c0_78 = arith.constant 0 : index
    %128 = vector.load %arg1[%c8, %c0_77, %c0_78] : memref<9x1x256xf32, #tpu.memory_space<vmem>>, vector<1x1x256xf32>
    %129 = vector.shape_cast %128 : vector<1x1x256xf32> to vector<1x256xf32>
    %130 = vector.broadcast %129 : vector<1x256xf32> to vector<4x256xf32>
    %131 = arith.mulf %127, %130 : vector<4x256xf32>
    %c8_79 = arith.constant 8 : index
    %c0_80 = arith.constant 0 : index
    %c0_81 = arith.constant 0 : index
    %132 = vector.load %arg6[%c8_79, %c0_80, %c0_81] : memref<9x8x4xf32, #tpu.memory_space<vmem>>, vector<1x8x4xf32>
    %133 = vector.shape_cast %132 : vector<1x8x4xf32> to vector<8x4xf32>
    %cst_82 = arith.constant dense<0.000000e+00> : vector<8x256xf32>
    %134 = tpu.matmul %133, %131, %cst_82 {dimension_numbers = #tpu.dot_dimension_numbers<[1], [0], [0], [1], [0, 0, 1, 1], [], []>} : vector<8x4xf32>, vector<4x256xf32>, vector<8x256xf32> -> vector<8x256xf32>
    %135 = arith.addf %124, %134 : vector<8x256xf32>
    %136 = vector.broadcast %4 : vector<8x1xf32> to vector<8x256xf32>
    %137 = arith.addf %135, %136 : vector<8x256xf32>
    %cst_83 = arith.constant dense<0.000000e+00> : vector<8x256xf32>
    %138 = tpu.matmul %8, %137, %cst_83 {dimension_numbers = #tpu.dot_dimension_numbers<[1], [0], [0], [1], [0, 0, 1, 1], [], []>} : vector<8x8xf32>, vector<8x256xf32>, vector<8x256xf32> -> vector<8x256xf32>
    %cst_84 = arith.constant dense<0.000000e+00> : vector<8xf32>
    %139 = vector.multi_reduction <add>, %138, %cst_84 [1] : vector<8x256xf32> to vector<8xf32>
    %140 = vector.shape_cast %139 : vector<8xf32> to vector<8x1xf32>
    %cst_85 = arith.constant 2.560000e+02 : f32
    %141 = vector.broadcast %cst_85 : f32 to vector<8x1xf32>
    %142 = arith.divf %140, %141 : vector<8x1xf32>
    %143 = vector.broadcast %142 : vector<8x1xf32> to vector<8x256xf32>
    %144 = arith.subf %137, %143 : vector<8x256xf32>
    %145 = arith.mulf %144, %144 : vector<8x256xf32>
    %cst_86 = arith.constant dense<0.000000e+00> : vector<8x256xf32>
    %146 = tpu.matmul %8, %145, %cst_86 {dimension_numbers = #tpu.dot_dimension_numbers<[1], [0], [0], [1], [0, 0, 1, 1], [], []>} : vector<8x8xf32>, vector<8x256xf32>, vector<8x256xf32> -> vector<8x256xf32>
    %cst_87 = arith.constant dense<0.000000e+00> : vector<8xf32>
    %147 = vector.multi_reduction <add>, %146, %cst_87 [1] : vector<8x256xf32> to vector<8xf32>
    %148 = vector.shape_cast %147 : vector<8xf32> to vector<8x1xf32>
    %cst_88 = arith.constant 2.560000e+02 : f32
    %149 = vector.broadcast %cst_88 : f32 to vector<8x1xf32>
    %150 = arith.divf %148, %149 : vector<8x1xf32>
    %cst_89 = arith.constant 9.99999974E-6 : f32
    %151 = vector.broadcast %cst_89 : f32 to vector<8x1xf32>
    %152 = arith.addf %150, %151 : vector<8x1xf32>
    %153 = math.rsqrt %152 : vector<8x1xf32>
    %154 = vector.broadcast %153 : vector<8x1xf32> to vector<8x256xf32>
    %155 = arith.mulf %144, %154 : vector<8x256xf32>
    %156 = vector.broadcast %2 : vector<8x1xf32> to vector<8x256xf32>
    %157 = arith.mulf %155, %156 : vector<8x256xf32>
    %158 = vector.broadcast %3 : vector<8x1xf32> to vector<8x256xf32>
    %159 = arith.addf %157, %158 : vector<8x256xf32>
    %160 = arith.negf %159 : vector<8x256xf32>
    %161 = math.exp %160 : vector<8x256xf32>
    %cst_90 = arith.constant 1.000000e+00 : f32
    %162 = vector.broadcast %cst_90 : f32 to vector<8x256xf32>
    %163 = arith.addf %162, %161 : vector<8x256xf32>
    %164 = arith.divf %162, %163 : vector<8x256xf32>
    %165 = arith.mulf %159, %164 : vector<8x256xf32>
    %cst_91 = arith.constant 0.000000e+00 : f32
    %166 = vector.broadcast %cst_91 : f32 to vector<8x256xf32>
    %167 = vector.extract_strided_slice %165 {offsets = [0, 239], sizes = [8, 17], strides = [1, 1]} : vector<8x256xf32> to vector<8x17xf32>
    %168 = vector.extract_strided_slice %165 {offsets = [0, 0], sizes = [8, 239], strides = [1, 1]} : vector<8x256xf32> to vector<8x239xf32>
    %169 = tpu.concatenate %167, %168 in 1 : vector<8x17xf32>, vector<8x239xf32> -> vector<8x256xf32>
    %c0_92 = arith.constant 0 : index
    %c0_93 = arith.constant 0 : index
    %c0_94 = arith.constant 0 : index
    %170 = vector.load %arg1[%c0_92, %c0_93, %c0_94] : memref<9x1x256xf32, #tpu.memory_space<vmem>>, vector<1x1x256xf32>
    %171 = vector.shape_cast %170 : vector<1x1x256xf32> to vector<1x256xf32>
    %172 = vector.broadcast %171 : vector<1x256xf32> to vector<8x256xf32>
    %173 = arith.mulf %169, %172 : vector<8x256xf32>
    %c0_95 = arith.constant 0 : index
    %c0_96 = arith.constant 0 : index
    %c0_97 = arith.constant 0 : index
    %174 = vector.load %arg7[%c0_95, %c0_96, %c0_97] : memref<9x8x8xf32, #tpu.memory_space<vmem>>, vector<1x8x8xf32>
    %175 = vector.shape_cast %174 : vector<1x8x8xf32> to vector<8x8xf32>
    %cst_98 = arith.constant dense<0.000000e+00> : vector<8x256xf32>
    %176 = tpu.matmul %175, %173, %cst_98 {dimension_numbers = #tpu.dot_dimension_numbers<[1], [0], [0], [1], [0, 0, 1, 1], [], []>} : vector<8x8xf32>, vector<8x256xf32>, vector<8x256xf32> -> vector<8x256xf32>
    %177 = arith.addf %166, %176 : vector<8x256xf32>
    %178 = vector.extract_strided_slice %165 {offsets = [0, 240], sizes = [8, 16], strides = [1, 1]} : vector<8x256xf32> to vector<8x16xf32>
    %179 = vector.extract_strided_slice %165 {offsets = [0, 0], sizes = [8, 240], strides = [1, 1]} : vector<8x256xf32> to vector<8x240xf32>
    %180 = tpu.concatenate %178, %179 in 1 : vector<8x16xf32>, vector<8x240xf32> -> vector<8x256xf32>
    %c1_99 = arith.constant 1 : index
    %c0_100 = arith.constant 0 : index
    %c0_101 = arith.constant 0 : index
    %181 = vector.load %arg1[%c1_99, %c0_100, %c0_101] : memref<9x1x256xf32, #tpu.memory_space<vmem>>, vector<1x1x256xf32>
    %182 = vector.shape_cast %181 : vector<1x1x256xf32> to vector<1x256xf32>
    %183 = vector.broadcast %182 : vector<1x256xf32> to vector<8x256xf32>
    %184 = arith.mulf %180, %183 : vector<8x256xf32>
    %c1_102 = arith.constant 1 : index
    %c0_103 = arith.constant 0 : index
    %c0_104 = arith.constant 0 : index
    %185 = vector.load %arg7[%c1_102, %c0_103, %c0_104] : memref<9x8x8xf32, #tpu.memory_space<vmem>>, vector<1x8x8xf32>
    %186 = vector.shape_cast %185 : vector<1x8x8xf32> to vector<8x8xf32>
    %cst_105 = arith.constant dense<0.000000e+00> : vector<8x256xf32>
    %187 = tpu.matmul %186, %184, %cst_105 {dimension_numbers = #tpu.dot_dimension_numbers<[1], [0], [0], [1], [0, 0, 1, 1], [], []>} : vector<8x8xf32>, vector<8x256xf32>, vector<8x256xf32> -> vector<8x256xf32>
    %188 = arith.addf %177, %187 : vector<8x256xf32>
    %189 = vector.extract_strided_slice %165 {offsets = [0, 241], sizes = [8, 15], strides = [1, 1]} : vector<8x256xf32> to vector<8x15xf32>
    %190 = vector.extract_strided_slice %165 {offsets = [0, 0], sizes = [8, 241], strides = [1, 1]} : vector<8x256xf32> to vector<8x241xf32>
    %191 = tpu.concatenate %189, %190 in 1 : vector<8x15xf32>, vector<8x241xf32> -> vector<8x256xf32>
    %c2_106 = arith.constant 2 : index
    %c0_107 = arith.constant 0 : index
    %c0_108 = arith.constant 0 : index
    %192 = vector.load %arg1[%c2_106, %c0_107, %c0_108] : memref<9x1x256xf32, #tpu.memory_space<vmem>>, vector<1x1x256xf32>
    %193 = vector.shape_cast %192 : vector<1x1x256xf32> to vector<1x256xf32>
    %194 = vector.broadcast %193 : vector<1x256xf32> to vector<8x256xf32>
    %195 = arith.mulf %191, %194 : vector<8x256xf32>
    %c2_109 = arith.constant 2 : index
    %c0_110 = arith.constant 0 : index
    %c0_111 = arith.constant 0 : index
    %196 = vector.load %arg7[%c2_109, %c0_110, %c0_111] : memref<9x8x8xf32, #tpu.memory_space<vmem>>, vector<1x8x8xf32>
    %197 = vector.shape_cast %196 : vector<1x8x8xf32> to vector<8x8xf32>
    %cst_112 = arith.constant dense<0.000000e+00> : vector<8x256xf32>
    %198 = tpu.matmul %197, %195, %cst_112 {dimension_numbers = #tpu.dot_dimension_numbers<[1], [0], [0], [1], [0, 0, 1, 1], [], []>} : vector<8x8xf32>, vector<8x256xf32>, vector<8x256xf32> -> vector<8x256xf32>
    %199 = arith.addf %188, %198 : vector<8x256xf32>
    %200 = vector.extract_strided_slice %165 {offsets = [0, 255], sizes = [8, 1], strides = [1, 1]} : vector<8x256xf32> to vector<8x1xf32>
    %201 = vector.extract_strided_slice %165 {offsets = [0, 0], sizes = [8, 255], strides = [1, 1]} : vector<8x256xf32> to vector<8x255xf32>
    %202 = tpu.concatenate %200, %201 in 1 : vector<8x1xf32>, vector<8x255xf32> -> vector<8x256xf32>
    %c3_113 = arith.constant 3 : index
    %c0_114 = arith.constant 0 : index
    %c0_115 = arith.constant 0 : index
    %203 = vector.load %arg1[%c3_113, %c0_114, %c0_115] : memref<9x1x256xf32, #tpu.memory_space<vmem>>, vector<1x1x256xf32>
    %204 = vector.shape_cast %203 : vector<1x1x256xf32> to vector<1x256xf32>
    %205 = vector.broadcast %204 : vector<1x256xf32> to vector<8x256xf32>
    %206 = arith.mulf %202, %205 : vector<8x256xf32>
    %c3_116 = arith.constant 3 : index
    %c0_117 = arith.constant 0 : index
    %c0_118 = arith.constant 0 : index
    %207 = vector.load %arg7[%c3_116, %c0_117, %c0_118] : memref<9x8x8xf32, #tpu.memory_space<vmem>>, vector<1x8x8xf32>
    %208 = vector.shape_cast %207 : vector<1x8x8xf32> to vector<8x8xf32>
    %cst_119 = arith.constant dense<0.000000e+00> : vector<8x256xf32>
    %209 = tpu.matmul %208, %206, %cst_119 {dimension_numbers = #tpu.dot_dimension_numbers<[1], [0], [0], [1], [0, 0, 1, 1], [], []>} : vector<8x8xf32>, vector<8x256xf32>, vector<8x256xf32> -> vector<8x256xf32>
    %210 = arith.addf %199, %209 : vector<8x256xf32>
    %c4_120 = arith.constant 4 : index
    %c0_121 = arith.constant 0 : index
    %c0_122 = arith.constant 0 : index
    %211 = vector.load %arg1[%c4_120, %c0_121, %c0_122] : memref<9x1x256xf32, #tpu.memory_space<vmem>>, vector<1x1x256xf32>
    %212 = vector.shape_cast %211 : vector<1x1x256xf32> to vector<1x256xf32>
    %213 = vector.broadcast %212 : vector<1x256xf32> to vector<8x256xf32>
    %214 = arith.mulf %165, %213 : vector<8x256xf32>
    %c4_123 = arith.constant 4 : index
    %c0_124 = arith.constant 0 : index
    %c0_125 = arith.constant 0 : index
    %215 = vector.load %arg7[%c4_123, %c0_124, %c0_125] : memref<9x8x8xf32, #tpu.memory_space<vmem>>, vector<1x8x8xf32>
    %216 = vector.shape_cast %215 : vector<1x8x8xf32> to vector<8x8xf32>
    %cst_126 = arith.constant dense<0.000000e+00> : vector<8x256xf32>
    %217 = tpu.matmul %216, %214, %cst_126 {dimension_numbers = #tpu.dot_dimension_numbers<[1], [0], [0], [1], [0, 0, 1, 1], [], []>} : vector<8x8xf32>, vector<8x256xf32>, vector<8x256xf32> -> vector<8x256xf32>
    %218 = arith.addf %210, %217 : vector<8x256xf32>
    %219 = vector.extract_strided_slice %165 {offsets = [0, 1], sizes = [8, 255], strides = [1, 1]} : vector<8x256xf32> to vector<8x255xf32>
    %220 = vector.extract_strided_slice %165 {offsets = [0, 0], sizes = [8, 1], strides = [1, 1]} : vector<8x256xf32> to vector<8x1xf32>
    %221 = tpu.concatenate %219, %220 in 1 : vector<8x255xf32>, vector<8x1xf32> -> vector<8x256xf32>
    %c5_127 = arith.constant 5 : index
    %c0_128 = arith.constant 0 : index
    %c0_129 = arith.constant 0 : index
    %222 = vector.load %arg1[%c5_127, %c0_128, %c0_129] : memref<9x1x256xf32, #tpu.memory_space<vmem>>, vector<1x1x256xf32>
    %223 = vector.shape_cast %222 : vector<1x1x256xf32> to vector<1x256xf32>
    %224 = vector.broadcast %223 : vector<1x256xf32> to vector<8x256xf32>
    %225 = arith.mulf %221, %224 : vector<8x256xf32>
    %c5_130 = arith.constant 5 : index
    %c0_131 = arith.constant 0 : index
    %c0_132 = arith.constant 0 : index
    %226 = vector.load %arg7[%c5_130, %c0_131, %c0_132] : memref<9x8x8xf32, #tpu.memory_space<vmem>>, vector<1x8x8xf32>
    %227 = vector.shape_cast %226 : vector<1x8x8xf32> to vector<8x8xf32>
    %cst_133 = arith.constant dense<0.000000e+00> : vector<8x256xf32>
    %228 = tpu.matmul %227, %225, %cst_133 {dimension_numbers = #tpu.dot_dimension_numbers<[1], [0], [0], [1], [0, 0, 1, 1], [], []>} : vector<8x8xf32>, vector<8x256xf32>, vector<8x256xf32> -> vector<8x256xf32>
    %229 = arith.addf %218, %228 : vector<8x256xf32>
    %230 = vector.extract_strided_slice %165 {offsets = [0, 15], sizes = [8, 241], strides = [1, 1]} : vector<8x256xf32> to vector<8x241xf32>
    %231 = vector.extract_strided_slice %165 {offsets = [0, 0], sizes = [8, 15], strides = [1, 1]} : vector<8x256xf32> to vector<8x15xf32>
    %232 = tpu.concatenate %230, %231 in 1 : vector<8x241xf32>, vector<8x15xf32> -> vector<8x256xf32>
    %c6_134 = arith.constant 6 : index
    %c0_135 = arith.constant 0 : index
    %c0_136 = arith.constant 0 : index
    %233 = vector.load %arg1[%c6_134, %c0_135, %c0_136] : memref<9x1x256xf32, #tpu.memory_space<vmem>>, vector<1x1x256xf32>
    %234 = vector.shape_cast %233 : vector<1x1x256xf32> to vector<1x256xf32>
    %235 = vector.broadcast %234 : vector<1x256xf32> to vector<8x256xf32>
    %236 = arith.mulf %232, %235 : vector<8x256xf32>
    %c6_137 = arith.constant 6 : index
    %c0_138 = arith.constant 0 : index
    %c0_139 = arith.constant 0 : index
    %237 = vector.load %arg7[%c6_137, %c0_138, %c0_139] : memref<9x8x8xf32, #tpu.memory_space<vmem>>, vector<1x8x8xf32>
    %238 = vector.shape_cast %237 : vector<1x8x8xf32> to vector<8x8xf32>
    %cst_140 = arith.constant dense<0.000000e+00> : vector<8x256xf32>
    %239 = tpu.matmul %238, %236, %cst_140 {dimension_numbers = #tpu.dot_dimension_numbers<[1], [0], [0], [1], [0, 0, 1, 1], [], []>} : vector<8x8xf32>, vector<8x256xf32>, vector<8x256xf32> -> vector<8x256xf32>
    %240 = arith.addf %229, %239 : vector<8x256xf32>
    %241 = vector.extract_strided_slice %165 {offsets = [0, 16], sizes = [8, 240], strides = [1, 1]} : vector<8x256xf32> to vector<8x240xf32>
    %242 = vector.extract_strided_slice %165 {offsets = [0, 0], sizes = [8, 16], strides = [1, 1]} : vector<8x256xf32> to vector<8x16xf32>
    %243 = tpu.concatenate %241, %242 in 1 : vector<8x240xf32>, vector<8x16xf32> -> vector<8x256xf32>
    %c7_141 = arith.constant 7 : index
    %c0_142 = arith.constant 0 : index
    %c0_143 = arith.constant 0 : index
    %244 = vector.load %arg1[%c7_141, %c0_142, %c0_143] : memref<9x1x256xf32, #tpu.memory_space<vmem>>, vector<1x1x256xf32>
    %245 = vector.shape_cast %244 : vector<1x1x256xf32> to vector<1x256xf32>
    %246 = vector.broadcast %245 : vector<1x256xf32> to vector<8x256xf32>
    %247 = arith.mulf %243, %246 : vector<8x256xf32>
    %c7_144 = arith.constant 7 : index
    %c0_145 = arith.constant 0 : index
    %c0_146 = arith.constant 0 : index
    %248 = vector.load %arg7[%c7_144, %c0_145, %c0_146] : memref<9x8x8xf32, #tpu.memory_space<vmem>>, vector<1x8x8xf32>
    %249 = vector.shape_cast %248 : vector<1x8x8xf32> to vector<8x8xf32>
    %cst_147 = arith.constant dense<0.000000e+00> : vector<8x256xf32>
    %250 = tpu.matmul %249, %247, %cst_147 {dimension_numbers = #tpu.dot_dimension_numbers<[1], [0], [0], [1], [0, 0, 1, 1], [], []>} : vector<8x8xf32>, vector<8x256xf32>, vector<8x256xf32> -> vector<8x256xf32>
    %251 = arith.addf %240, %250 : vector<8x256xf32>
    %252 = vector.extract_strided_slice %165 {offsets = [0, 17], sizes = [8, 239], strides = [1, 1]} : vector<8x256xf32> to vector<8x239xf32>
    %253 = vector.extract_strided_slice %165 {offsets = [0, 0], sizes = [8, 17], strides = [1, 1]} : vector<8x256xf32> to vector<8x17xf32>
    %254 = tpu.concatenate %252, %253 in 1 : vector<8x239xf32>, vector<8x17xf32> -> vector<8x256xf32>
    %c8_148 = arith.constant 8 : index
    %c0_149 = arith.constant 0 : index
    %c0_150 = arith.constant 0 : index
    %255 = vector.load %arg1[%c8_148, %c0_149, %c0_150] : memref<9x1x256xf32, #tpu.memory_space<vmem>>, vector<1x1x256xf32>
    %256 = vector.shape_cast %255 : vector<1x1x256xf32> to vector<1x256xf32>
    %257 = vector.broadcast %256 : vector<1x256xf32> to vector<8x256xf32>
    %258 = arith.mulf %254, %257 : vector<8x256xf32>
    %c8_151 = arith.constant 8 : index
    %c0_152 = arith.constant 0 : index
    %c0_153 = arith.constant 0 : index
    %259 = vector.load %arg7[%c8_151, %c0_152, %c0_153] : memref<9x8x8xf32, #tpu.memory_space<vmem>>, vector<1x8x8xf32>
    %260 = vector.shape_cast %259 : vector<1x8x8xf32> to vector<8x8xf32>
    %cst_154 = arith.constant dense<0.000000e+00> : vector<8x256xf32>
    %261 = tpu.matmul %260, %258, %cst_154 {dimension_numbers = #tpu.dot_dimension_numbers<[1], [0], [0], [1], [0, 0, 1, 1], [], []>} : vector<8x8xf32>, vector<8x256xf32>, vector<8x256xf32> -> vector<8x256xf32>
    %262 = arith.addf %251, %261 : vector<8x256xf32>
    %263 = vector.broadcast %5 : vector<8x1xf32> to vector<8x256xf32>
    %264 = arith.addf %262, %263 : vector<8x256xf32>
    %c0_155 = arith.constant 0 : index
    %c0_156 = arith.constant 0 : index
    %265 = vector.load %arg8[%c0_155, %c0_156] : memref<8x4xf32, #tpu.memory_space<vmem>>, vector<8x4xf32>
    %cst_157 = arith.constant dense<0.000000e+00> : vector<8x256xf32>
    %266 = tpu.matmul %265, %10, %cst_157 {dimension_numbers = #tpu.dot_dimension_numbers<[1], [0], [0], [1], [0, 0, 1, 1], [], []>} : vector<8x4xf32>, vector<4x256xf32>, vector<8x256xf32> -> vector<8x256xf32>
    %267 = vector.broadcast %6 : vector<8x1xf32> to vector<8x256xf32>
    %268 = arith.addf %266, %267 : vector<8x256xf32>
    %269 = arith.addf %264, %268 : vector<8x256xf32>
    %c0_158 = arith.constant 0 : index
    %c0_159 = arith.constant 0 : index
    %c0_160 = arith.constant 0 : index
    %270 = vector.load %arg9[%c0_158, %c0_159, %c0_160] : memref<2x8x256xf32, #tpu.memory_space<vmem>>, vector<1x8x256xf32>
    %271 = vector.shape_cast %270 : vector<1x8x256xf32> to vector<8x256xf32>
    %272 = vector.shape_cast %269 : vector<8x256xf32> to vector<1x8x256xf32>
    tpu.vector_store %arg9[%c0_158, %c0_159, %c0_160], %272 {strides = array<i32>} : memref<2x8x256xf32, #tpu.memory_space<vmem>>, vector<1x8x256xf32>,
    %c1_161 = arith.constant 1 : index
    %c0_162 = arith.constant 0 : index
    %c0_163 = arith.constant 0 : index
    %273 = vector.load %arg0[%c1_161, %c0_162, %c0_163] : memref<2x4x256xf32, #tpu.memory_space<vmem>>, vector<1x4x256xf32>
    %274 = vector.shape_cast %273 : vector<1x4x256xf32> to vector<4x256xf32>
    %cst_164 = arith.constant dense<0.000000e+00> : vector<4x256xf32>
    %275 = tpu.matmul %7, %274, %cst_164 {dimension_numbers = #tpu.dot_dimension_numbers<[1], [0], [0], [1], [0, 0, 1, 1], [], []>} : vector<4x4xf32>, vector<4x256xf32>, vector<4x256xf32> -> vector<4x256xf32>
    %cst_165 = arith.constant dense<0.000000e+00> : vector<4xf32>
    %276 = vector.multi_reduction <add>, %275, %cst_165 [1] : vector<4x256xf32> to vector<4xf32>
    %277 = vector.shape_cast %276 : vector<4xf32> to vector<4x1xf32>
    %cst_166 = arith.constant 2.560000e+02 : f32
    %278 = vector.broadcast %cst_166 : f32 to vector<4x1xf32>
    %279 = arith.divf %277, %278 : vector<4x1xf32>
    %280 = vector.broadcast %279 : vector<4x1xf32> to vector<4x256xf32>
    %281 = arith.subf %274, %280 : vector<4x256xf32>
    %282 = arith.mulf %281, %281 : vector<4x256xf32>
    %cst_167 = arith.constant dense<0.000000e+00> : vector<4x256xf32>
    %283 = tpu.matmul %7, %282, %cst_167 {dimension_numbers = #tpu.dot_dimension_numbers<[1], [0], [0], [1], [0, 0, 1, 1], [], []>} : vector<4x4xf32>, vector<4x256xf32>, vector<4x256xf32> -> vector<4x256xf32>
    %cst_168 = arith.constant dense<0.000000e+00> : vector<4xf32>
    %284 = vector.multi_reduction <add>, %283, %cst_168 [1] : vector<4x256xf32> to vector<4xf32>
    %285 = vector.shape_cast %284 : vector<4xf32> to vector<4x1xf32>
    %cst_169 = arith.constant 2.560000e+02 : f32
    %286 = vector.broadcast %cst_169 : f32 to vector<4x1xf32>
    %287 = arith.divf %285, %286 : vector<4x1xf32>
    %cst_170 = arith.constant 9.99999974E-6 : f32
    %288 = vector.broadcast %cst_170 : f32 to vector<4x1xf32>
    %289 = arith.addf %287, %288 : vector<4x1xf32>
    %290 = math.rsqrt %289 : vector<4x1xf32>
    %291 = vector.broadcast %290 : vector<4x1xf32> to vector<4x256xf32>
    %292 = arith.mulf %281, %291 : vector<4x256xf32>
    %293 = vector.broadcast %0 : vector<4x1xf32> to vector<4x256xf32>
    %294 = arith.mulf %292, %293 : vector<4x256xf32>
    %295 = vector.broadcast %1 : vector<4x1xf32> to vector<4x256xf32>
    %296 = arith.addf %294, %295 : vector<4x256xf32>
    %297 = arith.negf %296 : vector<4x256xf32>
    %298 = math.exp %297 : vector<4x256xf32>
    %cst_171 = arith.constant 1.000000e+00 : f32
    %299 = vector.broadcast %cst_171 : f32 to vector<4x256xf32>
    %300 = arith.addf %299, %298 : vector<4x256xf32>
    %301 = arith.divf %299, %300 : vector<4x256xf32>
    %302 = arith.mulf %296, %301 : vector<4x256xf32>
    %cst_172 = arith.constant 0.000000e+00 : f32
    %303 = vector.broadcast %cst_172 : f32 to vector<8x256xf32>
    %304 = vector.extract_strided_slice %302 {offsets = [0, 239], sizes = [4, 17], strides = [1, 1]} : vector<4x256xf32> to vector<4x17xf32>
    %305 = vector.extract_strided_slice %302 {offsets = [0, 0], sizes = [4, 239], strides = [1, 1]} : vector<4x256xf32> to vector<4x239xf32>
    %306 = tpu.concatenate %304, %305 in 1 : vector<4x17xf32>, vector<4x239xf32> -> vector<4x256xf32>
    %c0_173 = arith.constant 0 : index
    %c0_174 = arith.constant 0 : index
    %c0_175 = arith.constant 0 : index
    %307 = vector.load %arg1[%c0_173, %c0_174, %c0_175] : memref<9x1x256xf32, #tpu.memory_space<vmem>>, vector<1x1x256xf32>
    %308 = vector.shape_cast %307 : vector<1x1x256xf32> to vector<1x256xf32>
    %309 = vector.broadcast %308 : vector<1x256xf32> to vector<4x256xf32>
    %310 = arith.mulf %306, %309 : vector<4x256xf32>
    %c0_176 = arith.constant 0 : index
    %c0_177 = arith.constant 0 : index
    %c0_178 = arith.constant 0 : index
    %311 = vector.load %arg6[%c0_176, %c0_177, %c0_178] : memref<9x8x4xf32, #tpu.memory_space<vmem>>, vector<1x8x4xf32>
    %312 = vector.shape_cast %311 : vector<1x8x4xf32> to vector<8x4xf32>
    %cst_179 = arith.constant dense<0.000000e+00> : vector<8x256xf32>
    %313 = tpu.matmul %312, %310, %cst_179 {dimension_numbers = #tpu.dot_dimension_numbers<[1], [0], [0], [1], [0, 0, 1, 1], [], []>} : vector<8x4xf32>, vector<4x256xf32>, vector<8x256xf32> -> vector<8x256xf32>
    %314 = arith.addf %303, %313 : vector<8x256xf32>
    %315 = vector.extract_strided_slice %302 {offsets = [0, 240], sizes = [4, 16], strides = [1, 1]} : vector<4x256xf32> to vector<4x16xf32>
    %316 = vector.extract_strided_slice %302 {offsets = [0, 0], sizes = [4, 240], strides = [1, 1]} : vector<4x256xf32> to vector<4x240xf32>
    %317 = tpu.concatenate %315, %316 in 1 : vector<4x16xf32>, vector<4x240xf32> -> vector<4x256xf32>
    %c1_180 = arith.constant 1 : index
    %c0_181 = arith.constant 0 : index
    %c0_182 = arith.constant 0 : index
    %318 = vector.load %arg1[%c1_180, %c0_181, %c0_182] : memref<9x1x256xf32, #tpu.memory_space<vmem>>, vector<1x1x256xf32>
    %319 = vector.shape_cast %318 : vector<1x1x256xf32> to vector<1x256xf32>
    %320 = vector.broadcast %319 : vector<1x256xf32> to vector<4x256xf32>
    %321 = arith.mulf %317, %320 : vector<4x256xf32>
    %c1_183 = arith.constant 1 : index
    %c0_184 = arith.constant 0 : index
    %c0_185 = arith.constant 0 : index
    %322 = vector.load %arg6[%c1_183, %c0_184, %c0_185] : memref<9x8x4xf32, #tpu.memory_space<vmem>>, vector<1x8x4xf32>
    %323 = vector.shape_cast %322 : vector<1x8x4xf32> to vector<8x4xf32>
    %cst_186 = arith.constant dense<0.000000e+00> : vector<8x256xf32>
    %324 = tpu.matmul %323, %321, %cst_186 {dimension_numbers = #tpu.dot_dimension_numbers<[1], [0], [0], [1], [0, 0, 1, 1], [], []>} : vector<8x4xf32>, vector<4x256xf32>, vector<8x256xf32> -> vector<8x256xf32>
    %325 = arith.addf %314, %324 : vector<8x256xf32>
    %326 = vector.extract_strided_slice %302 {offsets = [0, 241], sizes = [4, 15], strides = [1, 1]} : vector<4x256xf32> to vector<4x15xf32>
    %327 = vector.extract_strided_slice %302 {offsets = [0, 0], sizes = [4, 241], strides = [1, 1]} : vector<4x256xf32> to vector<4x241xf32>
    %328 = tpu.concatenate %326, %327 in 1 : vector<4x15xf32>, vector<4x241xf32> -> vector<4x256xf32>
    %c2_187 = arith.constant 2 : index
    %c0_188 = arith.constant 0 : index
    %c0_189 = arith.constant 0 : index
    %329 = vector.load %arg1[%c2_187, %c0_188, %c0_189] : memref<9x1x256xf32, #tpu.memory_space<vmem>>, vector<1x1x256xf32>
    %330 = vector.shape_cast %329 : vector<1x1x256xf32> to vector<1x256xf32>
    %331 = vector.broadcast %330 : vector<1x256xf32> to vector<4x256xf32>
    %332 = arith.mulf %328, %331 : vector<4x256xf32>
    %c2_190 = arith.constant 2 : index
    %c0_191 = arith.constant 0 : index
    %c0_192 = arith.constant 0 : index
    %333 = vector.load %arg6[%c2_190, %c0_191, %c0_192] : memref<9x8x4xf32, #tpu.memory_space<vmem>>, vector<1x8x4xf32>
    %334 = vector.shape_cast %333 : vector<1x8x4xf32> to vector<8x4xf32>
    %cst_193 = arith.constant dense<0.000000e+00> : vector<8x256xf32>
    %335 = tpu.matmul %334, %332, %cst_193 {dimension_numbers = #tpu.dot_dimension_numbers<[1], [0], [0], [1], [0, 0, 1, 1], [], []>} : vector<8x4xf32>, vector<4x256xf32>, vector<8x256xf32> -> vector<8x256xf32>
    %336 = arith.addf %325, %335 : vector<8x256xf32>
    %337 = vector.extract_strided_slice %302 {offsets = [0, 255], sizes = [4, 1], strides = [1, 1]} : vector<4x256xf32> to vector<4x1xf32>
    %338 = vector.extract_strided_slice %302 {offsets = [0, 0], sizes = [4, 255], strides = [1, 1]} : vector<4x256xf32> to vector<4x255xf32>
    %339 = tpu.concatenate %337, %338 in 1 : vector<4x1xf32>, vector<4x255xf32> -> vector<4x256xf32>
    %c3_194 = arith.constant 3 : index
    %c0_195 = arith.constant 0 : index
    %c0_196 = arith.constant 0 : index
    %340 = vector.load %arg1[%c3_194, %c0_195, %c0_196] : memref<9x1x256xf32, #tpu.memory_space<vmem>>, vector<1x1x256xf32>
    %341 = vector.shape_cast %340 : vector<1x1x256xf32> to vector<1x256xf32>
    %342 = vector.broadcast %341 : vector<1x256xf32> to vector<4x256xf32>
    %343 = arith.mulf %339, %342 : vector<4x256xf32>
    %c3_197 = arith.constant 3 : index
    %c0_198 = arith.constant 0 : index
    %c0_199 = arith.constant 0 : index
    %344 = vector.load %arg6[%c3_197, %c0_198, %c0_199] : memref<9x8x4xf32, #tpu.memory_space<vmem>>, vector<1x8x4xf32>
    %345 = vector.shape_cast %344 : vector<1x8x4xf32> to vector<8x4xf32>
    %cst_200 = arith.constant dense<0.000000e+00> : vector<8x256xf32>
    %346 = tpu.matmul %345, %343, %cst_200 {dimension_numbers = #tpu.dot_dimension_numbers<[1], [0], [0], [1], [0, 0, 1, 1], [], []>} : vector<8x4xf32>, vector<4x256xf32>, vector<8x256xf32> -> vector<8x256xf32>
    %347 = arith.addf %336, %346 : vector<8x256xf32>
    %c4_201 = arith.constant 4 : index
    %c0_202 = arith.constant 0 : index
    %c0_203 = arith.constant 0 : index
    %348 = vector.load %arg1[%c4_201, %c0_202, %c0_203] : memref<9x1x256xf32, #tpu.memory_space<vmem>>, vector<1x1x256xf32>
    %349 = vector.shape_cast %348 : vector<1x1x256xf32> to vector<1x256xf32>
    %350 = vector.broadcast %349 : vector<1x256xf32> to vector<4x256xf32>
    %351 = arith.mulf %302, %350 : vector<4x256xf32>
    %c4_204 = arith.constant 4 : index
    %c0_205 = arith.constant 0 : index
    %c0_206 = arith.constant 0 : index
    %352 = vector.load %arg6[%c4_204, %c0_205, %c0_206] : memref<9x8x4xf32, #tpu.memory_space<vmem>>, vector<1x8x4xf32>
    %353 = vector.shape_cast %352 : vector<1x8x4xf32> to vector<8x4xf32>
    %cst_207 = arith.constant dense<0.000000e+00> : vector<8x256xf32>
    %354 = tpu.matmul %353, %351, %cst_207 {dimension_numbers = #tpu.dot_dimension_numbers<[1], [0], [0], [1], [0, 0, 1, 1], [], []>} : vector<8x4xf32>, vector<4x256xf32>, vector<8x256xf32> -> vector<8x256xf32>
    %355 = arith.addf %347, %354 : vector<8x256xf32>
    %356 = vector.extract_strided_slice %302 {offsets = [0, 1], sizes = [4, 255], strides = [1, 1]} : vector<4x256xf32> to vector<4x255xf32>
    %357 = vector.extract_strided_slice %302 {offsets = [0, 0], sizes = [4, 1], strides = [1, 1]} : vector<4x256xf32> to vector<4x1xf32>
    %358 = tpu.concatenate %356, %357 in 1 : vector<4x255xf32>, vector<4x1xf32> -> vector<4x256xf32>
    %c5_208 = arith.constant 5 : index
    %c0_209 = arith.constant 0 : index
    %c0_210 = arith.constant 0 : index
    %359 = vector.load %arg1[%c5_208, %c0_209, %c0_210] : memref<9x1x256xf32, #tpu.memory_space<vmem>>, vector<1x1x256xf32>
    %360 = vector.shape_cast %359 : vector<1x1x256xf32> to vector<1x256xf32>
    %361 = vector.broadcast %360 : vector<1x256xf32> to vector<4x256xf32>
    %362 = arith.mulf %358, %361 : vector<4x256xf32>
    %c5_211 = arith.constant 5 : index
    %c0_212 = arith.constant 0 : index
    %c0_213 = arith.constant 0 : index
    %363 = vector.load %arg6[%c5_211, %c0_212, %c0_213] : memref<9x8x4xf32, #tpu.memory_space<vmem>>, vector<1x8x4xf32>
    %364 = vector.shape_cast %363 : vector<1x8x4xf32> to vector<8x4xf32>
    %cst_214 = arith.constant dense<0.000000e+00> : vector<8x256xf32>
    %365 = tpu.matmul %364, %362, %cst_214 {dimension_numbers = #tpu.dot_dimension_numbers<[1], [0], [0], [1], [0, 0, 1, 1], [], []>} : vector<8x4xf32>, vector<4x256xf32>, vector<8x256xf32> -> vector<8x256xf32>
    %366 = arith.addf %355, %365 : vector<8x256xf32>
    %367 = vector.extract_strided_slice %302 {offsets = [0, 15], sizes = [4, 241], strides = [1, 1]} : vector<4x256xf32> to vector<4x241xf32>
    %368 = vector.extract_strided_slice %302 {offsets = [0, 0], sizes = [4, 15], strides = [1, 1]} : vector<4x256xf32> to vector<4x15xf32>
    %369 = tpu.concatenate %367, %368 in 1 : vector<4x241xf32>, vector<4x15xf32> -> vector<4x256xf32>
    %c6_215 = arith.constant 6 : index
    %c0_216 = arith.constant 0 : index
    %c0_217 = arith.constant 0 : index
    %370 = vector.load %arg1[%c6_215, %c0_216, %c0_217] : memref<9x1x256xf32, #tpu.memory_space<vmem>>, vector<1x1x256xf32>
    %371 = vector.shape_cast %370 : vector<1x1x256xf32> to vector<1x256xf32>
    %372 = vector.broadcast %371 : vector<1x256xf32> to vector<4x256xf32>
    %373 = arith.mulf %369, %372 : vector<4x256xf32>
    %c6_218 = arith.constant 6 : index
    %c0_219 = arith.constant 0 : index
    %c0_220 = arith.constant 0 : index
    %374 = vector.load %arg6[%c6_218, %c0_219, %c0_220] : memref<9x8x4xf32, #tpu.memory_space<vmem>>, vector<1x8x4xf32>
    %375 = vector.shape_cast %374 : vector<1x8x4xf32> to vector<8x4xf32>
    %cst_221 = arith.constant dense<0.000000e+00> : vector<8x256xf32>
    %376 = tpu.matmul %375, %373, %cst_221 {dimension_numbers = #tpu.dot_dimension_numbers<[1], [0], [0], [1], [0, 0, 1, 1], [], []>} : vector<8x4xf32>, vector<4x256xf32>, vector<8x256xf32> -> vector<8x256xf32>
    %377 = arith.addf %366, %376 : vector<8x256xf32>
    %378 = vector.extract_strided_slice %302 {offsets = [0, 16], sizes = [4, 240], strides = [1, 1]} : vector<4x256xf32> to vector<4x240xf32>
    %379 = vector.extract_strided_slice %302 {offsets = [0, 0], sizes = [4, 16], strides = [1, 1]} : vector<4x256xf32> to vector<4x16xf32>
    %380 = tpu.concatenate %378, %379 in 1 : vector<4x240xf32>, vector<4x16xf32> -> vector<4x256xf32>
    %c7_222 = arith.constant 7 : index
    %c0_223 = arith.constant 0 : index
    %c0_224 = arith.constant 0 : index
    %381 = vector.load %arg1[%c7_222, %c0_223, %c0_224] : memref<9x1x256xf32, #tpu.memory_space<vmem>>, vector<1x1x256xf32>
    %382 = vector.shape_cast %381 : vector<1x1x256xf32> to vector<1x256xf32>
    %383 = vector.broadcast %382 : vector<1x256xf32> to vector<4x256xf32>
    %384 = arith.mulf %380, %383 : vector<4x256xf32>
    %c7_225 = arith.constant 7 : index
    %c0_226 = arith.constant 0 : index
    %c0_227 = arith.constant 0 : index
    %385 = vector.load %arg6[%c7_225, %c0_226, %c0_227] : memref<9x8x4xf32, #tpu.memory_space<vmem>>, vector<1x8x4xf32>
    %386 = vector.shape_cast %385 : vector<1x8x4xf32> to vector<8x4xf32>
    %cst_228 = arith.constant dense<0.000000e+00> : vector<8x256xf32>
    %387 = tpu.matmul %386, %384, %cst_228 {dimension_numbers = #tpu.dot_dimension_numbers<[1], [0], [0], [1], [0, 0, 1, 1], [], []>} : vector<8x4xf32>, vector<4x256xf32>, vector<8x256xf32> -> vector<8x256xf32>
    %388 = arith.addf %377, %387 : vector<8x256xf32>
    %389 = vector.extract_strided_slice %302 {offsets = [0, 17], sizes = [4, 239], strides = [1, 1]} : vector<4x256xf32> to vector<4x239xf32>
    %390 = vector.extract_strided_slice %302 {offsets = [0, 0], sizes = [4, 17], strides = [1, 1]} : vector<4x256xf32> to vector<4x17xf32>
    %391 = tpu.concatenate %389, %390 in 1 : vector<4x239xf32>, vector<4x17xf32> -> vector<4x256xf32>
    %c8_229 = arith.constant 8 : index
    %c0_230 = arith.constant 0 : index
    %c0_231 = arith.constant 0 : index
    %392 = vector.load %arg1[%c8_229, %c0_230, %c0_231] : memref<9x1x256xf32, #tpu.memory_space<vmem>>, vector<1x1x256xf32>
    %393 = vector.shape_cast %392 : vector<1x1x256xf32> to vector<1x256xf32>
    %394 = vector.broadcast %393 : vector<1x256xf32> to vector<4x256xf32>
    %395 = arith.mulf %391, %394 : vector<4x256xf32>
    %c8_232 = arith.constant 8 : index
    %c0_233 = arith.constant 0 : index
    %c0_234 = arith.constant 0 : index
    %396 = vector.load %arg6[%c8_232, %c0_233, %c0_234] : memref<9x8x4xf32, #tpu.memory_space<vmem>>, vector<1x8x4xf32>
    %397 = vector.shape_cast %396 : vector<1x8x4xf32> to vector<8x4xf32>
    %cst_235 = arith.constant dense<0.000000e+00> : vector<8x256xf32>
    %398 = tpu.matmul %397, %395, %cst_235 {dimension_numbers = #tpu.dot_dimension_numbers<[1], [0], [0], [1], [0, 0, 1, 1], [], []>} : vector<8x4xf32>, vector<4x256xf32>, vector<8x256xf32> -> vector<8x256xf32>
    %399 = arith.addf %388, %398 : vector<8x256xf32>
    %400 = vector.broadcast %4 : vector<8x1xf32> to vector<8x256xf32>
    %401 = arith.addf %399, %400 : vector<8x256xf32>
    %cst_236 = arith.constant dense<0.000000e+00> : vector<8x256xf32>
    %402 = tpu.matmul %8, %401, %cst_236 {dimension_numbers = #tpu.dot_dimension_numbers<[1], [0], [0], [1], [0, 0, 1, 1], [], []>} : vector<8x8xf32>, vector<8x256xf32>, vector<8x256xf32> -> vector<8x256xf32>
    %cst_237 = arith.constant dense<0.000000e+00> : vector<8xf32>
    %403 = vector.multi_reduction <add>, %402, %cst_237 [1] : vector<8x256xf32> to vector<8xf32>
    %404 = vector.shape_cast %403 : vector<8xf32> to vector<8x1xf32>
    %cst_238 = arith.constant 2.560000e+02 : f32
    %405 = vector.broadcast %cst_238 : f32 to vector<8x1xf32>
    %406 = arith.divf %404, %405 : vector<8x1xf32>
    %407 = vector.broadcast %406 : vector<8x1xf32> to vector<8x256xf32>
    %408 = arith.subf %401, %407 : vector<8x256xf32>
    %409 = arith.mulf %408, %408 : vector<8x256xf32>
    %cst_239 = arith.constant dense<0.000000e+00> : vector<8x256xf32>
    %410 = tpu.matmul %8, %409, %cst_239 {dimension_numbers = #tpu.dot_dimension_numbers<[1], [0], [0], [1], [0, 0, 1, 1], [], []>} : vector<8x8xf32>, vector<8x256xf32>, vector<8x256xf32> -> vector<8x256xf32>
    %cst_240 = arith.constant dense<0.000000e+00> : vector<8xf32>
    %411 = vector.multi_reduction <add>, %410, %cst_240 [1] : vector<8x256xf32> to vector<8xf32>
    %412 = vector.shape_cast %411 : vector<8xf32> to vector<8x1xf32>
    %cst_241 = arith.constant 2.560000e+02 : f32
    %413 = vector.broadcast %cst_241 : f32 to vector<8x1xf32>
    %414 = arith.divf %412, %413 : vector<8x1xf32>
    %cst_242 = arith.constant 9.99999974E-6 : f32
    %415 = vector.broadcast %cst_242 : f32 to vector<8x1xf32>
    %416 = arith.addf %414, %415 : vector<8x1xf32>
    %417 = math.rsqrt %416 : vector<8x1xf32>
    %418 = vector.broadcast %417 : vector<8x1xf32> to vector<8x256xf32>
    %419 = arith.mulf %408, %418 : vector<8x256xf32>
    %420 = vector.broadcast %2 : vector<8x1xf32> to vector<8x256xf32>
    %421 = arith.mulf %419, %420 : vector<8x256xf32>
    %422 = vector.broadcast %3 : vector<8x1xf32> to vector<8x256xf32>
    %423 = arith.addf %421, %422 : vector<8x256xf32>
    %424 = arith.negf %423 : vector<8x256xf32>
    %425 = math.exp %424 : vector<8x256xf32>
    %cst_243 = arith.constant 1.000000e+00 : f32
    %426 = vector.broadcast %cst_243 : f32 to vector<8x256xf32>
    %427 = arith.addf %426, %425 : vector<8x256xf32>
    %428 = arith.divf %426, %427 : vector<8x256xf32>
    %429 = arith.mulf %423, %428 : vector<8x256xf32>
    %cst_244 = arith.constant 0.000000e+00 : f32
    %430 = vector.broadcast %cst_244 : f32 to vector<8x256xf32>
    %431 = vector.extract_strided_slice %429 {offsets = [0, 239], sizes = [8, 17], strides = [1, 1]} : vector<8x256xf32> to vector<8x17xf32>
    %432 = vector.extract_strided_slice %429 {offsets = [0, 0], sizes = [8, 239], strides = [1, 1]} : vector<8x256xf32> to vector<8x239xf32>
    %433 = tpu.concatenate %431, %432 in 1 : vector<8x17xf32>, vector<8x239xf32> -> vector<8x256xf32>
    %c0_245 = arith.constant 0 : index
    %c0_246 = arith.constant 0 : index
    %c0_247 = arith.constant 0 : index
    %434 = vector.load %arg1[%c0_245, %c0_246, %c0_247] : memref<9x1x256xf32, #tpu.memory_space<vmem>>, vector<1x1x256xf32>
    %435 = vector.shape_cast %434 : vector<1x1x256xf32> to vector<1x256xf32>
    %436 = vector.broadcast %435 : vector<1x256xf32> to vector<8x256xf32>
    %437 = arith.mulf %433, %436 : vector<8x256xf32>
    %c0_248 = arith.constant 0 : index
    %c0_249 = arith.constant 0 : index
    %c0_250 = arith.constant 0 : index
    %438 = vector.load %arg7[%c0_248, %c0_249, %c0_250] : memref<9x8x8xf32, #tpu.memory_space<vmem>>, vector<1x8x8xf32>
    %439 = vector.shape_cast %438 : vector<1x8x8xf32> to vector<8x8xf32>
    %cst_251 = arith.constant dense<0.000000e+00> : vector<8x256xf32>
    %440 = tpu.matmul %439, %437, %cst_251 {dimension_numbers = #tpu.dot_dimension_numbers<[1], [0], [0], [1], [0, 0, 1, 1], [], []>} : vector<8x8xf32>, vector<8x256xf32>, vector<8x256xf32> -> vector<8x256xf32>
    %441 = arith.addf %430, %440 : vector<8x256xf32>
    %442 = vector.extract_strided_slice %429 {offsets = [0, 240], sizes = [8, 16], strides = [1, 1]} : vector<8x256xf32> to vector<8x16xf32>
    %443 = vector.extract_strided_slice %429 {offsets = [0, 0], sizes = [8, 240], strides = [1, 1]} : vector<8x256xf32> to vector<8x240xf32>
    %444 = tpu.concatenate %442, %443 in 1 : vector<8x16xf32>, vector<8x240xf32> -> vector<8x256xf32>
    %c1_252 = arith.constant 1 : index
    %c0_253 = arith.constant 0 : index
    %c0_254 = arith.constant 0 : index
    %445 = vector.load %arg1[%c1_252, %c0_253, %c0_254] : memref<9x1x256xf32, #tpu.memory_space<vmem>>, vector<1x1x256xf32>
    %446 = vector.shape_cast %445 : vector<1x1x256xf32> to vector<1x256xf32>
    %447 = vector.broadcast %446 : vector<1x256xf32> to vector<8x256xf32>
    %448 = arith.mulf %444, %447 : vector<8x256xf32>
    %c1_255 = arith.constant 1 : index
    %c0_256 = arith.constant 0 : index
    %c0_257 = arith.constant 0 : index
    %449 = vector.load %arg7[%c1_255, %c0_256, %c0_257] : memref<9x8x8xf32, #tpu.memory_space<vmem>>, vector<1x8x8xf32>
    %450 = vector.shape_cast %449 : vector<1x8x8xf32> to vector<8x8xf32>
    %cst_258 = arith.constant dense<0.000000e+00> : vector<8x256xf32>
    %451 = tpu.matmul %450, %448, %cst_258 {dimension_numbers = #tpu.dot_dimension_numbers<[1], [0], [0], [1], [0, 0, 1, 1], [], []>} : vector<8x8xf32>, vector<8x256xf32>, vector<8x256xf32> -> vector<8x256xf32>
    %452 = arith.addf %441, %451 : vector<8x256xf32>
    %453 = vector.extract_strided_slice %429 {offsets = [0, 241], sizes = [8, 15], strides = [1, 1]} : vector<8x256xf32> to vector<8x15xf32>
    %454 = vector.extract_strided_slice %429 {offsets = [0, 0], sizes = [8, 241], strides = [1, 1]} : vector<8x256xf32> to vector<8x241xf32>
    %455 = tpu.concatenate %453, %454 in 1 : vector<8x15xf32>, vector<8x241xf32> -> vector<8x256xf32>
    %c2_259 = arith.constant 2 : index
    %c0_260 = arith.constant 0 : index
    %c0_261 = arith.constant 0 : index
    %456 = vector.load %arg1[%c2_259, %c0_260, %c0_261] : memref<9x1x256xf32, #tpu.memory_space<vmem>>, vector<1x1x256xf32>
    %457 = vector.shape_cast %456 : vector<1x1x256xf32> to vector<1x256xf32>
    %458 = vector.broadcast %457 : vector<1x256xf32> to vector<8x256xf32>
    %459 = arith.mulf %455, %458 : vector<8x256xf32>
    %c2_262 = arith.constant 2 : index
    %c0_263 = arith.constant 0 : index
    %c0_264 = arith.constant 0 : index
    %460 = vector.load %arg7[%c2_262, %c0_263, %c0_264] : memref<9x8x8xf32, #tpu.memory_space<vmem>>, vector<1x8x8xf32>
    %461 = vector.shape_cast %460 : vector<1x8x8xf32> to vector<8x8xf32>
    %cst_265 = arith.constant dense<0.000000e+00> : vector<8x256xf32>
    %462 = tpu.matmul %461, %459, %cst_265 {dimension_numbers = #tpu.dot_dimension_numbers<[1], [0], [0], [1], [0, 0, 1, 1], [], []>} : vector<8x8xf32>, vector<8x256xf32>, vector<8x256xf32> -> vector<8x256xf32>
    %463 = arith.addf %452, %462 : vector<8x256xf32>
    %464 = vector.extract_strided_slice %429 {offsets = [0, 255], sizes = [8, 1], strides = [1, 1]} : vector<8x256xf32> to vector<8x1xf32>
    %465 = vector.extract_strided_slice %429 {offsets = [0, 0], sizes = [8, 255], strides = [1, 1]} : vector<8x256xf32> to vector<8x255xf32>
    %466 = tpu.concatenate %464, %465 in 1 : vector<8x1xf32>, vector<8x255xf32> -> vector<8x256xf32>
    %c3_266 = arith.constant 3 : index
    %c0_267 = arith.constant 0 : index
    %c0_268 = arith.constant 0 : index
    %467 = vector.load %arg1[%c3_266, %c0_267, %c0_268] : memref<9x1x256xf32, #tpu.memory_space<vmem>>, vector<1x1x256xf32>
    %468 = vector.shape_cast %467 : vector<1x1x256xf32> to vector<1x256xf32>
    %469 = vector.broadcast %468 : vector<1x256xf32> to vector<8x256xf32>
    %470 = arith.mulf %466, %469 : vector<8x256xf32>
    %c3_269 = arith.constant 3 : index
    %c0_270 = arith.constant 0 : index
    %c0_271 = arith.constant 0 : index
    %471 = vector.load %arg7[%c3_269, %c0_270, %c0_271] : memref<9x8x8xf32, #tpu.memory_space<vmem>>, vector<1x8x8xf32>
    %472 = vector.shape_cast %471 : vector<1x8x8xf32> to vector<8x8xf32>
    %cst_272 = arith.constant dense<0.000000e+00> : vector<8x256xf32>
    %473 = tpu.matmul %472, %470, %cst_272 {dimension_numbers = #tpu.dot_dimension_numbers<[1], [0], [0], [1], [0, 0, 1, 1], [], []>} : vector<8x8xf32>, vector<8x256xf32>, vector<8x256xf32> -> vector<8x256xf32>
    %474 = arith.addf %463, %473 : vector<8x256xf32>
    %c4_273 = arith.constant 4 : index
    %c0_274 = arith.constant 0 : index
    %c0_275 = arith.constant 0 : index
    %475 = vector.load %arg1[%c4_273, %c0_274, %c0_275] : memref<9x1x256xf32, #tpu.memory_space<vmem>>, vector<1x1x256xf32>
    %476 = vector.shape_cast %475 : vector<1x1x256xf32> to vector<1x256xf32>
    %477 = vector.broadcast %476 : vector<1x256xf32> to vector<8x256xf32>
    %478 = arith.mulf %429, %477 : vector<8x256xf32>
    %c4_276 = arith.constant 4 : index
    %c0_277 = arith.constant 0 : index
    %c0_278 = arith.constant 0 : index
    %479 = vector.load %arg7[%c4_276, %c0_277, %c0_278] : memref<9x8x8xf32, #tpu.memory_space<vmem>>, vector<1x8x8xf32>
    %480 = vector.shape_cast %479 : vector<1x8x8xf32> to vector<8x8xf32>
    %cst_279 = arith.constant dense<0.000000e+00> : vector<8x256xf32>
    %481 = tpu.matmul %480, %478, %cst_279 {dimension_numbers = #tpu.dot_dimension_numbers<[1], [0], [0], [1], [0, 0, 1, 1], [], []>} : vector<8x8xf32>, vector<8x256xf32>, vector<8x256xf32> -> vector<8x256xf32>
    %482 = arith.addf %474, %481 : vector<8x256xf32>
    %483 = vector.extract_strided_slice %429 {offsets = [0, 1], sizes = [8, 255], strides = [1, 1]} : vector<8x256xf32> to vector<8x255xf32>
    %484 = vector.extract_strided_slice %429 {offsets = [0, 0], sizes = [8, 1], strides = [1, 1]} : vector<8x256xf32> to vector<8x1xf32>
    %485 = tpu.concatenate %483, %484 in 1 : vector<8x255xf32>, vector<8x1xf32> -> vector<8x256xf32>
    %c5_280 = arith.constant 5 : index
    %c0_281 = arith.constant 0 : index
    %c0_282 = arith.constant 0 : index
    %486 = vector.load %arg1[%c5_280, %c0_281, %c0_282] : memref<9x1x256xf32, #tpu.memory_space<vmem>>, vector<1x1x256xf32>
    %487 = vector.shape_cast %486 : vector<1x1x256xf32> to vector<1x256xf32>
    %488 = vector.broadcast %487 : vector<1x256xf32> to vector<8x256xf32>
    %489 = arith.mulf %485, %488 : vector<8x256xf32>
    %c5_283 = arith.constant 5 : index
    %c0_284 = arith.constant 0 : index
    %c0_285 = arith.constant 0 : index
    %490 = vector.load %arg7[%c5_283, %c0_284, %c0_285] : memref<9x8x8xf32, #tpu.memory_space<vmem>>, vector<1x8x8xf32>
    %491 = vector.shape_cast %490 : vector<1x8x8xf32> to vector<8x8xf32>
    %cst_286 = arith.constant dense<0.000000e+00> : vector<8x256xf32>
    %492 = tpu.matmul %491, %489, %cst_286 {dimension_numbers = #tpu.dot_dimension_numbers<[1], [0], [0], [1], [0, 0, 1, 1], [], []>} : vector<8x8xf32>, vector<8x256xf32>, vector<8x256xf32> -> vector<8x256xf32>
    %493 = arith.addf %482, %492 : vector<8x256xf32>
    %494 = vector.extract_strided_slice %429 {offsets = [0, 15], sizes = [8, 241], strides = [1, 1]} : vector<8x256xf32> to vector<8x241xf32>
    %495 = vector.extract_strided_slice %429 {offsets = [0, 0], sizes = [8, 15], strides = [1, 1]} : vector<8x256xf32> to vector<8x15xf32>
    %496 = tpu.concatenate %494, %495 in 1 : vector<8x241xf32>, vector<8x15xf32> -> vector<8x256xf32>
    %c6_287 = arith.constant 6 : index
    %c0_288 = arith.constant 0 : index
    %c0_289 = arith.constant 0 : index
    %497 = vector.load %arg1[%c6_287, %c0_288, %c0_289] : memref<9x1x256xf32, #tpu.memory_space<vmem>>, vector<1x1x256xf32>
    %498 = vector.shape_cast %497 : vector<1x1x256xf32> to vector<1x256xf32>
    %499 = vector.broadcast %498 : vector<1x256xf32> to vector<8x256xf32>
    %500 = arith.mulf %496, %499 : vector<8x256xf32>
    %c6_290 = arith.constant 6 : index
    %c0_291 = arith.constant 0 : index
    %c0_292 = arith.constant 0 : index
    %501 = vector.load %arg7[%c6_290, %c0_291, %c0_292] : memref<9x8x8xf32, #tpu.memory_space<vmem>>, vector<1x8x8xf32>
    %502 = vector.shape_cast %501 : vector<1x8x8xf32> to vector<8x8xf32>
    %cst_293 = arith.constant dense<0.000000e+00> : vector<8x256xf32>
    %503 = tpu.matmul %502, %500, %cst_293 {dimension_numbers = #tpu.dot_dimension_numbers<[1], [0], [0], [1], [0, 0, 1, 1], [], []>} : vector<8x8xf32>, vector<8x256xf32>, vector<8x256xf32> -> vector<8x256xf32>
    %504 = arith.addf %493, %503 : vector<8x256xf32>
    %505 = vector.extract_strided_slice %429 {offsets = [0, 16], sizes = [8, 240], strides = [1, 1]} : vector<8x256xf32> to vector<8x240xf32>
    %506 = vector.extract_strided_slice %429 {offsets = [0, 0], sizes = [8, 16], strides = [1, 1]} : vector<8x256xf32> to vector<8x16xf32>
    %507 = tpu.concatenate %505, %506 in 1 : vector<8x240xf32>, vector<8x16xf32> -> vector<8x256xf32>
    %c7_294 = arith.constant 7 : index
    %c0_295 = arith.constant 0 : index
    %c0_296 = arith.constant 0 : index
    %508 = vector.load %arg1[%c7_294, %c0_295, %c0_296] : memref<9x1x256xf32, #tpu.memory_space<vmem>>, vector<1x1x256xf32>
    %509 = vector.shape_cast %508 : vector<1x1x256xf32> to vector<1x256xf32>
    %510 = vector.broadcast %509 : vector<1x256xf32> to vector<8x256xf32>
    %511 = arith.mulf %507, %510 : vector<8x256xf32>
    %c7_297 = arith.constant 7 : index
    %c0_298 = arith.constant 0 : index
    %c0_299 = arith.constant 0 : index
    %512 = vector.load %arg7[%c7_297, %c0_298, %c0_299] : memref<9x8x8xf32, #tpu.memory_space<vmem>>, vector<1x8x8xf32>
    %513 = vector.shape_cast %512 : vector<1x8x8xf32> to vector<8x8xf32>
    %cst_300 = arith.constant dense<0.000000e+00> : vector<8x256xf32>
    %514 = tpu.matmul %513, %511, %cst_300 {dimension_numbers = #tpu.dot_dimension_numbers<[1], [0], [0], [1], [0, 0, 1, 1], [], []>} : vector<8x8xf32>, vector<8x256xf32>, vector<8x256xf32> -> vector<8x256xf32>
    %515 = arith.addf %504, %514 : vector<8x256xf32>
    %516 = vector.extract_strided_slice %429 {offsets = [0, 17], sizes = [8, 239], strides = [1, 1]} : vector<8x256xf32> to vector<8x239xf32>
    %517 = vector.extract_strided_slice %429 {offsets = [0, 0], sizes = [8, 17], strides = [1, 1]} : vector<8x256xf32> to vector<8x17xf32>
    %518 = tpu.concatenate %516, %517 in 1 : vector<8x239xf32>, vector<8x17xf32> -> vector<8x256xf32>
    %c8_301 = arith.constant 8 : index
    %c0_302 = arith.constant 0 : index
    %c0_303 = arith.constant 0 : index
    %519 = vector.load %arg1[%c8_301, %c0_302, %c0_303] : memref<9x1x256xf32, #tpu.memory_space<vmem>>, vector<1x1x256xf32>
    %520 = vector.shape_cast %519 : vector<1x1x256xf32> to vector<1x256xf32>
    %521 = vector.broadcast %520 : vector<1x256xf32> to vector<8x256xf32>
    %522 = arith.mulf %518, %521 : vector<8x256xf32>
    %c8_304 = arith.constant 8 : index
    %c0_305 = arith.constant 0 : index
    %c0_306 = arith.constant 0 : index
    %523 = vector.load %arg7[%c8_304, %c0_305, %c0_306] : memref<9x8x8xf32, #tpu.memory_space<vmem>>, vector<1x8x8xf32>
    %524 = vector.shape_cast %523 : vector<1x8x8xf32> to vector<8x8xf32>
    %cst_307 = arith.constant dense<0.000000e+00> : vector<8x256xf32>
    %525 = tpu.matmul %524, %522, %cst_307 {dimension_numbers = #tpu.dot_dimension_numbers<[1], [0], [0], [1], [0, 0, 1, 1], [], []>} : vector<8x8xf32>, vector<8x256xf32>, vector<8x256xf32> -> vector<8x256xf32>
    %526 = arith.addf %515, %525 : vector<8x256xf32>
    %527 = vector.broadcast %5 : vector<8x1xf32> to vector<8x256xf32>
    %528 = arith.addf %526, %527 : vector<8x256xf32>
    %c0_308 = arith.constant 0 : index
    %c0_309 = arith.constant 0 : index
    %529 = vector.load %arg8[%c0_308, %c0_309] : memref<8x4xf32, #tpu.memory_space<vmem>>, vector<8x4xf32>
    %cst_310 = arith.constant dense<0.000000e+00> : vector<8x256xf32>
    %530 = tpu.matmul %529, %274, %cst_310 {dimension_numbers = #tpu.dot_dimension_numbers<[1], [0], [0], [1], [0, 0, 1, 1], [], []>} : vector<8x4xf32>, vector<4x256xf32>, vector<8x256xf32> -> vector<8x256xf32>
    %531 = vector.broadcast %6 : vector<8x1xf32> to vector<8x256xf32>
    %532 = arith.addf %530, %531 : vector<8x256xf32>
    %533 = arith.addf %528, %532 : vector<8x256xf32>
    %c1_311 = arith.constant 1 : index
    %c0_312 = arith.constant 0 : index
    %c0_313 = arith.constant 0 : index
    %534 = vector.load %arg9[%c1_311, %c0_312, %c0_313] : memref<2x8x256xf32, #tpu.memory_space<vmem>>, vector<1x8x256xf32>
    %535 = vector.shape_cast %534 : vector<1x8x256xf32> to vector<8x256xf32>
    %536 = vector.shape_cast %533 : vector<8x256xf32> to vector<1x8x256xf32>
    tpu.vector_store %arg9[%c1_311, %c0_312, %c0_313], %536 {strides = array<i32>} : memref<2x8x256xf32, #tpu.memory_space<vmem>>, vector<1x8x256xf32>,
    return
  }
}

</mosaic_0001>

<bundles_post_ra>
// kernel: tpu_custom_call.1
= control target key start
LH: loop header
LB: loop body
LE: loop exit
PB: predicated region body
PF: predicated region fallthrough
CT: control target
= control target key end

     0   :  { %s4453_s0 = inlined_call_operand.vmem [shape: f32[2,4,256], index: 0, kind: input, shape index: {}]   ;;  %s4454_s1 = inlined_call_operand.vmem [shape: f32[9,1,256], index: 1, kind: input, shape index: {}]   ;;  %s4455_s2 = inlined_call_operand.vmem [shape: f32[4,4], index: 2, kind: input, shape index: {}]   ;;  %s4456_s3 = inlined_call_operand.vmem [shape: f32[8,8], index: 3, kind: input, shape index: {}]   ;;  %s4457_s4 = inlined_call_operand.vmem [shape: f32[4,2], index: 4, kind: input, shape index: {}]   ;;  %s4458_s5 = inlined_call_operand.vmem [shape: f32[8,5], index: 5, kind: input, shape index: {}]   ;;  %s4459_s6 = inlined_call_operand.vmem [shape: f32[9,8,4], index: 6, kind: input, shape index: {}]   ;;  %s4460_s7 = inlined_call_operand.vmem [shape: f32[9,8,8], index: 7, kind: input, shape index: {}]   ;;  %s4461_s8 = inlined_call_operand.vmem [shape: f32[8,4], index: 8, kind: input, shape index: {}]   ;;  %s4462_s9 = inlined_call_operand.hbm [shape: f32[2,8,256], index: 9, kind: output, shape index: {}]  }
   0x1   :  { %v3568_v0 = vld [vmem:[%s4453_s0] sm:$0xff] }
   0x2   :  { %39 = vst [vmem:[#allocation1] ss:$2 sm:$0xff] %v3568_v0 }
   0x3   :  { %14 = vsyncpa [#allocation3], 0  ;;  %vm46_vm0 = vcmask 1043456   ;;  %v35_v1 = vld [vmem:[%s4455_s2] sm:$0xf]  ;;  %vm4463_vm1 = vcmask 31744  }
   0x4   :  { %v3498_v9 = vmov 256.0   ;;  %v3499_v15 = vmov 839922192   ;;  %v33_v26 = vld [vmem:[%s4457_s4] sm:$0xf]  ;;  %v3500_v27 = vmov 0  }
   0x5   :  { %3435 = vrcp.f32 %v3498_v9  ;;  %v106_v16 = vunpack.c.l.s4 %v3499_v15  ;;  %3427 = vset.pattern.permute.xlu1 %v3500_v27  ;;  %v3501_v28 = vmov 1   ;;  %s3502_s4 = smov 17   ;;  %s3503_s15 = smov 16   ;;  %vm236_vm10 = vcmask 138240  }
   0x6   :  { %186 = vperm.xlu1 %3427, %v33_v26   ;;  %s3504_s16 = smov 15   ;;  %s3505_s19 = smov 1   ;;  %vm262_vm11 = vcmask 130048   ;;  %vm388_vm12 = vcmask 121856   ;;  %vm467_vm13 = vcmask 7168   ;;  %vm4464_vm14 = vcmask 1039360  }
   0x7   :  { %v3582_v18 = vunpack.c.0.s8 %v106_v16  ;;  %s3506_s20 = smov 127   ;;  %s3507_s21 = smov 113   ;;  %vm684_vm15 = vcmask 924672  }
   0x8   :  { %s3508_s24 = smov 112   ;;  %s3509_s25 = smov 111  }
   0x9   :  { %v40_v2 = vld.sshfl [vmem:[#allocation1] sm:$0xff pattern:$0x75316420]  ;;  %v41_v3 = vld.sshfl [vmem:[#allocation1 + $0x8] sm:$0xff pattern:$0x75316420] }
   0xa   :  { %3215 = vmatpush.msk.msra.mxu0 %vm46_vm0, %v40_v2  ;;  %3217 = vmatpush.msk.msra.mxu1 %vm46_vm0, %v41_v3  ;;  %s3203_s26 = sshll.u32 %s4462_s9, 4  ;;  %s3204_s26 = int_to_ptr.hbm [resolvable:$true] %s3203_s26 }
   0xb   :  { %3216 = vmatmul.msk.f32.vlgmr.msra.gmra.mxu0 %vm4463_vm1, %v35_v1  ;;  %3218 = vmatmul.msk.f32.vlgmr.msra.gmra.mxu1 %vm4463_vm1, %v35_v1  ;;  %v3436_v10 = vpop.eup %3435 }
   0xc   :  { %v97_v11 = vmul.f32 256.0, %v3436_v10  ;;  %vm101_vm2 = vweird.f32 %v3436_v10 }
   0xe   :  { %v98_v12 = vsub.f32 1.0, %v97_v11  ;;  %3428 = vset.pattern.permute.xlu1 %v3501_v28 }
   0xf   :  { %195 = vperm.xlu1 %3428, %v33_v26  }
  0x10   :  { %v99_v13 = vmul.f32 %v3436_v10, %v98_v12  ;;  %v3626_v12 = vld [vmem:[%s4454_s1 + $0x8] sm:$0x3] }
  0x12   :  { %v100_v14 = vadd.f32 %v3436_v10, %v99_v13  ;;  %v538_v13 = vperm.slane %v3626_v12, 1 }
  0x14   :  { %v3580_v17 = vsel %vm101_vm2, %v3436_v10, %v100_v14  ;;  %v537_v14 = vperm.slane %v3626_v12, 0  ;;  %v539_v15 = vrot.slane %v538_v13, 4  ;;  %vm4465_vm2 = vcmask 916480  }
  0x78   :  { %v187_v39 = vpop.permute.xlu1 %186 }
  0x79   :  { %v3601_v48 = vperm.slane %v187_v39, %v3582_v18 }
  0x81   :  { %v196_v45 = vpop.permute.xlu1 %195 }
  0x82   :  { %v3604_v49 = vperm.slane %v196_v45, %v3582_v18 }
  0x88   :  { %v68_v4 = vpop.f32.mrf.mxu0  ;;  %v88_v5 = vpop.f32.mrf.mxu1 }
  0x89   :  { %v91_v6 = vsel %vm46_vm0, %v68_v4, 0.0  ;;  %v92_v7 = vsel %vm46_vm0, %v88_v5, 0.0 }
  0x8a   :  { %v93_v8 = vadd.f32 %v92_v7, %v91_v6 }
  0x8c   :  { %94 = vadd.xlane.f32.xlu0 %v93_v8 }
  0xff   :  { %v95_v19 = vpop.xlane.xlu0 %94 }
 0x100   :  { %v103_v20 = vmul.f32 %v3580_v17, %v95_v19  ;;  %v540_v19 = vsel %vm46_vm0, %v537_v14, %v539_v15 }
 0x102   :  { %v108_v21 = vperm.slane %v103_v20, %v3582_v18 }
 0x104   :  { %v110_v22 = vsub.f32 %v3568_v0, %v108_v21 }
 0x106   :  { %v111_v23 = vmul.f32 %v110_v22, %v110_v22 }
 0x108   :  { %113 = vst [vmem:[#allocation1] ss:$2 sm:$0xff] %v111_v23 }
 0x10f   :  { %v114_v24 = vld.sshfl [vmem:[#allocation1] sm:$0xff pattern:$0x75316420]  ;;  %v115_v25 = vld.sshfl [vmem:[#allocation1 + $0x8] sm:$0xff pattern:$0x75316420] }
 0x110   :  { %3219 = vmatpush.msk.msra.mxu2 %vm46_vm0, %v114_v24  ;;  %3221 = vmatpush.msk.msra.mxu3 %vm46_vm0, %v115_v25 }
 0x111   :  { %3220 = vmatmul.msk.f32.vlgmr.msra.gmra.mxu2 %vm4463_vm1, %v35_v1  ;;  %3222 = vmatmul.msk.f32.vlgmr.msra.gmra.mxu3 %vm4463_vm1, %v35_v1 }
 0x194   :  { %v137_v29 = vpop.f32.mrf.mxu2  ;;  %v157_v30 = vpop.f32.mrf.mxu3 }
 0x195   :  { %v160_v31 = vsel %vm46_vm0, %v137_v29, 0.0  ;;  %v161_v32 = vsel %vm46_vm0, %v157_v30, 0.0 }
 0x196   :  { %v162_v33 = vadd.f32 %v161_v32, %v160_v31 }
 0x198   :  { %163 = vadd.xlane.f32.xlu0 %v162_v33  ;;  %v3659_v33 = vld [vmem:[%s4454_s1] sm:$0x3] }
 0x20b   :  { %v164_v34 = vpop.xlane.xlu0 %163 }
 0x20c   :  { %v165_v35 = vmul.f32 %v164_v34, %v3580_v17 }
 0x20e   :  { %v166_v36 = vadd.f32 1e-05, %v165_v35  ;;  %v243_v35 = vperm.slane %v3659_v33, 0 }
 0x210   :  { %3437 = vrsqrt.f32 %v166_v36  ;;  %vm173_vm4 = vweird.f32 %v166_v36 }
 0x216   :  { %v3438_v37 = vpop.eup %3437 }
 0x217   :  { %v168_v38 = vmul.f32 %v3438_v37, %v166_v36  ;;  %vm174_vm3 = vweird.f32 %v3438_v37 }
 0x218   :  { %vm175_vm5 = vmor %vm173_vm4, %vm174_vm3  ;;  %vm842_vm3 = vcmask 908288   ;;  %vm921_vm4 = vcmask 64512  }
 0x219   :  { %v169_v40 = vmul.f32 %v3438_v37, %v168_v38 }
 0x21b   :  { %v170_v41 = vmul.f32 0.5, %v169_v40 }
 0x21d   :  { %v171_v42 = vsub.f32 1.5, %v170_v41 }
 0x21f   :  { %v172_v43 = vmul.f32 %v3438_v37, %v171_v42 }
 0x221   :  { %v176_v44 = vsel %vm175_vm5, %v3438_v37, %v172_v43 }
 0x222   :  { %v181_v46 = vperm.slane %v176_v44, %v3582_v18  ;;  %v244_v44 = vperm.slane %v3659_v33, 1 }
 0x224   :  { %v183_v47 = vmul.f32 %v181_v46, %v110_v22 }
 0x226   :  { %v193_v50 = vmul.f32 %v3601_v48, %v183_v47 }
 0x228   :  { %v202_v51 = vadd.f32 %v3604_v49, %v193_v50  ;;  %v3683_v50 = vld [vmem:[%s4454_s1 + $0x2] sm:$0x3] }
 0x22a   :  { %v3223_v52 = vmul.f32 -1.442695, %v202_v51 }
 0x22c   :  { %3439 = vpow2.f32 %v3223_v52  ;;  %v270_v52 = vperm.slane %v3683_v50, 0 }
 0x232   :  { %v3440_v53 = vpop.eup %3439 }
 0x233   :  { %v206_v54 = vadd.f32 1.0, %v3440_v53 }
 0x235   :  { %3441 = vrcp.f32 %v206_v54  ;;  %v218_v58 = vand.u32 2147483648, %v206_v54  ;;  %v216_v60 = vand.u32 2147483647, %v206_v54  ;;  %vm212_vm7 = vweird.f32 %v206_v54 }
 0x237   :  { %v219_v62 = vor.u32 1.1754944e-38, %v218_v58  ;;  %vm217_vm9 = vcmp.eq.f32.partialorder %v216_v60, 8.507059e+37 }
 0x23b   :  { %v3442_v55 = vpop.eup %3441 }
 0x23c   :  { %v208_v56 = vmul.f32 %v3442_v55, %v206_v54  ;;  %vm213_vm6 = vweird.f32 %v3442_v55 }
 0x23d   :  { %vm214_vm8 = vmor %vm212_vm7, %vm213_vm6 }
 0x23e   :  { %v209_v57 = vsub.f32 1.0, %v208_v56 }
 0x240   :  { %v210_v59 = vmul.f32 %v3442_v55, %v209_v57  ;;  %v3225_v57 = vld [vmem:[%s4459_s6 + $0x8] sm:$0xff] }
 0x242   :  { %v211_v61 = vadd.f32 %v3442_v55, %v210_v59 }
 0x244   :  { %v215_v63 = vsel %vm214_vm8, %v3442_v55, %v211_v61 }
 0x245   :  { %v220_v1 = vsel %vm217_vm9, %v219_v62, %v215_v63  ;;  %v3706_v62 = vld [vmem:[%s4454_s1 + $0x4] sm:$0x3] }
 0x246   :  { %v3608_v2 = vmul.f32 %v220_v1, %v202_v51  ;;  %v396_v63 = vperm.slane %v3706_v62, 0  ;;  %v397_v1 = vperm.slane %v3706_v62, 1 }
 0x248   :  { %224 = vst [vmem:[#allocation1] ss:$2 sm:$0xff] %v3608_v2  ;;  %v542_v20 = vmul.f32 %v540_v19, %v3608_v2 }
 0x24f   :  { %v225_v3 = vld.sshfl [vmem:[#allocation1 + $0x8] sm:$0xff pattern:$0x75316420] }
 0x250   :  { %229 = vst [vmem:[#allocation1] ss:$2 sm:$0xff] %v3608_v2  ;;  %226 = vrot.lane.b32.xlu2 %v225_v3, %s3502_s4 }
 0x257   :  { %v230_v4 = vld.sshfl [vmem:[#allocation1] sm:$0xff pattern:$0x75316420]  ;;  %v231_v5 = vld.sshfl [vmem:[#allocation1 + $0x8] sm:$0xff pattern:$0x75316420] }
 0x258   :  { %250 = vst [vmem:[#allocation1] ss:$2 sm:$0xff] %v3608_v2  ;;  %234 = vrot.lane.b32.xlu0 %v231_v5, %s3502_s4  ;;  %232 = vrot.lane.b32.xlu2 %v230_v4, %s3502_s4 }
 0x25f   :  { %v251_v6 = vld.sshfl [vmem:[#allocation1 + $0x8] sm:$0xff pattern:$0x75316420] }
 0x260   :  { %255 = vst [vmem:[#allocation1] ss:$2 sm:$0xff] %v3608_v2  ;;  %252 = vrot.lane.b32.xlu1 %v251_v6, %s3503_s15 }
 0x267   :  { %v256_v7 = vld.sshfl [vmem:[#allocation1] sm:$0xff pattern:$0x75316420]  ;;  %v257_v8 = vld.sshfl [vmem:[#allocation1 + $0x8] sm:$0xff pattern:$0x75316420] }
 0x268   :  { %376 = vst [vmem:[#allocation1] ss:$2 sm:$0xff] %v3608_v2  ;;  %260 = vrot.lane.b32.xlu1 %v257_v8, %s3503_s15  ;;  %258 = vrot.lane.b32.xlu2 %v256_v7, %s3503_s15  ;;  %v249_v8 = vld [vmem:[%s4459_s6] sm:$0xff] }
 0x26f   :  { %v377_v9 = vld.sshfl [vmem:[#allocation1 + $0x8] sm:$0xff pattern:$0x75316420] }
 0x270   :  { %381 = vst [vmem:[#allocation1] ss:$2 sm:$0xff] %v3608_v2  ;;  %378 = vrot.lane.b32.xlu2 %v377_v9, %s3504_s16  ;;  %v3235_v9 = vld [vmem:[%s4459_s6 + $0x10] sm:$0xff] }
 0x277   :  { %v382_v10 = vld.sshfl [vmem:[#allocation1] sm:$0xff pattern:$0x75316420]  ;;  %v383_v11 = vld.sshfl [vmem:[#allocation1 + $0x8] sm:$0xff pattern:$0x75316420] }
 0x278   :  { %455 = vst [vmem:[#allocation1] ss:$2 sm:$0xff] %v3608_v2  ;;  %386 = vrot.lane.b32.xlu2 %v383_v11, %s3504_s16  ;;  %384 = vrot.lane.b32.xlu1 %v382_v10, %s3504_s16  ;;  %v3735_v10 = vld [vmem:[%s4454_s1 + $0x6] sm:$0x3] }
 0x279   :  { %v475_v11 = vperm.slane %v3735_v10, 0  ;;  %v476_v15 = vperm.slane %v3735_v10, 1 }
 0x27f   :  { %v456_v16 = vld.sshfl [vmem:[#allocation1 + $0x8] sm:$0xff pattern:$0x75316420] }
 0x280   :  { %460 = vst [vmem:[#allocation1] ss:$2 sm:$0xff] %v3608_v2  ;;  %457 = vrot.lane.b32.xlu0 %v456_v16, %s3505_s19 }
 0x287   :  { %v461_v21 = vld.sshfl [vmem:[#allocation1] sm:$0xff pattern:$0x75316420]  ;;  %v462_v22 = vld.sshfl [vmem:[#allocation1 + $0x8] sm:$0xff pattern:$0x75316420] }
 0x288   :  { %546 = vst [vmem:[#allocation1] ss:$2 sm:$0xff] %v542_v20  ;;  %465 = vrot.lane.b32.xlu2 %v462_v22, %s3505_s19  ;;  %463 = vrot.lane.b32.xlu1 %v461_v21, %s3505_s19 }
 0x28f   :  { %v3643_v23 = vld.sshfl [vmem:[#allocation1] sm:$0xff pattern:$0x75316420]  ;;  %v3645_v24 = vld.sshfl [vmem:[#allocation1 + $0x8] sm:$0xff pattern:$0x75316420] }
 0x290   :  { %598 = vst [vmem:[#allocation1] ss:$2 sm:$0xff] %v3608_v2 }
 0x297   :  { %v600_v25 = vld.sshfl [vmem:[#allocation1 + $0x8] sm:$0xff pattern:$0x75316420]  ;;  %v599_v26 = vld.sshfl [vmem:[#allocation1] sm:$0xff pattern:$0x75316420] }
 0x298   :  { %603 = vrot.lane.b32.xlu1 %v600_v25, %s3506_s20  ;;  %601 = vrot.lane.b32.xlu0 %v599_v26, %s3506_s20  ;;  %609 = vst [vmem:[#allocation1] ss:$2 sm:$0xff] %v3608_v2  ;;  %v3241_v25 = vld [vmem:[%s4459_s6 + $0x18] sm:$0xff]  ;;  %v3247_v26 = vld [vmem:[%s4459_s6 + $0x20] sm:$0xff] }
 0x29f   :  { %v610_v29 = vld.sshfl [vmem:[#allocation1] sm:$0xff pattern:$0x75316420] }
 0x2a0   :  { %611 = vrot.lane.b32.xlu2 %v610_v29, %s3506_s20  ;;  %677 = vst [vmem:[#allocation1] ss:$2 sm:$0xff] %v3608_v2  ;;  %v3760_v29 = vld [vmem:[%s4454_s1 + $0xa] sm:$0x3] }
 0x2a7   :  { %v679_v30 = vld.sshfl [vmem:[#allocation1 + $0x8] sm:$0xff pattern:$0x75316420]  ;;  %v678_v31 = vld.sshfl [vmem:[#allocation1] sm:$0xff pattern:$0x75316420] }
 0x2a8   :  { %682 = vrot.lane.b32.xlu1 %v679_v30, %s3507_s21  ;;  %680 = vrot.lane.b32.xlu0 %v678_v31, %s3507_s21  ;;  %688 = vst [vmem:[#allocation1] ss:$2 sm:$0xff] %v3608_v2  ;;  %v619_v30 = vperm.slane %v3760_v29, 1  ;;  %v618_v31 = vperm.slane %v3760_v29, 0  ;;  %v3469_v29 = vld [vmem:[%s4455_s2] sm:$0xf] }
 0x2aa   :  { %v227_v32 = vpop.permute.xlu2 %226 }
 0x2af   :  { %v689_v34 = vld.sshfl [vmem:[#allocation1] sm:$0xff pattern:$0x75316420] }
 0x2b0   :  { %690 = vrot.lane.b32.xlu2 %v689_v34, %s3507_s21  ;;  %756 = vst [vmem:[#allocation1] ss:$2 sm:$0xff] %v3608_v2 }
 0x2b2   :  { %v233_v36 = vpop.permute.xlu2 %232 }
 0x2b3   :  { %v240_v37 = vsel %vm236_vm10, %v227_v32, %v233_v36 }
 0x2b4   :  { %v247_v38 = vmul.f32 %v243_v35, %v240_v37 }
 0x2b6   :  { %3230 = vmatpush.msk.msrb.mxu2 %vm46_vm0, %v247_v38 }
 0x2b7   :  { %v758_v39 = vld.sshfl [vmem:[#allocation1 + $0x8] sm:$0xff pattern:$0x75316420]  ;;  %v757_v40 = vld.sshfl [vmem:[#allocation1] sm:$0xff pattern:$0x75316420]  ;;  %3231 = vmatmul.msk.f32.vlgmr.msrb.gmra.mxu2 %vm4463_vm1, %v249_v8 }
 0x2b8   :  { %761 = vrot.lane.b32.xlu1 %v758_v39, %s3508_s24  ;;  %759 = vrot.lane.b32.xlu0 %v757_v40, %s3508_s24  ;;  %767 = vst [vmem:[#allocation1] ss:$2 sm:$0xff] %v3608_v2 }
 0x2bf   :  { %v768_v41 = vld.sshfl [vmem:[#allocation1] sm:$0xff pattern:$0x75316420] }
 0x2c0   :  { %769 = vrot.lane.b32.xlu2 %v768_v41, %s3508_s24  ;;  %835 = vst [vmem:[#allocation1] ss:$2 sm:$0xff] %v3608_v2  ;;  %v3253_v41 = vld [vmem:[%s4459_s6 + $0x28] sm:$0xff] }
 0x2c2   :  { %v259_v53 = vpop.permute.xlu2 %258 }
 0x2c7   :  { %v837_v42 = vld.sshfl [vmem:[#allocation1 + $0x8] sm:$0xff pattern:$0x75316420]  ;;  %v836_v43 = vld.sshfl [vmem:[#allocation1] sm:$0xff pattern:$0x75316420] }
 0x2c8   :  { %840 = vrot.lane.b32.xlu1 %v837_v42, %s3509_s25  ;;  %838 = vrot.lane.b32.xlu0 %v836_v43, %s3509_s25  ;;  %846 = vst [vmem:[#allocation1] ss:$2 sm:$0xff] %v3608_v2  ;;  %v3780_v42 = vld [vmem:[%s4454_s1 + $0xc] sm:$0x3] }
 0x2c9   :  { %v698_v43 = vperm.slane %v3780_v42, 1 }
 0x2ca   :  { %v235_v45 = vpop.permute.xlu0 %234  ;;  %v379_v61 = vpop.permute.xlu2 %378 }
 0x2cb   :  { %v237_v46 = vsel %vm236_vm10, %v233_v36, %v235_v45  ;;  %v697_v45 = vperm.slane %v3780_v42, 0 }
 0x2cc   :  { %v248_v47 = vmul.f32 %v244_v44, %v237_v46 }
 0x2ce   :  { %3232 = vmatpush.msk.msrb.mxu3 %vm46_vm0, %v248_v47 }
 0x2cf   :  { %v847_v51 = vld.sshfl [vmem:[#allocation1] sm:$0xff pattern:$0x75316420]  ;;  %3233 = vmatmul.msk.f32.vlgmr.msrb.gmra.mxu3 %vm4463_vm1, %v249_v8 }
 0x2d0   :  { %848 = vrot.lane.b32.xlu2 %v847_v51, %s3509_s25  ;;  %1605 = vst [vmem:[#allocation1] ss:$2 sm:$0xff] %v3568_v0  ;;  %v271_v0 = vperm.slane %v3683_v50, 1 }
 0x2d2   :  { %v253_v54 = vpop.permute.xlu1 %252  ;;  %v387_v2 = vpop.permute.xlu2 %386 }
 0x2d3   :  { %v266_v55 = vsel %vm262_vm11, %v253_v54, %v259_v53 }
 0x2d4   :  { %v274_v56 = vmul.f32 %v270_v52, %v266_v55 }
 0x2d6   :  { %3226 = vmatpush.msk.msrb.mxu0 %vm46_vm0, %v274_v56 }
 0x2d7   :  { %3227 = vmatmul.msk.f32.vlgmr.msrb.gmra.mxu0 %vm4463_vm1, %v3225_v57 }
 0x2da   :  { %v261_v58 = vpop.permute.xlu1 %260 }
 0x2db   :  { %v263_v59 = vsel %vm262_vm11, %v259_v53, %v261_v58  ;;  %v34_v58 = vld [vmem:[%s4458_s5] sm:$0xff] }
 0x2dc   :  { %v275_v60 = vmul.f32 %v271_v0, %v263_v59  ;;  %v3510_v59 = vmov 2  }
 0x2dd   :  { %3429 = vset.pattern.permute.xlu0 %v3510_v59 }
 0x2de   :  { %3228 = vmatpush.msk.msrb.mxu1 %vm46_vm0, %v275_v60  ;;  %916 = vperm.xlu0 %3429, %v34_v58   ;;  %v3803_v60 = vld [vmem:[%s4454_s1 + $0xe] sm:$0x3] }
 0x2df   :  { %3229 = vmatmul.msk.f32.vlgmr.msrb.gmra.mxu1 %vm4463_vm1, %v3225_v57  ;;  %v3259_v57 = vld [vmem:[%s4459_s6 + $0x30] sm:$0xff] }
 0x2e2   :  { %v466_v16 = vpop.permute.xlu2 %465 }
 0x2e6   :  { %3430 = vset.pattern.permute.xlu0 %v3500_v27  ;;  %v3825_v27 = vld [vmem:[%s4454_s1 + $0x10] sm:$0x3] }
 0x2e7   :  { %1031 = vperm.xlu0 %3430, %v34_v58  }
 0x2ea   :  { %v385_v3 = vpop.permute.xlu1 %384 }
 0x2eb   :  { %v389_v4 = vsel %vm388_vm12, %v385_v3, %v387_v2  ;;  %v392_v5 = vsel %vm388_vm12, %v379_v61, %v385_v3  ;;  %v777_v61 = vperm.slane %v3803_v60, 1  ;;  %v776_v2 = vperm.slane %v3803_v60, 0 }
 0x2ec   :  { %v400_v6 = vmul.f32 %v396_v63, %v392_v5  ;;  %v401_v7 = vmul.f32 %v397_v1, %v389_v4 }
 0x2ee   :  { %3236 = vmatpush.msk.msra.mxu0 %vm46_vm0, %v400_v6  ;;  %3238 = vmatpush.msk.msra.mxu1 %vm46_vm0, %v401_v7 }
 0x2ef   :  { %3237 = vmatmul.msk.f32.vlgmr.msra.gmra.mxu0 %vm4463_vm1, %v3235_v9  ;;  %3239 = vmatmul.msk.f32.vlgmr.msra.gmra.mxu1 %vm4463_vm1, %v3235_v9 }
 0x2f0   :  { %3248 = vmatpush.msk.msrb.mxu0 %vm46_vm0, %v3643_v23  ;;  %3250 = vmatpush.msk.msrb.mxu1 %vm46_vm0, %v3645_v24 }
 0x2f1   :  { %3431 = vset.pattern.permute.xlu0 %v3501_v28 }
 0x2f2   :  { %v458_v19 = vpop.permute.xlu0 %457  ;;  %1037 = vperm.xlu0 %3431, %v34_v58  }
 0x2f7   :  { %3249 = vmatmul.msk.f32.vlgmr.msrb.gmra.mxu0 %vm4463_vm1, %v3247_v26  ;;  %3251 = vmatmul.msk.f32.vlgmr.msrb.gmra.mxu1 %vm4463_vm1, %v3247_v26 }
 0x2fa   :  { %v464_v20 = vpop.permute.xlu1 %463  ;;  %v612_v32 = vpop.permute.xlu2 %611 }
 0x2fb   :  { %v468_v21 = vsel %vm467_vm13, %v464_v20, %v466_v16  ;;  %v471_v22 = vsel %vm467_vm13, %v458_v19, %v464_v20  ;;  %v3265_v16 = vld [vmem:[%s4459_s6 + $0x38] sm:$0xff]  ;;  %v856_v19 = vperm.slane %v3825_v27, 1  ;;  %v855_v20 = vperm.slane %v3825_v27, 0 }
 0x2fc   :  { %v479_v23 = vmul.f32 %v475_v11, %v471_v22  ;;  %v480_v24 = vmul.f32 %v476_v15, %v468_v21 }
 0x2fe   :  { %3242 = vmatpush.msk.msra.mxu2 %vm46_vm0, %v479_v23  ;;  %3244 = vmatpush.msk.msra.mxu3 %vm46_vm0, %v480_v24 }
 0x2ff   :  { %3243 = vmatmul.msk.f32.vlgmr.msra.gmra.mxu2 %vm4463_vm1, %v3241_v25  ;;  %3245 = vmatmul.msk.f32.vlgmr.msra.gmra.mxu3 %vm4463_vm1, %v3241_v25 }
 0x30a   :  { %v604_v34 = vpop.permute.xlu1 %603  ;;  %v602_v36 = vpop.permute.xlu0 %601 }
 0x30b   :  { %v614_v37 = vsel %vm4464_vm14, %v604_v34, %v612_v32  ;;  %v606_v38 = vsel %vm4464_vm14, %v602_v36, %v604_v34  ;;  %v691_v46 = vpop.permute.xlu2 %690  ;;  %v3271_v32 = vld [vmem:[%s4459_s6 + $0x40] sm:$0xff] }
 0x30c   :  { %v623_v39 = vmul.f32 %v619_v30, %v614_v37  ;;  %v622_v40 = vmul.f32 %v618_v31, %v606_v38 }
 0x30e   :  { %3254 = vmatpush.msk.msrb.mxu2 %vm46_vm0, %v622_v40  ;;  %3256 = vmatpush.msk.msrb.mxu3 %vm46_vm0, %v623_v39 }
 0x30f   :  { %3255 = vmatmul.msk.f32.vlgmr.msrb.gmra.mxu2 %vm4463_vm1, %v3253_v41  ;;  %3257 = vmatmul.msk.f32.vlgmr.msrb.gmra.mxu3 %vm4463_vm1, %v3253_v41 }
 0x31a   :  { %v683_v47 = vpop.permute.xlu1 %682  ;;  %v681_v51 = vpop.permute.xlu0 %680 }
 0x31b   :  { %v693_v53 = vsel %vm684_vm15, %v683_v47, %v691_v46  ;;  %v685_v54 = vsel %vm684_vm15, %v681_v51, %v683_v47  ;;  %v770_v3 = vpop.permute.xlu2 %769 }
 0x31c   :  { %v702_v55 = vmul.f32 %v698_v43, %v693_v53  ;;  %v701_v56 = vmul.f32 %v697_v45, %v685_v54 }
 0x31e   :  { %3260 = vmatpush.msk.msra.mxu0 %vm46_vm0, %v701_v56  ;;  %3262 = vmatpush.msk.msra.mxu1 %vm46_vm0, %v702_v55 }
 0x31f   :  { %3261 = vmatmul.msk.f32.vlgmr.msra.gmra.mxu0 %vm4463_vm1, %v3259_v57  ;;  %3263 = vmatmul.msk.f32.vlgmr.msra.gmra.mxu1 %vm4463_vm1, %v3259_v57 }
 0x32a   :  { %v762_v4 = vpop.permute.xlu1 %761  ;;  %v760_v5 = vpop.permute.xlu0 %759 }
 0x32b   :  { %v772_v6 = vsel %vm4465_vm2, %v762_v4, %v770_v3  ;;  %v764_v7 = vsel %vm4465_vm2, %v760_v5, %v762_v4  ;;  %v849_v21 = vpop.permute.xlu2 %848 }
 0x32c   :  { %v781_v8 = vmul.f32 %v777_v61, %v772_v6  ;;  %v780_v9 = vmul.f32 %v776_v2, %v764_v7 }
 0x32e   :  { %3266 = vmatpush.msk.msra.mxu2 %vm46_vm0, %v780_v9  ;;  %3268 = vmatpush.msk.msra.mxu3 %vm46_vm0, %v781_v8 }
 0x32f   :  { %3267 = vmatmul.msk.f32.vlgmr.msra.gmra.mxu2 %vm4463_vm1, %v3265_v16  ;;  %3269 = vmatmul.msk.f32.vlgmr.msra.gmra.mxu3 %vm4463_vm1, %v3265_v16 }
 0x33a   :  { %v841_v22 = vpop.permute.xlu1 %840  ;;  %v839_v23 = vpop.permute.xlu0 %838 }
 0x33b   :  { %v851_v24 = vsel %vm842_vm3, %v841_v22, %v849_v21  ;;  %v843_v25 = vsel %vm842_vm3, %v839_v23, %v841_v22  ;;  %v353_v37 = vpop.f32.mrf.mxu2 }
 0x33c   :  { %v860_v28 = vmul.f32 %v856_v19, %v851_v24  ;;  %v859_v26 = vmul.f32 %v855_v20, %v843_v25 }
 0x33e   :  { %3272 = vmatpush.msk.msrb.mxu0 %vm46_vm0, %v859_v26  ;;  %3274 = vmatpush.msk.msrb.mxu1 %vm46_vm0, %v860_v28 }
 0x33f   :  { %3273 = vmatmul.msk.f32.vlgmr.msrb.gmra.mxu0 %vm4463_vm1, %v3271_v32  ;;  %3275 = vmatmul.msk.f32.vlgmr.msrb.gmra.mxu1 %vm4463_vm1, %v3271_v32 }
 0x350   :  { %v3842_v28 = vpop.permute.xlu0 %916 }
 0x352   :  { %v373_v38 = vpop.f32.mrf.mxu3 }
 0x354   :  { %v304_v34 = vpop.f32.mrf.mxu0 }
 0x355   :  { %v354_v41 = vadd.f32 %v353_v37, %v304_v34 }
 0x35c   :  { %v324_v36 = vpop.f32.mrf.mxu1 }
 0x35d   :  { %v374_v46 = vadd.f32 %v373_v38, %v324_v36 }
 0x36c   :  { %v430_v39 = vpop.f32.mrf.mxu0  ;;  %v450_v40 = vpop.f32.mrf.mxu1 }
 0x36d   :  { %v453_v53 = vadd.f32 %v430_v39, %v354_v41  ;;  %v454_v54 = vadd.f32 %v450_v40, %v374_v46  ;;  %v36_v39 = vld [vmem:[%s4456_s3] sm:$0xff] }
 0x374   :  { %v573_v55 = vpop.f32.mrf.mxu0  ;;  %v593_v56 = vpop.f32.mrf.mxu1 }
 0x382   :  { %v509_v47 = vpop.f32.mrf.mxu2  ;;  %v529_v51 = vpop.f32.mrf.mxu3 }
 0x383   :  { %v532_v57 = vadd.f32 %v509_v47, %v453_v53  ;;  %v533_v58 = vadd.f32 %v529_v51, %v454_v54 }
 0x385   :  { %v596_v4 = vadd.f32 %v573_v55, %v532_v57  ;;  %v597_v5 = vadd.f32 %v593_v56, %v533_v58 }
 0x392   :  { %v652_v59 = vpop.f32.mrf.mxu2  ;;  %v672_v3 = vpop.f32.mrf.mxu3 }
 0x393   :  { %v675_v8 = vadd.f32 %v652_v59, %v596_v4  ;;  %v676_v9 = vadd.f32 %v672_v3, %v597_v5 }
 0x39c   :  { %v731_v6 = vpop.f32.mrf.mxu0  ;;  %v751_v7 = vpop.f32.mrf.mxu1 }
 0x39d   :  { %v754_v22 = vadd.f32 %v731_v6, %v675_v8  ;;  %v755_v23 = vadd.f32 %v751_v7, %v676_v9  ;;  %v3855_v9 = vpop.permute.xlu0 %1031 }
 0x3b2   :  { %v810_v16 = vpop.f32.mrf.mxu2  ;;  %v830_v21 = vpop.f32.mrf.mxu3 }
 0x3b3   :  { %v833_v24 = vadd.f32 %v810_v16, %v754_v22  ;;  %v834_v25 = vadd.f32 %v830_v21, %v755_v23 }
 0x3bc   :  { %v889_v26 = vpop.f32.mrf.mxu0  ;;  %v909_v32 = vpop.f32.mrf.mxu1 }
 0x3bd   :  { %v912_v34 = vadd.f32 %v889_v26, %v833_v24  ;;  %v913_v36 = vadd.f32 %v909_v32, %v834_v25  ;;  %v3857_v26 = vpop.permute.xlu0 %1037 }
 0x3bf   :  { %v919_v37 = vadd.f32 %v3842_v28, %v912_v34  ;;  %v920_v38 = vadd.f32 %v3842_v28, %v913_v36 }
 0x3c1   :  { %940 = vmatpush.msrb.mxu2 %v919_v37  ;;  %960 = vmatpush.msrb.mxu3 %v920_v38 }
 0x3c2   :  { %3276 = vmatmul.msk.f32.vlgmr.msrb.gmra.mxu2 %vm921_vm4, %v36_v39  ;;  %3277 = vmatmul.msk.f32.vlgmr.msrb.gmra.mxu3 %vm921_vm4, %v36_v39 }
 0x445   :  { %v942_v40 = vpop.f32.mrf.mxu2  ;;  %v962_v41 = vpop.f32.mrf.mxu3 }
 0x446   :  { %v965_v46 = vadd.f32 %v962_v41, %v942_v40 }
 0x448   :  { %966 = vadd.xlane.f32.xlu1 %v965_v46 }
 0x4bb   :  { %v967_v47 = vpop.xlane.xlu1 %966 }
 0x4bc   :  { %v968_v51 = vmul.f32 %v967_v47, %v3580_v17 }
 0x4be   :  { %v969_v53 = vsub.f32 %v919_v37, %v968_v51  ;;  %v970_v54 = vsub.f32 %v920_v38, %v968_v51 }
 0x4c0   :  { %v971_v55 = vmul.f32 %v969_v53, %v969_v53  ;;  %v972_v56 = vmul.f32 %v970_v54, %v970_v54 }
 0x4c2   :  { %988 = vmatpush.msra.mxu0 %v971_v55  ;;  %1008 = vmatpush.msra.mxu1 %v972_v56 }
 0x4c3   :  { %3278 = vmatmul.msk.f32.vlgmr.msra.gmra.mxu0 %vm921_vm4, %v36_v39  ;;  %3279 = vmatmul.msk.f32.vlgmr.msra.gmra.mxu1 %vm921_vm4, %v36_v39 }
 0x540   :  { %v990_v57 = vpop.f32.mrf.mxu0  ;;  %v1010_v58 = vpop.f32.mrf.mxu1 }
 0x541   :  { %v1013_v59 = vadd.f32 %v1010_v58, %v990_v57 }
 0x543   :  { %1014 = vadd.xlane.f32.xlu2 %v1013_v59 }
 0x5b6   :  { %v1015_v3 = vpop.xlane.xlu2 %1014 }
 0x5b7   :  { %v1016_v4 = vmul.f32 %v1015_v3, %v3580_v17 }
 0x5b9   :  { %v1017_v5 = vadd.f32 1e-05, %v1016_v4 }
 0x5bb   :  { %3443 = vrsqrt.f32 %v1017_v5  ;;  %vm1024_vm6 = vweird.f32 %v1017_v5 }
 0x5c1   :  { %v3444_v6 = vpop.eup %3443 }
 0x5c2   :  { %v1019_v7 = vmul.f32 %v3444_v6, %v1017_v5  ;;  %vm1025_vm5 = vweird.f32 %v3444_v6 }
 0x5c3   :  { %vm1026_vm7 = vmor %vm1024_vm6, %vm1025_vm5 }
 0x5c4   :  { %v1020_v8 = vmul.f32 %v3444_v6, %v1019_v7 }
 0x5c6   :  { %v1021_v16 = vmul.f32 0.5, %v1020_v8 }
 0x5c8   :  { %v1022_v21 = vsub.f32 1.5, %v1021_v16 }
 0x5ca   :  { %v1023_v22 = vmul.f32 %v3444_v6, %v1022_v21 }
 0x5cc   :  { %v1027_v23 = vsel %vm1026_vm7, %v3444_v6, %v1023_v22 }
 0x5cd   :  { %v1028_v24 = vmul.f32 %v1027_v23, %v969_v53  ;;  %v1029_v25 = vmul.f32 %v1027_v23, %v970_v54 }
 0x5cf   :  { %v1034_v32 = vmul.f32 %v3855_v9, %v1028_v24  ;;  %v1035_v34 = vmul.f32 %v3855_v9, %v1029_v25 }
 0x5d1   :  { %v1040_v36 = vadd.f32 %v3857_v26, %v1034_v32  ;;  %v1041_v37 = vadd.f32 %v3857_v26, %v1035_v34 }
 0x5d3   :  { %v3280_v38 = vmul.f32 -1.442695, %v1040_v36  ;;  %v3281_v39 = vmul.f32 -1.442695, %v1041_v37 }
 0x5d5   :  { %3445 = vpow2.f32 %v3280_v38 }
 0x5d6   :  { %3447 = vpow2.f32 %v3281_v39 }
 0x5db   :  { %v3446_v40 = vpop.eup %3445 }
 0x5dc   :  { %v3448_v41 = vpop.eup %3447  ;;  %v1048_v46 = vadd.f32 1.0, %v3446_v40 }
 0x5dd   :  { %v1049_v47 = vadd.f32 1.0, %v3448_v41 }
 0x5de   :  { %3449 = vrcp.f32 %v1048_v46  ;;  %v1061_v57 = vand.u32 2147483648, %v1048_v46  ;;  %v1059_v3 = vand.u32 2147483647, %v1048_v46  ;;  %vm1055_vm5 = vweird.f32 %v1048_v46 }
 0x5df   :  { %3451 = vrcp.f32 %v1049_v47  ;;  %v1076_v4 = vand.u32 2147483648, %v1049_v47  ;;  %v1074_v6 = vand.u32 2147483647, %v1049_v47  ;;  %vm1070_vm7 = vweird.f32 %v1049_v47 }
 0x5e0   :  { %v1062_v8 = vor.u32 1.1754944e-38, %v1061_v57  ;;  %vm1060_vm1 = vcmp.eq.f32.partialorder %v1059_v3, 8.507059e+37 }
 0x5e1   :  { %v1077_v22 = vor.u32 1.1754944e-38, %v1076_v4  ;;  %vm1075_vm2 = vcmp.eq.f32.partialorder %v1074_v6, 8.507059e+37 }
 0x5e4   :  { %v3450_v51 = vpop.eup %3449 }
 0x5e5   :  { %v3452_v53 = vpop.eup %3451  ;;  %v1051_v54 = vmul.f32 %v3450_v51, %v1048_v46  ;;  %vm1056_vm8 = vweird.f32 %v3450_v51 }
 0x5e6   :  { %v1066_v55 = vmul.f32 %v3452_v53, %v1049_v47  ;;  %vm1071_vm9 = vweird.f32 %v3452_v53  ;;  %vm1057_vm6 = vmor %vm1055_vm5, %vm1056_vm8  ;;  %v3282_v47 = vld [vmem:[%s4460_s7 + $0x8] sm:$0xff] }
 0x5e7   :  { %v1052_v56 = vsub.f32 1.0, %v1051_v54  ;;  %vm1072_vm14 = vmor %vm1070_vm7, %vm1071_vm9  ;;  %vm4470_vm9 = vcmask 31744  }
 0x5e8   :  { %v1067_v58 = vsub.f32 1.0, %v1066_v55  ;;  %vm4471_vm5 = vmmov %vm4470_vm9 }
 0x5e9   :  { %v1053_v59 = vmul.f32 %v3450_v51, %v1052_v56  ;;  %vm4473_vm7 = vmmov %vm4471_vm5 }
 0x5ea   :  { %v1068_v5 = vmul.f32 %v3452_v53, %v1067_v58 }
 0x5eb   :  { %v1054_v7 = vadd.f32 %v3450_v51, %v1053_v59  ;;  %v3287_v59 = vld [vmem:[%s4460_s7 + $0x10] sm:$0xff] }
 0x5ec   :  { %v1069_v16 = vadd.f32 %v3452_v53, %v1068_v5 }
 0x5ed   :  { %v1058_v21 = vsel %vm1057_vm6, %v3450_v51, %v1054_v7  ;;  %v3888_v51 = vld.sshfl [vmem:[#allocation1] sm:$0xff pattern:$0x75316420]  ;;  %vm4472_vm6 = vmmov %vm4471_vm5 }
 0x5ee   :  { %v1063_v23 = vsel %vm1060_vm1, %v1062_v8, %v1058_v21  ;;  %v1073_v24 = vsel %vm1072_vm14, %v3452_v53, %v1069_v16  ;;  %v3890_v53 = vld.sshfl [vmem:[#allocation1 + $0x8] sm:$0xff pattern:$0x75316420]  ;;  %v1095_v21 = vld [vmem:[%s4460_s7] sm:$0xff]  ;;  %vm4466_vm1 = vcmask 916480  }
 0x5ef   :  { %v1078_v25 = vsel %vm1075_vm2, %v1077_v22, %v1073_v24  ;;  %v1080_v32 = vmul.f32 %v1063_v23, %v1040_v36  ;;  %v3293_v22 = vld [vmem:[%s4460_s7 + $0x20] sm:$0xff]  ;;  %vm4467_vm14 = vmmov %vm4466_vm1  ;;  %vm4468_vm2 = vcmask 1039360  }
 0x5f0   :  { %v1081_v34 = vmul.f32 %v1078_v25, %v1041_v37  ;;  %vm4469_vm8 = vmmov %vm4468_vm2 }
 0x5f1   :  { %1099 = vrot.lane.b32.xlu1 %v1080_v32, %s3503_s15  ;;  %v1313_v3 = vmul.f32 %v1080_v32, %v537_v14 }
 0x5f2   :  { %1195 = vrot.lane.b32.xlu0 %v1081_v34, %s3504_s16  ;;  %1096 = vrot.lane.b32.xlu2 %v1081_v34, %s3503_s15  ;;  %v1314_v4 = vmul.f32 %v1081_v34, %v538_v13 }
 0x5f9   :  { %1536 = vrot.lane.b32.xlu1 %v1080_v32, %s3509_s25 }
 0x5fa   :  { %1422 = vrot.lane.b32.xlu2 %v1081_v34, %s3507_s21  ;;  %1198 = vrot.lane.b32.xlu0 %v1080_v32, %s3504_s16 }
 0x601   :  { %1087 = vrot.lane.b32.xlu1 %v1080_v32, %s3502_s4 }
 0x602   :  { %1083 = vrot.lane.b32.xlu2 %v1081_v34, %s3502_s4  ;;  %1420 = vrot.lane.b32.xlu0 %v1080_v32, %s3507_s21 }
 0x609   :  { %1362 = vrot.lane.b32.xlu1 %v1080_v32, %s3506_s20 }
 0x60a   :  { %1256 = vrot.lane.b32.xlu2 %v1080_v32, %s3505_s19  ;;  %1538 = vrot.lane.b32.xlu0 %v1081_v34, %s3509_s25 }
 0x611   :  { %1480 = vrot.lane.b32.xlu1 %v1081_v34, %s3508_s24 }
 0x612   :  { %1478 = vrot.lane.b32.xlu2 %v1080_v32, %s3508_s24  ;;  %1253 = vrot.lane.b32.xlu0 %v1081_v34, %s3505_s19 }
 0x61a   :  { %1364 = vrot.lane.b32.xlu0 %v1081_v34, %s3506_s20 }
 0x64c   :  { %v1097_v36 = vpop.permute.xlu2 %1096 }
 0x654   :  { %v1423_v50 = vpop.permute.xlu2 %1422 }
 0x65c   :  { %v1084_v62 = vpop.permute.xlu2 %1083 }
 0x663   :  { %v1100_v37 = vpop.permute.xlu1 %1099 }
 0x664   :  { %v1196_v38 = vpop.permute.xlu0 %1195  ;;  %v1101_v39 = vsel %vm262_vm11, %v1100_v37, %v1097_v36  ;;  %v1104_v40 = vsel %vm262_vm11, %v1097_v36, %v1100_v37  ;;  %v1257_v32 = vpop.permute.xlu2 %1256  ;;  %v3290_v37 = vld [vmem:[%s4460_s7 + $0x18] sm:$0xff] }
 0x665   :  { %v1105_v41 = vmul.f32 %v1104_v40, %v270_v52  ;;  %v1106_v46 = vmul.f32 %v1101_v39, %v271_v0  ;;  %v3897_v52 = vld [vmem:[%s4453_s0 + $0x8] sm:$0xff] }
 0x666   :  { %1662 = vst [vmem:[#allocation1] ss:$2 sm:$0xff] %v3897_v52 }
 0x667   :  { %1127 = vmatpush.msra.mxu2 %v1105_v41  ;;  %1147 = vmatpush.msra.mxu3 %v1106_v46 }
 0x668   :  { %3283 = vmatmul.msk.f32.vlgmr.msra.gmra.mxu2 %vm921_vm4, %v3282_v47  ;;  %3284 = vmatmul.msk.f32.vlgmr.msra.gmra.mxu3 %vm921_vm4, %v3282_v47 }
 0x66b   :  { %v1537_v0 = vpop.permute.xlu1 %1536 }
 0x66c   :  { %v1199_v54 = vpop.permute.xlu0 %1198  ;;  %v1479_v10 = vpop.permute.xlu2 %1478 }
 0x66d   :  { %v1200_v55 = vsel %vm388_vm12, %v1199_v54, %v1196_v38  ;;  %v1203_v56 = vsel %vm388_vm12, %v1196_v38, %v1199_v54  ;;  %v1663_v24 = vld.sshfl [vmem:[#allocation1] sm:$0xff pattern:$0x75316420]  ;;  %v1664_v25 = vld.sshfl [vmem:[#allocation1 + $0x8] sm:$0xff pattern:$0x75316420] }
 0x66e   :  { %v1204_v57 = vmul.f32 %v1203_v56, %v396_v63  ;;  %v1205_v58 = vmul.f32 %v1200_v55, %v397_v1  ;;  %v3305_v38 = vld [vmem:[%s4460_s7 + $0x40] sm:$0xff] }
 0x670   :  { %1226 = vmatpush.msrb.mxu2 %v1204_v57  ;;  %1246 = vmatpush.msrb.mxu3 %v1205_v58 }
 0x671   :  { %3288 = vmatmul.msk.f32.vlgmr.msrb.gmra.mxu2 %vm921_vm4, %v3287_v59  ;;  %3289 = vmatmul.msk.f32.vlgmr.msrb.gmra.mxu3 %vm921_vm4, %v3287_v59 }
 0x672   :  { %1335 = vmatpush.msra.mxu2 %v1313_v3  ;;  %1355 = vmatpush.msra.mxu3 %v1314_v4 }
 0x673   :  { %v1088_v63 = vpop.permute.xlu1 %1087 }
 0x674   :  { %v1421_v1 = vpop.permute.xlu0 %1420  ;;  %v1089_v5 = vsel %vm236_vm10, %v1088_v63, %v1084_v62  ;;  %v1092_v6 = vsel %vm236_vm10, %v1084_v62, %v1088_v63 }
 0x675   :  { %v1424_v7 = vsel %vm684_vm15, %v1421_v1, %v1423_v50  ;;  %v1428_v14 = vsel %vm684_vm15, %v1423_v50, %v1421_v1  ;;  %v1093_v12 = vmul.f32 %v1092_v6, %v243_v35  ;;  %v1094_v13 = vmul.f32 %v1089_v5, %v244_v44 }
 0x676   :  { %v1429_v8 = vmul.f32 %v1424_v7, %v697_v45  ;;  %v1430_v16 = vmul.f32 %v1428_v14, %v698_v43  ;;  %v3299_v45 = vld [vmem:[%s4460_s7 + $0x30] sm:$0xff] }
 0x677   :  { %1170 = vmatpush.msrb.mxu0 %v1093_v12  ;;  %1190 = vmatpush.msrb.mxu1 %v1094_v13 }
 0x678   :  { %1451 = vmatpush.msrb.mxu2 %v1429_v8  ;;  %1471 = vmatpush.msrb.mxu3 %v1430_v16 }
 0x679   :  { %3285 = vmatmul.msk.f32.vlgmr.msrb.gmra.mxu0 %vm921_vm4, %v1095_v21  ;;  %3286 = vmatmul.msk.f32.vlgmr.msrb.gmra.mxu1 %vm921_vm4, %v1095_v21 }
 0x67a   :  { %3294 = vmatmul.msk.f32.vlgmr.msra.gmra.mxu2 %vm921_vm4, %v3293_v22  ;;  %3295 = vmatmul.msk.f32.vlgmr.msra.gmra.mxu3 %vm921_vm4, %v3293_v22 }
 0x67b   :  { %v1363_v23 = vpop.permute.xlu1 %1362 }
 0x67c   :  { %v1539_v33 = vpop.permute.xlu0 %1538 }
 0x67d   :  { %v1540_v35 = vsel %vm842_vm3, %v1537_v0, %v1539_v33  ;;  %v1544_v44 = vsel %vm842_vm3, %v1539_v33, %v1537_v0  ;;  %v3296_v0 = vld [vmem:[%s4460_s7 + $0x28] sm:$0xff] }
 0x67e   :  { %v1545_v42 = vmul.f32 %v1540_v35, %v855_v20  ;;  %v1546_v43 = vmul.f32 %v1544_v44, %v856_v19 }
 0x680   :  { %1567 = vmatpush.msra.mxu2 %v1545_v42  ;;  %1587 = vmatpush.msra.mxu3 %v1546_v43 }
 0x682   :  { %3300 = vmatmul.msk.f32.vlgmr.msrb.gmra.mxu2 %vm921_vm4, %v3299_v45  ;;  %3301 = vmatmul.msk.f32.vlgmr.msrb.gmra.mxu3 %vm921_vm4, %v3299_v45 }
 0x683   :  { %3313 = vmatpush.msk.msrb.mxu2 %vm46_vm0, %v1663_v24  ;;  %3315 = vmatpush.msk.msrb.mxu3 %vm46_vm0, %v1664_v25  ;;  %v1481_v39 = vpop.permute.xlu1 %1480 }
 0x684   :  { %v1254_v27 = vpop.permute.xlu0 %1253  ;;  %v1486_v40 = vsel %vm4467_vm14, %v1481_v39, %v1479_v10 }
 0x685   :  { %v1258_v19 = vsel %vm467_vm13, %v1257_v32, %v1254_v27  ;;  %v1261_v20 = vsel %vm467_vm13, %v1254_v27, %v1257_v32  ;;  %v1488_v55 = vmul.f32 %v1486_v40, %v777_v61 }
 0x686   :  { %v1262_v34 = vmul.f32 %v1261_v20, %v475_v11  ;;  %v1263_v36 = vmul.f32 %v1258_v19, %v476_v15  ;;  %v1482_v15 = vsel %vm4466_vm1, %v1479_v10, %v1481_v39  ;;  %vm4474_vm1 = vmmov %vm4471_vm5 }
 0x687   :  { %v1487_v54 = vmul.f32 %v1482_v15, %v776_v2  ;;  %vm4475_vm14 = vmmov %vm4474_vm1 }
 0x688   :  { %1284 = vmatpush.msra.mxu0 %v1262_v34  ;;  %1304 = vmatpush.msra.mxu1 %v1263_v36  ;;  %v4006_v36 = vld [vmem:[%s4461_s8] sm:$0xff] }
 0x689   :  { %3291 = vmatmul.msk.f32.vlgmr.msra.gmra.mxu0 %vm921_vm4, %v3290_v37  ;;  %3292 = vmatmul.msk.f32.vlgmr.msra.gmra.mxu1 %vm921_vm4, %v3290_v37 }
 0x68a   :  { %3306 = vmatmul.msk.f32.vlgmr.msra.gmra.mxu2 %vm921_vm4, %v3305_v38  ;;  %3307 = vmatmul.msk.f32.vlgmr.msra.gmra.mxu3 %vm921_vm4, %v3305_v38 }
 0x68c   :  { %v1365_v11 = vpop.permute.xlu0 %1364 }
 0x68d   :  { %v1366_v41 = vsel %vm4468_vm2, %v1363_v23, %v1365_v11  ;;  %v1370_v46 = vsel %vm4469_vm8, %v1365_v11, %v1363_v23 }
 0x68e   :  { %v1371_v47 = vmul.f32 %v1366_v41, %v618_v31  ;;  %v1372_v50 = vmul.f32 %v1370_v46, %v619_v30  ;;  %v3302_v30 = vld [vmem:[%s4460_s7 + $0x38] sm:$0xff] }
 0x690   :  { %1393 = vmatpush.msrb.mxu0 %v1371_v47  ;;  %1413 = vmatpush.msrb.mxu1 %v1372_v50 }
 0x691   :  { %3297 = vmatmul.msk.f32.vlgmr.msrb.gmra.mxu0 %vm921_vm4, %v3296_v0  ;;  %3298 = vmatmul.msk.f32.vlgmr.msrb.gmra.mxu1 %vm921_vm4, %v3296_v0 }
 0x692   :  { %1509 = vmatpush.msra.mxu0 %v1487_v54  ;;  %1529 = vmatpush.msra.mxu1 %v1488_v55 }
 0x693   :  { %3314 = vmatmul.msk.f32.vlgmr.msrb.gmra.mxu2 %vm4470_vm9, %v3469_v29  ;;  %3316 = vmatmul.msk.f32.vlgmr.msrb.gmra.mxu3 %vm4471_vm5, %v3469_v29 }
 0x694   :  { %3308 = vmatpush.msk.msrb.mxu0 %vm46_vm0, %v3888_v51  ;;  %3310 = vmatpush.msk.msrb.mxu1 %vm46_vm0, %v3890_v53 }
 0x699   :  { %3303 = vmatmul.msk.f32.vlgmr.msra.gmra.mxu0 %vm921_vm4, %v3302_v30  ;;  %3304 = vmatmul.msk.f32.vlgmr.msra.gmra.mxu1 %vm921_vm4, %v3302_v30 }
 0x6a1   :  { %3309 = vmatmul.msk.f32.vlgmr.msrb.gmra.mxu0 %vm4472_vm6, %v4006_v36  ;;  %3311 = vmatmul.msk.f32.vlgmr.msrb.gmra.mxu1 %vm4473_vm7, %v4006_v36 }
 0x6eb   :  { %v1129_v31 = vpop.f32.mrf.mxu2  ;;  %v1149_v60 = vpop.f32.mrf.mxu3 }
 0x6f4   :  { %v1228_v61 = vpop.f32.mrf.mxu2  ;;  %v1248_v2 = vpop.f32.mrf.mxu3 }
 0x6f6   :  { %v1172_v56 = vpop.f32.mrf.mxu0  ;;  %v1192_v57 = vpop.f32.mrf.mxu1 }
 0x6f7   :  { %v1173_v58 = vadd.f32 %v1172_v56, %v1129_v31  ;;  %v1193_v59 = vadd.f32 %v1192_v57, %v1149_v60 }
 0x6f9   :  { %v1251_v51 = vadd.f32 %v1228_v61, %v1173_v58  ;;  %v1252_v3 = vadd.f32 %v1248_v2, %v1193_v59 }
 0x6fd   :  { %v1337_v4 = vpop.f32.mrf.mxu2  ;;  %v1357_v53 = vpop.f32.mrf.mxu3 }
 0x705   :  { %v1453_v62 = vpop.f32.mrf.mxu2  ;;  %v1473_v63 = vpop.f32.mrf.mxu3 }
 0x706   :  { %v1286_v1 = vpop.f32.mrf.mxu0  ;;  %v1306_v5 = vpop.f32.mrf.mxu1 }
 0x707   :  { %v1309_v6 = vadd.f32 %v1286_v1, %v1251_v51  ;;  %v1310_v7 = vadd.f32 %v1306_v5, %v1252_v3 }
 0x709   :  { %v1360_v14 = vadd.f32 %v1337_v4, %v1309_v6  ;;  %v1361_v12 = vadd.f32 %v1357_v53, %v1310_v7 }
 0x70d   :  { %v1569_v13 = vpop.f32.mrf.mxu2  ;;  %v1589_v8 = vpop.f32.mrf.mxu3 }
 0x70e   :  { %v1395_v16 = vpop.f32.mrf.mxu0  ;;  %v1415_v21 = vpop.f32.mrf.mxu1 }
 0x70f   :  { %v1418_v22 = vadd.f32 %v1395_v16, %v1360_v14  ;;  %v1419_v33 = vadd.f32 %v1415_v21, %v1361_v12 }
 0x711   :  { %v1476_v35 = vadd.f32 %v1453_v62, %v1418_v22  ;;  %v1477_v44 = vadd.f32 %v1473_v63, %v1419_v33 }
 0x716   :  { %v1686_v42 = vpop.f32.mrf.mxu2  ;;  %v1706_v43 = vpop.f32.mrf.mxu3 }
 0x717   :  { %v1709_v45 = vsel %vm46_vm0, %v1686_v42, 0.0  ;;  %v1710_v23 = vsel %vm46_vm0, %v1706_v43, 0.0  ;;  %v1511_v24 = vpop.f32.mrf.mxu0  ;;  %v1531_v25 = vpop.f32.mrf.mxu1 }
 0x718   :  { %v1534_v32 = vadd.f32 %v1511_v24, %v1476_v35  ;;  %v1535_v27 = vadd.f32 %v1531_v25, %v1477_v44  ;;  %v1711_v19 = vadd.f32 %v1710_v23, %v1709_v45  ;;  %v4045_v24 = vld [vmem:[%s4454_s1 + $0x8] sm:$0x3] }
 0x719   :  { %v2121_v25 = vperm.slane %v4045_v24, 1 }
 0x71a   :  { %v3999_v20 = vadd.f32 %v1569_v13, %v1534_v32  ;;  %v4001_v34 = vadd.f32 %v1589_v8, %v1535_v27  ;;  %1712 = vadd.xlane.f32.xlu0 %v1711_v19  ;;  %v2120_v32 = vperm.slane %v4045_v24, 0 }
 0x71b   :  { %v2122_v27 = vrot.slane %v2121_v25, 4 }
 0x71f   :  { %v4019_v41 = vpop.f32.mrf.mxu0  ;;  %v4021_v46 = vpop.f32.mrf.mxu1 }
 0x78d   :  { %v1713_v37 = vpop.xlane.xlu0 %1712 }
 0x78e   :  { %v1714_v38 = vmul.f32 %v1713_v37, %v3580_v17  ;;  %v2123_v37 = vsel %vm46_vm0, %v2120_v32, %v2122_v27 }
 0x790   :  { %v1719_v39 = vperm.slane %v1714_v38, %v3582_v18 }
 0x792   :  { %v1721_v10 = vsub.f32 %v3897_v52, %v1719_v39 }
 0x794   :  { %v1722_v11 = vmul.f32 %v1721_v10, %v1721_v10 }
 0x796   :  { %1724 = vst [vmem:[#allocation1] ss:$2 sm:$0xff] %v1722_v11 }
 0x79d   :  { %v1725_v15 = vld.sshfl [vmem:[#allocation1] sm:$0xff pattern:$0x75316420]  ;;  %v1726_v40 = vld.sshfl [vmem:[#allocation1 + $0x8] sm:$0xff pattern:$0x75316420] }
 0x79e   :  { %3317 = vmatpush.msk.msra.mxu0 %vm46_vm0, %v1725_v15  ;;  %3319 = vmatpush.msk.msra.mxu1 %vm46_vm0, %v1726_v40 }
 0x79f   :  { %3318 = vmatmul.msk.f32.vlgmr.msra.gmra.mxu0 %vm4474_vm1, %v3469_v29  ;;  %3320 = vmatmul.msk.f32.vlgmr.msra.gmra.mxu1 %vm4475_vm14, %v3469_v29 }
 0x81c   :  { %v1748_v47 = vpop.f32.mrf.mxu0  ;;  %v1768_v50 = vpop.f32.mrf.mxu1 }
 0x81d   :  { %v1771_v0 = vsel %vm46_vm0, %v1748_v47, 0.0  ;;  %v1772_v54 = vsel %vm46_vm0, %v1768_v50, 0.0 }
 0x81e   :  { %v1773_v55 = vadd.f32 %v1772_v54, %v1771_v0 }
 0x820   :  { %1774 = vadd.xlane.f32.xlu2 %v1773_v55 }
 0x893   :  { %v1775_v30 = vpop.xlane.xlu2 %1774 }
 0x894   :  { %v1776_v31 = vmul.f32 %v1775_v30, %v3580_v17 }
 0x896   :  { %v1777_v60 = vadd.f32 1e-05, %v1776_v31 }
 0x898   :  { %3453 = vrsqrt.f32 %v1777_v60  ;;  %vm1784_vm8 = vweird.f32 %v1777_v60 }
 0x89e   :  { %v3454_v61 = vpop.eup %3453 }
 0x89f   :  { %v1779_v2 = vmul.f32 %v3454_v61, %v1777_v60  ;;  %vm1785_vm2 = vweird.f32 %v3454_v61 }
 0x8a0   :  { %vm1786_vm9 = vmor %vm1784_vm8, %vm1785_vm2 }
 0x8a1   :  { %v1780_v29 = vmul.f32 %v3454_v61, %v1779_v2  ;;  %vm4476_vm2 = vmmov %vm4475_vm14 }
 0x8a2   :  { %vm4477_vm8 = vmmov %vm4476_vm2 }
 0x8a3   :  { %v1781_v56 = vmul.f32 0.5, %v1780_v29 }
 0x8a5   :  { %v1782_v57 = vsub.f32 1.5, %v1781_v56 }
 0x8a7   :  { %v1783_v58 = vmul.f32 %v3454_v61, %v1782_v57 }
 0x8a9   :  { %v1787_v59 = vsel %vm1786_vm9, %v3454_v61, %v1783_v58  ;;  %v4084_v61 = vld [vmem:[%s4454_s1] sm:$0x3]  ;;  %vm4478_vm9 = vmmov %vm4476_vm2 }
 0x8aa   :  { %v1792_v51 = vperm.slane %v1787_v59, %v3582_v18  ;;  %v1836_v56 = vperm.slane %v4084_v61, 0 }
 0x8ac   :  { %v1794_v3 = vmul.f32 %v1792_v51, %v1721_v10 }
 0x8ae   :  { %v1795_v4 = vmul.f32 %v1794_v3, %v3601_v48 }
 0x8b0   :  { %v1796_v53 = vadd.f32 %v1795_v4, %v3604_v49  ;;  %v1837_v4 = vperm.slane %v4084_v61, 1 }
 0x8b2   :  { %v3321_v62 = vmul.f32 -1.442695, %v1796_v53 }
 0x8b4   :  { %3455 = vpow2.f32 %v3321_v62 }
 0x8ba   :  { %v3456_v63 = vpop.eup %3455 }
 0x8bb   :  { %v1800_v1 = vadd.f32 1.0, %v3456_v63 }
 0x8bd   :  { %3457 = vrcp.f32 %v1800_v1  ;;  %v1812_v14 = vand.u32 2147483648, %v1800_v1  ;;  %v1810_v13 = vand.u32 2147483647, %v1800_v1  ;;  %vm1806_vm6 = vweird.f32 %v1800_v1 }
 0x8bf   :  { %v1813_v18 = vor.u32 1.1754944e-38, %v1812_v14  ;;  %vm1811_vm1 = vcmp.eq.f32.partialorder %v1810_v13, 8.507059e+37 }
 0x8c3   :  { %v3458_v5 = vpop.eup %3457 }
 0x8c4   :  { %v1802_v6 = vmul.f32 %v3458_v5, %v1800_v1  ;;  %vm1807_vm5 = vweird.f32 %v3458_v5 }
 0x8c5   :  { %vm1808_vm7 = vmor %vm1806_vm6, %vm1807_vm5 }
 0x8c6   :  { %v1803_v7 = vsub.f32 1.0, %v1802_v6  ;;  %vm4479_vm5 = vmmov %vm4476_vm2 }
 0x8c7   :  { %vm4480_vm6 = vmmov %vm4476_vm2 }
 0x8c8   :  { %v1804_v12 = vmul.f32 %v3458_v5, %v1803_v7 }
 0x8ca   :  { %v1805_v8 = vadd.f32 %v3458_v5, %v1804_v12  ;;  %v3323_v12 = vld [vmem:[%s4459_s6 + $0x8] sm:$0xff] }
 0x8cc   :  { %v1809_v16 = vsel %vm1808_vm7, %v3458_v5, %v1805_v8  ;;  %v4107_v5 = vld [vmem:[%s4454_s1 + $0x2] sm:$0x3]  ;;  %vm4481_vm7 = vcmask 1039360  }
 0x8cd   :  { %v1814_v48 = vsel %vm1811_vm1, %v1813_v18, %v1809_v16  ;;  %v1862_v13 = vperm.slane %v4107_v5, 1  ;;  %vm4482_vm1 = vmmov %vm4476_vm2 }
 0x8ce   :  { %v4029_v49 = vmul.f32 %v1814_v48, %v1796_v53  ;;  %v1842_v48 = vld [vmem:[%s4459_s6] sm:$0xff] }
 0x8d0   :  { %1818 = vst [vmem:[#allocation1] ss:$2 sm:$0xff] %v4029_v49  ;;  %v2125_v38 = vmul.f32 %v2123_v37, %v4029_v49  ;;  %v3333_v37 = vld [vmem:[%s4459_s6 + $0x10] sm:$0xff] }
 0x8d7   :  { %v1819_v21 = vld.sshfl [vmem:[#allocation1 + $0x8] sm:$0xff pattern:$0x75316420] }
 0x8d8   :  { %1820 = vrot.lane.b32.xlu2 %v1819_v21, %s3502_s4  ;;  %1823 = vst [vmem:[#allocation1] ss:$2 sm:$0xff] %v4029_v49 }
 0x8df   :  { %v1824_v22 = vld.sshfl [vmem:[#allocation1] sm:$0xff pattern:$0x75316420]  ;;  %v1825_v33 = vld.sshfl [vmem:[#allocation1 + $0x8] sm:$0xff pattern:$0x75316420] }
 0x8e0   :  { %1826 = vrot.lane.b32.xlu1 %v1824_v22, %s3502_s4  ;;  %1843 = vst [vmem:[#allocation1] ss:$2 sm:$0xff] %v4029_v49  ;;  %v4132_v22 = vld [vmem:[%s4454_s1 + $0x4] sm:$0x3] }
 0x8e7   :  { %v1844_v35 = vld.sshfl [vmem:[#allocation1 + $0x8] sm:$0xff pattern:$0x75316420] }
 0x8e8   :  { %1828 = vrot.lane.b32.xlu1 %v1825_v33, %s3502_s4  ;;  %1848 = vst [vmem:[#allocation1] ss:$2 sm:$0xff] %v4029_v49 }
 0x8ef   :  { %v1849_v44 = vld.sshfl [vmem:[#allocation1] sm:$0xff pattern:$0x75316420]  ;;  %v1850_v42 = vld.sshfl [vmem:[#allocation1 + $0x8] sm:$0xff pattern:$0x75316420] }
 0x8f0   :  { %1845 = vrot.lane.b32.xlu1 %v1844_v35, %s3503_s15  ;;  %1966 = vst [vmem:[#allocation1] ss:$2 sm:$0xff] %v4029_v49  ;;  %v1984_v35 = vperm.slane %v4132_v22, 0 }
 0x8f7   :  { %v1967_v43 = vld.sshfl [vmem:[#allocation1 + $0x8] sm:$0xff pattern:$0x75316420] }
 0x8f8   :  { %1851 = vrot.lane.b32.xlu1 %v1849_v44, %s3503_s15  ;;  %1971 = vst [vmem:[#allocation1] ss:$2 sm:$0xff] %v4029_v49  ;;  %v1985_v44 = vperm.slane %v4132_v22, 1 }
 0x8ff   :  { %v1973_v45 = vld.sshfl [vmem:[#allocation1 + $0x8] sm:$0xff pattern:$0x75316420]  ;;  %v1972_v23 = vld.sshfl [vmem:[#allocation1] sm:$0xff pattern:$0x75316420] }
 0x900   :  { %1853 = vrot.lane.b32.xlu1 %v1850_v42, %s3503_s15  ;;  %1976 = vrot.lane.b32.xlu0 %v1973_v45, %s3504_s16  ;;  %2042 = vst [vmem:[#allocation1] ss:$2 sm:$0xff] %v4029_v49 }
 0x907   :  { %v2043_v19 = vld.sshfl [vmem:[#allocation1 + $0x8] sm:$0xff pattern:$0x75316420] }
 0x908   :  { %1968 = vrot.lane.b32.xlu1 %v1967_v43, %s3504_s16  ;;  %2044 = vrot.lane.b32.xlu0 %v2043_v19, %s3505_s19  ;;  %2047 = vst [vmem:[#allocation1] ss:$2 sm:$0xff] %v4029_v49  ;;  %v4145_v19 = vld [vmem:[%s4454_s1 + $0x6] sm:$0x3] }
 0x90f   :  { %v2049_v39 = vld.sshfl [vmem:[#allocation1 + $0x8] sm:$0xff pattern:$0x75316420]  ;;  %v2048_v10 = vld.sshfl [vmem:[#allocation1] sm:$0xff pattern:$0x75316420] }
 0x910   :  { %1974 = vrot.lane.b32.xlu1 %v1972_v23, %s3504_s16  ;;  %2052 = vrot.lane.b32.xlu0 %v2049_v39, %s3505_s19  ;;  %2128 = vst [vmem:[#allocation1] ss:$2 sm:$0xff] %v2125_v38  ;;  %v2060_v38 = vperm.slane %v4145_v19, 0  ;;  %v2061_v39 = vperm.slane %v4145_v19, 1 }
 0x917   :  { %v4063_v11 = vld.sshfl [vmem:[#allocation1] sm:$0xff pattern:$0x75316420]  ;;  %v4065_v15 = vld.sshfl [vmem:[#allocation1 + $0x8] sm:$0xff pattern:$0x75316420] }
 0x918   :  { %2050 = vrot.lane.b32.xlu1 %v2048_v10, %s3505_s19  ;;  %2180 = vst [vmem:[#allocation1] ss:$2 sm:$0xff] %v4029_v49 }
 0x91f   :  { %v2182_v40 = vld.sshfl [vmem:[#allocation1 + $0x8] sm:$0xff pattern:$0x75316420]  ;;  %v2181_v47 = vld.sshfl [vmem:[#allocation1] sm:$0xff pattern:$0x75316420] }
 0x920   :  { %2185 = vrot.lane.b32.xlu1 %v2182_v40, %s3506_s20  ;;  %2183 = vrot.lane.b32.xlu2 %v2181_v47, %s3506_s20  ;;  %2190 = vst [vmem:[#allocation1] ss:$2 sm:$0xff] %v4029_v49 }
 0x927   :  { %v2191_v50 = vld.sshfl [vmem:[#allocation1] sm:$0xff pattern:$0x75316420] }
 0x928   :  { %2192 = vrot.lane.b32.xlu0 %v2191_v50, %s3506_s20  ;;  %2256 = vst [vmem:[#allocation1] ss:$2 sm:$0xff] %v4029_v49 }
 0x92f   :  { %v2258_v0 = vld.sshfl [vmem:[#allocation1 + $0x8] sm:$0xff pattern:$0x75316420]  ;;  %v2257_v54 = vld.sshfl [vmem:[#allocation1] sm:$0xff pattern:$0x75316420] }
 0x930   :  { %2261 = vrot.lane.b32.xlu1 %v2258_v0, %s3507_s21  ;;  %2259 = vrot.lane.b32.xlu2 %v2257_v54, %s3507_s21  ;;  %2266 = vst [vmem:[#allocation1] ss:$2 sm:$0xff] %v4029_v49  ;;  %v4169_v0 = vld [vmem:[%s4454_s1 + $0xa] sm:$0x3] }
 0x931   :  { %v2198_v54 = vperm.slane %v4169_v0, 0 }
 0x932   :  { %v1821_v57 = vpop.permute.xlu2 %1820 }
 0x937   :  { %v2267_v55 = vld.sshfl [vmem:[#allocation1] sm:$0xff pattern:$0x75316420] }
 0x938   :  { %2268 = vrot.lane.b32.xlu0 %v2267_v55, %s3507_s21  ;;  %2332 = vst [vmem:[#allocation1] ss:$2 sm:$0xff] %v4029_v49 }
 0x93f   :  { %v2333_v30 = vld.sshfl [vmem:[#allocation1] sm:$0xff pattern:$0x75316420]  ;;  %v2334_v31 = vld.sshfl [vmem:[#allocation1 + $0x8] sm:$0xff pattern:$0x75316420] }
 0x940   :  { %2342 = vst [vmem:[#allocation1] ss:$2 sm:$0xff] %v4029_v49 }
 0x947   :  { %v2343_v60 = vld.sshfl [vmem:[#allocation1] sm:$0xff pattern:$0x75316420] }
 0x948   :  { %2408 = vst [vmem:[#allocation1] ss:$2 sm:$0xff] %v4029_v49 }
 0x94f   :  { %v2410_v2 = vld.sshfl [vmem:[#allocation1 + $0x8] sm:$0xff pattern:$0x75316420]  ;;  %v2409_v29 = vld.sshfl [vmem:[#allocation1] sm:$0xff pattern:$0x75316420] }
 0x950   :  { %2413 = vrot.lane.b32.xlu1 %v2410_v2, %s3509_s25  ;;  %2411 = vrot.lane.b32.xlu2 %v2409_v29, %s3509_s25  ;;  %2418 = vst [vmem:[#allocation1] ss:$2 sm:$0xff] %v4029_v49 }
 0x952   :  { %v1827_v58 = vpop.permute.xlu1 %1826 }
 0x953   :  { %v1833_v59 = vsel %vm236_vm10, %v1821_v57, %v1827_v58  ;;  %v2199_v57 = vperm.slane %v4169_v0, 1 }
 0x954   :  { %v1840_v51 = vmul.f32 %v1836_v56, %v1833_v59 }
 0x956   :  { %3328 = vmatpush.msk.msrb.mxu0 %vm46_vm0, %v1840_v51 }
 0x957   :  { %v2419_v3 = vld.sshfl [vmem:[#allocation1] sm:$0xff pattern:$0x75316420]  ;;  %3329 = vmatmul.msk.f32.vlgmr.msrb.gmra.mxu0 %vm4476_vm2, %v1842_v48  ;;  %vm4484_vm2 = vmmov %vm4482_vm1 }
 0x958   :  { %2337 = vrot.lane.b32.xlu1 %v2334_v31, %s3508_s24  ;;  %2335 = vrot.lane.b32.xlu2 %v2333_v30, %s3508_s24  ;;  %3142 = vst [vmem:[#allocation1] ss:$2 sm:$0xff] %v3897_v52  ;;  %v1861_v52 = vperm.slane %v4107_v5, 0  ;;  %v3345_v31 = vld [vmem:[%s4459_s6 + $0x20] sm:$0xff] }
 0x959   :  { %2420 = vrot.lane.b32.xlu0 %v2419_v3, %s3509_s25 }
 0x95a   :  { %v1829_v53 = vpop.permute.xlu1 %1828 }
 0x95b   :  { %v1830_v62 = vsel %vm236_vm10, %v1827_v58, %v1829_v53  ;;  %v3351_v58 = vld [vmem:[%s4459_s6 + $0x28] sm:$0xff] }
 0x95c   :  { %v1841_v63 = vmul.f32 %v1837_v4, %v1830_v62  ;;  %v4199_v53 = vld [vmem:[%s4454_s1 + $0xc] sm:$0x3] }
 0x95d   :  { %v2274_v62 = vperm.slane %v4199_v53, 0 }
 0x95e   :  { %3330 = vmatpush.msk.msrb.mxu1 %vm46_vm0, %v1841_v63 }
 0x95f   :  { %3331 = vmatmul.msk.f32.vlgmr.msrb.gmra.mxu1 %vm4477_vm8, %v1842_v48  ;;  %vm4485_vm8 = vmmov %vm4482_vm1  ;;  %v4221_v48 = vld [vmem:[%s4454_s1 + $0x10] sm:$0x3] }
 0x961   :  { %2344 = vrot.lane.b32.xlu0 %v2343_v60, %s3508_s24  ;;  %v3339_v60 = vld [vmem:[%s4459_s6 + $0x18] sm:$0xff] }
 0x962   :  { %v1846_v1 = vpop.permute.xlu1 %1845 }
 0x96a   :  { %v1852_v6 = vpop.permute.xlu1 %1851 }
 0x96b   :  { %v1858_v7 = vsel %vm262_vm11, %v1846_v1, %v1852_v6 }
 0x96c   :  { %v1865_v14 = vmul.f32 %v1861_v52, %v1858_v7 }
 0x96e   :  { %3324 = vmatpush.msk.msra.mxu2 %vm46_vm0, %v1865_v14  ;;  %v3357_v14 = vld [vmem:[%s4459_s6 + $0x30] sm:$0xff] }
 0x96f   :  { %3325 = vmatmul.msk.f32.vlgmr.msra.gmra.mxu2 %vm4475_vm14, %v3323_v12  ;;  %vm4483_vm14 = vmmov %vm4482_vm1 }
 0x972   :  { %v1854_v8 = vpop.permute.xlu1 %1853  ;;  %v1977_v49 = vpop.permute.xlu0 %1976 }
 0x973   :  { %v1855_v18 = vsel %vm262_vm11, %v1852_v6, %v1854_v8 }
 0x974   :  { %v1866_v16 = vmul.f32 %v1862_v13, %v1855_v18 }
 0x976   :  { %3326 = vmatpush.msk.msra.mxu3 %vm46_vm0, %v1866_v16 }
 0x977   :  { %3327 = vmatmul.msk.f32.vlgmr.msra.gmra.mxu3 %vm4478_vm9, %v3323_v12  ;;  %vm4486_vm9 = vmmov %vm4481_vm7  ;;  %v2275_v12 = vperm.slane %v4199_v53, 1 }
 0x97a   :  { %v1969_v21 = vpop.permute.xlu1 %1968  ;;  %v2045_v33 = vpop.permute.xlu0 %2044 }
 0x97b   :  { %v2184_v55 = vpop.permute.xlu2 %2183 }
 0x982   :  { %v1975_v42 = vpop.permute.xlu1 %1974  ;;  %v2053_v10 = vpop.permute.xlu0 %2052 }
 0x983   :  { %v1978_v43 = vsel %vm388_vm12, %v1975_v42, %v1977_v49  ;;  %v1981_v45 = vsel %vm388_vm12, %v1969_v21, %v1975_v42  ;;  %v2426_v21 = vperm.slane %v4221_v48, 0 }
 0x984   :  { %v1988_v23 = vmul.f32 %v1984_v35, %v1981_v45  ;;  %v1989_v27 = vmul.f32 %v1985_v44, %v1978_v43  ;;  %v3369_v45 = vld [vmem:[%s4459_s6 + $0x40] sm:$0xff] }
 0x986   :  { %3334 = vmatpush.msk.msrb.mxu2 %vm46_vm0, %v1988_v23  ;;  %3336 = vmatpush.msk.msrb.mxu3 %vm46_vm0, %v1989_v27  ;;  %v4233_v23 = vld [vmem:[%s4454_s1 + $0xe] sm:$0x3]  ;;  %s3514_s1 = smov 256  }
 0x987   :  { %3335 = vmatmul.msk.f32.vlgmr.msrb.gmra.mxu2 %vm4479_vm5, %v3333_v37  ;;  %3337 = vmatmul.msk.f32.vlgmr.msrb.gmra.mxu3 %vm4480_vm6, %v3333_v37  ;;  %vm4487_vm5 = vmmov %vm4482_vm1  ;;  %v2350_v27 = vperm.slane %v4233_v23, 0  ;;  %v2427_v37 = vperm.slane %v4221_v48, 1 }
 0x988   :  { %3346 = vmatpush.msk.msra.mxu2 %vm46_vm0, %v4063_v11  ;;  %3348 = vmatpush.msk.msra.mxu3 %vm46_vm0, %v4065_v15  ;;  %vm4488_vm6 = vmmov %vm4482_vm1 }
 0x98a   :  { %v2051_v40 = vpop.permute.xlu1 %2050  ;;  %v2260_v63 = vpop.permute.xlu2 %2259 }
 0x98b   :  { %v2054_v47 = vsel %vm467_vm13, %v2051_v40, %v2053_v10  ;;  %v2057_v50 = vsel %vm467_vm13, %v2045_v33, %v2051_v40 }
 0x98c   :  { %v2064_v11 = vmul.f32 %v2060_v38, %v2057_v50  ;;  %v2065_v15 = vmul.f32 %v2061_v39, %v2054_v47 }
 0x98e   :  { %3340 = vmatpush.msk.msra.mxu0 %vm46_vm0, %v2064_v11  ;;  %3342 = vmatpush.msk.msra.mxu1 %vm46_vm0, %v2065_v15 }
 0x98f   :  { %3347 = vmatmul.msk.f32.vlgmr.msra.gmra.mxu2 %vm4482_vm1, %v3345_v31  ;;  %3349 = vmatmul.msk.f32.vlgmr.msra.gmra.mxu3 %vm4483_vm14, %v3345_v31  ;;  %vm4490_vm14 = vmmov %vm4482_vm1  ;;  %v2351_v31 = vperm.slane %v4233_v23, 1 }
 0x990   :  { %3341 = vmatmul.msk.f32.vlgmr.msra.gmra.mxu0 %vm4484_vm2, %v3339_v60  ;;  %3343 = vmatmul.msk.f32.vlgmr.msra.gmra.mxu1 %vm4485_vm8, %v3339_v60  ;;  %vm4491_vm2 = vcmask 916480   ;;  %vm4492_vm8 = vmmov %vm4482_vm1 }
 0x992   :  { %v2186_v30 = vpop.permute.xlu1 %2185 }
 0x993   :  { %v2187_v2 = vsel %vm4481_vm7, %v2184_v55, %v2186_v30  ;;  %vm4489_vm7 = vmmov %vm4482_vm1  ;;  %v3363_v55 = vld [vmem:[%s4459_s6 + $0x38] sm:$0xff] }
 0x994   :  { %v2202_v29 = vmul.f32 %v2198_v54, %v2187_v2 }
 0x996   :  { %3352 = vmatpush.msk.msrb.mxu0 %vm46_vm0, %v2202_v29 }
 0x998   :  { %3353 = vmatmul.msk.f32.vlgmr.msrb.gmra.mxu0 %vm4487_vm5, %v3351_v58  ;;  %vm4494_vm5 = vmmov %vm4491_vm2 }
 0x99a   :  { %v2193_v59 = vpop.permute.xlu0 %2192 }
 0x99b   :  { %v2195_v51 = vsel %vm4486_vm9, %v2186_v30, %v2193_v59  ;;  %vm4493_vm9 = vmmov %vm4482_vm1 }
 0x99c   :  { %v2203_v3 = vmul.f32 %v2199_v57, %v2195_v51 }
 0x99e   :  { %3354 = vmatpush.msk.msrb.mxu1 %vm46_vm0, %v2203_v3 }
 0x99f   :  { %3355 = vmatmul.msk.f32.vlgmr.msrb.gmra.mxu1 %vm4488_vm6, %v3351_v58  ;;  %vm4495_vm6 = vmmov %vm4482_vm1 }
 0x9a2   :  { %v2262_v1 = vpop.permute.xlu1 %2261 }
 0x9a3   :  { %v2263_v6 = vsel %vm684_vm15, %v2260_v63, %v2262_v1 }
 0x9a4   :  { %v2278_v7 = vmul.f32 %v2274_v62, %v2263_v6 }
 0x9a6   :  { %3358 = vmatpush.msk.msrb.mxu2 %vm46_vm0, %v2278_v7 }
 0x9a7   :  { %3359 = vmatmul.msk.f32.vlgmr.msrb.gmra.mxu2 %vm4489_vm7, %v3357_v14 }
 0x9aa   :  { %v2269_v8 = vpop.permute.xlu0 %2268  ;;  %v2412_v49 = vpop.permute.xlu2 %2411 }
 0x9ab   :  { %v2271_v18 = vsel %vm684_vm15, %v2262_v1, %v2269_v8 }
 0x9ac   :  { %v2279_v16 = vmul.f32 %v2275_v12, %v2271_v18 }
 0x9ae   :  { %3360 = vmatpush.msk.msrb.mxu3 %vm46_vm0, %v2279_v16 }
 0x9af   :  { %3361 = vmatmul.msk.f32.vlgmr.msrb.gmra.mxu3 %vm4482_vm1, %v3357_v14 }
 0x9b2   :  { %v2336_v10 = vpop.permute.xlu2 %2335 }
 0x9c2   :  { %v2414_v33 = vpop.permute.xlu1 %2413 }
 0x9c3   :  { %v2415_v42 = vsel %vm842_vm3, %v2412_v49, %v2414_v33 }
 0x9c4   :  { %v2430_v43 = vmul.f32 %v2426_v21, %v2415_v42 }
 0x9c6   :  { %3370 = vmatpush.msk.msra.mxu2 %vm46_vm0, %v2430_v43 }
 0x9c7   :  { %3371 = vmatmul.msk.f32.vlgmr.msra.gmra.mxu2 %vm4490_vm14, %v3369_v45 }
 0x9ca   :  { %v2338_v40 = vpop.permute.xlu1 %2337 }
 0x9cb   :  { %v2339_v47 = vsel %vm4491_vm2, %v2336_v10, %v2338_v40  ;;  %v2421_v50 = vpop.permute.xlu0 %2420 }
 0x9cc   :  { %v2354_v11 = vmul.f32 %v2350_v27, %v2339_v47  ;;  %v2423_v15 = vsel %vm842_vm3, %v2414_v33, %v2421_v50 }
 0x9cd   :  { %v2431_v30 = vmul.f32 %v2427_v37, %v2423_v15 }
 0x9ce   :  { %3364 = vmatpush.msk.msra.mxu0 %vm46_vm0, %v2354_v11 }
 0x9cf   :  { %3372 = vmatpush.msk.msra.mxu3 %vm46_vm0, %v2431_v30  ;;  %3365 = vmatmul.msk.f32.vlgmr.msra.gmra.mxu0 %vm4492_vm8, %v3363_v55 }
 0x9d0   :  { %3373 = vmatmul.msk.f32.vlgmr.msra.gmra.mxu3 %vm4493_vm9, %v3369_v45 }
 0x9d3   :  { %v2345_v60 = vpop.permute.xlu0 %2344 }
 0x9d4   :  { %v2347_v2 = vsel %vm4494_vm5, %v2338_v40, %v2345_v60  ;;  %v1943_v51 = vpop.f32.mrf.mxu0 }
 0x9d5   :  { %v2355_v29 = vmul.f32 %v2351_v31, %v2347_v2 }
 0x9d7   :  { %3366 = vmatpush.msk.msra.mxu1 %vm46_vm0, %v2355_v29 }
 0x9d8   :  { %3367 = vmatmul.msk.f32.vlgmr.msra.gmra.mxu1 %vm4495_vm6, %v3363_v55 }
 0x9dc   :  { %v1963_v1 = vpop.f32.mrf.mxu1 }
 0x9f2   :  { %v1894_v58 = vpop.f32.mrf.mxu2 }
 0x9f3   :  { %v1944_v63 = vadd.f32 %v1943_v51, %v1894_v58 }
 0x9fa   :  { %v1914_v59 = vpop.f32.mrf.mxu3 }
 0x9fb   :  { %v1964_v16 = vadd.f32 %v1963_v1, %v1914_v59 }
 0xa0a   :  { %v2017_v3 = vpop.f32.mrf.mxu2  ;;  %v2037_v6 = vpop.f32.mrf.mxu3 }
 0xa0b   :  { %v2040_v8 = vadd.f32 %v2017_v3, %v1944_v63  ;;  %v2041_v43 = vadd.f32 %v2037_v6, %v1964_v16  ;;  %v3470_v3 = vld [vmem:[%s4456_s3] sm:$0xff] }
 0xa0d   :  { %v2093_v7 = vpop.f32.mrf.mxu0  ;;  %v2113_v49 = vpop.f32.mrf.mxu1 }
 0xa0e   :  { %v2116_v18 = vadd.f32 %v2093_v7, %v2040_v8  ;;  %v2117_v47 = vadd.f32 %v2113_v49, %v2041_v43 }
 0xa12   :  { %v2155_v14 = vpop.f32.mrf.mxu2  ;;  %v2175_v42 = vpop.f32.mrf.mxu3 }
 0xa13   :  { %v2178_v33 = vadd.f32 %v2155_v14, %v2116_v18  ;;  %v2179_v11 = vadd.f32 %v2175_v42, %v2117_v47 }
 0xa15   :  { %v2231_v45 = vpop.f32.mrf.mxu0 }
 0xa16   :  { %v2254_v40 = vadd.f32 %v2231_v45, %v2178_v33 }
 0xa1c   :  { %v2251_v30 = vpop.f32.mrf.mxu1 }
 0xa1d   :  { %v2255_v58 = vadd.f32 %v2251_v30, %v2179_v11 }
 0xa2a   :  { %v2307_v10 = vpop.f32.mrf.mxu2 }
 0xa2b   :  { %v2330_v50 = vadd.f32 %v2307_v10, %v2254_v40 }
 0xa32   :  { %v2327_v60 = vpop.f32.mrf.mxu3 }
 0xa33   :  { %v2331_v59 = vadd.f32 %v2327_v60, %v2255_v58 }
 0xa4a   :  { %v2459_v55 = vpop.f32.mrf.mxu2 }
 0xa4c   :  { %v2383_v15 = vpop.f32.mrf.mxu0 }
 0xa4d   :  { %v2406_v2 = vadd.f32 %v2383_v15, %v2330_v50 }
 0xa4f   :  { %v2482_v29 = vadd.f32 %v2459_v55, %v2406_v2 }
 0xa51   :  { %v2484_v51 = vadd.f32 %v2482_v29, %v3842_v28 }
 0xa53   :  { %2501 = vmatpush.msrb.mxu0 %v2484_v51  ;;  %v2479_v1 = vpop.f32.mrf.mxu3 }
 0xa54   :  { %3374 = vmatmul.msk.f32.vlgmr.msrb.gmra.mxu0 %vm921_vm4, %v3470_v3 }
 0xa55   :  { %v2403_v63 = vpop.f32.mrf.mxu1 }
 0xa56   :  { %v2407_v6 = vadd.f32 %v2403_v63, %v2331_v59 }
 0xa58   :  { %v2483_v7 = vadd.f32 %v2479_v1, %v2407_v6 }
 0xa5a   :  { %v2485_v14 = vadd.f32 %v2483_v7, %v3842_v28 }
 0xa5c   :  { %2521 = vmatpush.msrb.mxu1 %v2485_v14 }
 0xa5d   :  { %3375 = vmatmul.msk.f32.vlgmr.msrb.gmra.mxu1 %vm921_vm4, %v3470_v3 }
 0xad1   :  { %v2503_v8 = vpop.f32.mrf.mxu0 }
 0xada   :  { %v2523_v18 = vpop.f32.mrf.mxu1 }
 0xadb   :  { %v2526_v16 = vadd.f32 %v2523_v18, %v2503_v8 }
 0xadd   :  { %2527 = vadd.xlane.f32.xlu2 %v2526_v16 }
 0xb50   :  { %v2528_v49 = vpop.xlane.xlu2 %2527 }
 0xb51   :  { %v2529_v33 = vmul.f32 %v2528_v49, %v3580_v17 }
 0xb53   :  { %v2530_v42 = vsub.f32 %v2484_v51, %v2529_v33  ;;  %v2531_v43 = vsub.f32 %v2485_v14, %v2529_v33  ;;  %v3511_v33 = vmov 3  }
 0xb54   :  { %3432 = vset.pattern.permute.xlu2 %v3511_v33 }
 0xb55   :  { %v2532_v45 = vmul.f32 %v2530_v42, %v2530_v42  ;;  %v2533_v10 = vmul.f32 %v2531_v43, %v2531_v43 }
 0xb57   :  { %2549 = vmatpush.msrb.mxu2 %v2532_v45  ;;  %2569 = vmatpush.msrb.mxu3 %v2533_v10 }
 0xb58   :  { %3376 = vmatmul.msk.f32.vlgmr.msrb.gmra.mxu2 %vm921_vm4, %v3470_v3  ;;  %3377 = vmatmul.msk.f32.vlgmr.msrb.gmra.mxu3 %vm921_vm4, %v3470_v3 }
 0xbdb   :  { %v2551_v28 = vpop.f32.mrf.mxu2  ;;  %v2571_v40 = vpop.f32.mrf.mxu3 }
 0xbdc   :  { %v2574_v47 = vadd.f32 %v2571_v40, %v2551_v28 }
 0xbde   :  { %2575 = vadd.xlane.f32.xlu1 %v2574_v47 }
 0xc51   :  { %v2576_v50 = vpop.xlane.xlu1 %2575 }
 0xc52   :  { %v2577_v11 = vmul.f32 %v2576_v50, %v3580_v17 }
 0xc54   :  { %v2578_v15 = vadd.f32 1e-05, %v2577_v11 }
 0xc56   :  { %3459 = vrsqrt.f32 %v2578_v15  ;;  %vm2585_vm1 = vweird.f32 %v2578_v15 }
 0xc5c   :  { %v3460_v55 = vpop.eup %3459 }
 0xc5d   :  { %v2580_v30 = vmul.f32 %v3460_v55, %v2578_v15  ;;  %vm2586_vm7 = vweird.f32 %v3460_v55 }
 0xc5e   :  { %vm2587_vm14 = vmor %vm2585_vm1, %vm2586_vm7 }
 0xc5f   :  { %v2581_v60 = vmul.f32 %v3460_v55, %v2580_v30 }
 0xc61   :  { %v2582_v2 = vmul.f32 0.5, %v2581_v60 }
 0xc63   :  { %v2583_v29 = vsub.f32 1.5, %v2582_v2 }
 0xc65   :  { %v2584_v58 = vmul.f32 %v3460_v55, %v2583_v29 }
 0xc67   :  { %v2588_v51 = vsel %vm2587_vm14, %v3460_v55, %v2584_v58 }
 0xc68   :  { %v2589_v59 = vmul.f32 %v2588_v51, %v2530_v42  ;;  %v2590_v3 = vmul.f32 %v2588_v51, %v2531_v43  ;;  %v3512_v42 = vmov 4  }
 0xc69   :  { %3433 = vset.pattern.permute.xlu1 %v3512_v42  ;;  %3434 = vset.pattern.permute.xlu0 %v3512_v42 }
 0xc6a   :  { %v2591_v63 = vmul.f32 %v2589_v59, %v3855_v9  ;;  %v2592_v1 = vmul.f32 %v2590_v3, %v3855_v9 }
 0xc6c   :  { %v2593_v17 = vadd.f32 %v2591_v63, %v3857_v26  ;;  %v2594_v6 = vadd.f32 %v2592_v1, %v3857_v26 }
 0xc6e   :  { %v3378_v7 = vmul.f32 -1.442695, %v2593_v17  ;;  %v3379_v14 = vmul.f32 -1.442695, %v2594_v6 }
 0xc70   :  { %3461 = vpow2.f32 %v3378_v7 }
 0xc71   :  { %3463 = vpow2.f32 %v3379_v14 }
 0xc76   :  { %v3462_v8 = vpop.eup %3461 }
 0xc77   :  { %v3464_v18 = vpop.eup %3463  ;;  %v2601_v16 = vadd.f32 1.0, %v3462_v8 }
 0xc78   :  { %v2602_v49 = vadd.f32 1.0, %v3464_v18 }
 0xc79   :  { %3465 = vrcp.f32 %v2601_v16  ;;  %v2614_v28 = vand.u32 2147483648, %v2601_v16  ;;  %v2612_v50 = vand.u32 2147483647, %v2601_v16  ;;  %vm2608_vm9 = vweird.f32 %v2601_v16 }
 0xc7a   :  { %3467 = vrcp.f32 %v2602_v49  ;;  %v2629_v11 = vand.u32 2147483648, %v2602_v49  ;;  %v2627_v55 = vand.u32 2147483647, %v2602_v49  ;;  %vm2623_vm6 = vweird.f32 %v2602_v49 }
 0xc7b   :  { %v2615_v60 = vor.u32 1.1754944e-38, %v2614_v28  ;;  %vm2613_vm7 = vcmp.eq.f32.partialorder %v2612_v50, 8.507059e+37 }
 0xc7c   :  { %v2630_v58 = vor.u32 1.1754944e-38, %v2629_v11  ;;  %vm2628_vm14 = vcmp.eq.f32.partialorder %v2627_v55, 8.507059e+37 }
 0xc7f   :  { %v3466_v43 = vpop.eup %3465 }
 0xc80   :  { %v3468_v9 = vpop.eup %3467  ;;  %v2604_v45 = vmul.f32 %v3466_v43, %v2601_v16  ;;  %vm2609_vm2 = vweird.f32 %v3466_v43 }
 0xc81   :  { %v2619_v10 = vmul.f32 %v3468_v9, %v2602_v49  ;;  %vm2624_vm8 = vweird.f32 %v3468_v9  ;;  %vm2610_vm5 = vmor %vm2608_vm9, %vm2609_vm2 }
 0xc82   :  { %v2605_v26 = vsub.f32 1.0, %v2604_v45  ;;  %vm2625_vm1 = vmor %vm2623_vm6, %vm2624_vm8 }
 0xc83   :  { %v2620_v40 = vsub.f32 1.0, %v2619_v10 }
 0xc84   :  { %v2606_v47 = vmul.f32 %v3466_v43, %v2605_v26 }
 0xc85   :  { %v2621_v15 = vmul.f32 %v3468_v9, %v2620_v40 }
 0xc86   :  { %v2607_v30 = vadd.f32 %v3466_v43, %v2606_v47 }
 0xc87   :  { %v2622_v2 = vadd.f32 %v3468_v9, %v2621_v15 }
 0xc88   :  { %v2611_v29 = vsel %vm2610_vm5, %v3466_v43, %v2607_v30 }
 0xc89   :  { %v2616_v51 = vsel %vm2613_vm7, %v2615_v60, %v2611_v29  ;;  %v2626_v59 = vsel %vm2625_vm1, %v3468_v9, %v2622_v2  ;;  %v2648_v9 = vld [vmem:[%s4460_s7] sm:$0xff]  ;;  %v3388_v2 = vld [vmem:[%s4460_s7 + $0x18] sm:$0xff] }
 0xc8a   :  { %v2631_v3 = vsel %vm2628_vm14, %v2630_v58, %v2626_v59  ;;  %v4273_v63 = vmul.f32 %v2616_v51, %v2593_v17  ;;  %v3471_v17 = vld [vmem:[%s4458_s5] sm:$0xff] }
 0xc8b   :  { %v4275_v1 = vmul.f32 %v2631_v3, %v2594_v6  ;;  %v3385_v3 = vld [vmem:[%s4460_s7 + $0x10] sm:$0xff] }
 0xc8c   :  { %2807 = vrot.lane.b32.xlu2 %v4273_v63, %s3505_s19 }
 0xc8d   :  { %2747 = vrot.lane.b32.xlu1 %v4275_v1, %s3504_s16  ;;  %2636 = vrot.lane.b32.xlu0 %v4275_v1, %s3502_s4  ;;  %v2864_v59 = vmul.f32 %v4275_v1, %v2121_v25 }
 0xc94   :  { %3025 = vrot.lane.b32.xlu2 %v4273_v63, %s3508_s24 }
 0xc95   :  { %3027 = vrot.lane.b32.xlu1 %v4275_v1, %s3508_s24  ;;  %2640 = vrot.lane.b32.xlu0 %v4273_v63, %s3502_s4 }
 0xc9c   :  { %2970 = vrot.lane.b32.xlu2 %v4275_v1, %s3507_s21 }
 0xc9d   :  { %3082 = vrot.lane.b32.xlu1 %v4273_v63, %s3509_s25  ;;  %2649 = vrot.lane.b32.xlu0 %v4275_v1, %s3503_s15 }
 0xca4   :  { %1595 = vperm.xlu2 %3432, %v3471_v17  }
 0xca5   :  { %1602 = vperm.xlu1 %3433, %v3471_v17   ;;  %2652 = vrot.lane.b32.xlu0 %v4273_v63, %s3503_s15 }
 0xcad   :  { %2804 = vrot.lane.b32.xlu0 %v4275_v1, %s3505_s19 }
 0xcb5   :  { %2750 = vrot.lane.b32.xlu0 %v4273_v63, %s3504_s16 }
 0xcbd   :  { %2911 = vrot.lane.b32.xlu0 %v4273_v63, %s3506_s20 }
 0xcc5   :  { %2913 = vrot.lane.b32.xlu0 %v4275_v1, %s3506_s20 }
 0xccd   :  { %2968 = vrot.lane.b32.xlu0 %v4273_v63, %s3507_s21 }
 0xcd5   :  { %3084 = vrot.lane.b32.xlu0 %v4275_v1, %s3509_s25 }
 0xce6   :  { %v2808_v6 = vpop.permute.xlu2 %2807 }
 0xcee   :  { %v4312_v8 = vpop.permute.xlu2 %3025 }
 0xcf6   :  { %v4325_v45 = vpop.permute.xlu2 %2970 }
 0xcfe   :  { %v4331_v28 = vpop.permute.xlu2 %1595 }
 0xcff   :  { %v2748_v7 = vpop.permute.xlu1 %2747  ;;  %v2637_v14 = vpop.permute.xlu0 %2636  ;;  %v1598_v61 = vadd.f32 %v4331_v28, %v3999_v20 }
 0xd07   :  { %v4314_v18 = vpop.permute.xlu1 %3027  ;;  %v2641_v16 = vpop.permute.xlu0 %2640 }
 0xd08   :  { %v2642_v49 = vsel %vm236_vm10, %v2641_v16, %v2637_v14  ;;  %v2645_v33 = vsel %vm236_vm10, %v2637_v14, %v2641_v16  ;;  %vm4496_vm10 = vcmask 916480   ;;  %v3400_v16 = vld [vmem:[%s4460_s7 + $0x38] sm:$0xff] }
 0xd09   :  { %v2646_v42 = vmul.f32 %v2645_v33, %v1836_v56  ;;  %v2647_v43 = vmul.f32 %v2642_v49, %v1837_v4  ;;  %v1599_v56 = vadd.f32 %v4331_v28, %v4001_v34  ;;  %v3380_v34 = vld [vmem:[%s4460_s7 + $0x8] sm:$0xff]  ;;  %v3029_v25 = vsel %vm4496_vm10, %v4312_v8, %v4314_v18 }
 0xd0b   :  { %2722 = vmatpush.msra.mxu2 %v2646_v42  ;;  %2742 = vmatpush.msra.mxu3 %v2647_v43  ;;  %v3403_v42 = vld [vmem:[%s4460_s7 + $0x40] sm:$0xff] }
 0xd0c   :  { %3383 = vmatmul.msk.f32.vlgmr.msra.gmra.mxu2 %vm921_vm4, %v2648_v9  ;;  %3384 = vmatmul.msk.f32.vlgmr.msra.gmra.mxu3 %vm921_vm4, %v2648_v9 }
 0xd0f   :  { %v4329_v10 = vpop.permute.xlu1 %3082  ;;  %v2650_v26 = vpop.permute.xlu0 %2649 }
 0xd17   :  { %v4337_v4 = vpop.permute.xlu1 %1602  ;;  %v2653_v40 = vpop.permute.xlu0 %2652 }
 0xd18   :  { %v1633_v47 = vadd.f32 %v4019_v41, %v4337_v4  ;;  %v1653_v50 = vadd.f32 %v4021_v46, %v4337_v4  ;;  %v2654_v11 = vsel %vm262_vm11, %v2653_v40, %v2650_v26  ;;  %v2657_v15 = vsel %vm262_vm11, %v2650_v26, %v2653_v40  ;;  %vm4497_vm11 = vmmov %vm4496_vm10 }
 0xd19   :  { %v2658_v55 = vmul.f32 %v2657_v15, %v1861_v52  ;;  %v2659_v20 = vmul.f32 %v2654_v11, %v1862_v13 }
 0xd1a   :  { %v1655_v30 = vadd.f32 %v1633_v47, %v1598_v61  ;;  %v1656_v60 = vadd.f32 %v1653_v50, %v1599_v56 }
 0xd1b   :  { %2679 = vmatpush.msra.mxu0 %v2658_v55  ;;  %2699 = vmatpush.msra.mxu1 %v2659_v20 }
 0xd1c   :  { %1657 = vst [vmem:[#allocation2] sm:$0xff] %v1655_v30  ;;  %3381 = vmatmul.msk.f32.vlgmr.msra.gmra.mxu0 %vm921_vm4, %v3380_v34  ;;  %3382 = vmatmul.msk.f32.vlgmr.msra.gmra.mxu1 %vm921_vm4, %v3380_v34 }
 0xd1d   :  { %1658 = vst [vmem:[#allocation2 + $0x8] sm:$0xff] %v1656_v60 }
 0xd1f   :  { %v2805_v41 = vpop.permute.xlu0 %2804 }
 0xd20   :  { %v2809_v46 = vsel %vm467_vm13, %v2808_v6, %v2805_v41  ;;  %v2812_v5 = vsel %vm467_vm13, %v2805_v41, %v2808_v6  ;;  %v3394_v6 = vld [vmem:[%s4460_s7 + $0x28] sm:$0xff] }
 0xd21   :  { %v2813_v52 = vmul.f32 %v2812_v5, %v2060_v38  ;;  %v2814_v13 = vmul.f32 %v2809_v46, %v2061_v39  ;;  %v2863_v39 = vmul.f32 %v4273_v63, %v2120_v32  ;;  %v3391_v32 = vld [vmem:[%s4460_s7 + $0x20] sm:$0xff] }
 0xd23   :  { %2834 = vmatpush.msrb.mxu2 %v2813_v52  ;;  %2854 = vmatpush.msrb.mxu3 %v2814_v13 }
 0xd24   :  { %3389 = vmatmul.msk.f32.vlgmr.msrb.gmra.mxu2 %vm921_vm4, %v3388_v2  ;;  %3390 = vmatmul.msk.f32.vlgmr.msrb.gmra.mxu3 %vm921_vm4, %v3388_v2 }
 0xd27   :  { %v2751_v29 = vpop.permute.xlu0 %2750 }
 0xd28   :  { %v2752_v58 = vsel %vm388_vm12, %v2751_v29, %v2748_v7  ;;  %v2755_v51 = vsel %vm388_vm12, %v2748_v7, %v2751_v29  ;;  %vm4498_vm12 = vcmask 1039360   ;;  %v3034_v7 = vmul.f32 %v3029_v25, %v2350_v27 }
 0xd29   :  { %v2756_v38 = vmul.f32 %v2755_v51, %v1984_v35  ;;  %v2757_v19 = vmul.f32 %v2752_v58, %v1985_v44  ;;  %v3033_v35 = vsel %vm4497_vm11, %v4314_v18, %v4312_v8  ;;  %vm4499_vm13 = vmmov %vm4498_vm12  ;;  %v3143_v8 = vld.sshfl [vmem:[#allocation1] sm:$0xff pattern:$0x75316420]  ;;  %v3144_v18 = vld.sshfl [vmem:[#allocation1 + $0x8] sm:$0xff pattern:$0x75316420] }
 0xd2a   :  { %v3035_v14 = vmul.f32 %v3033_v35, %v2351_v31  ;;  %v3397_v31 = vld [vmem:[%s4460_s7 + $0x30] sm:$0xff]  ;;  %s3513_s7 = smov [#allocation2]  }
 0xd2b   :  { %2777 = vmatpush.msrb.mxu0 %v2756_v38  ;;  %2797 = vmatpush.msrb.mxu1 %v2757_v19  ;;  %s3201_s23 = sshll.u32 %s3513_s7, 4  ;;  %s3202_s23 = int_to_ptr.vmem [resolvable:$true] %s3201_s23 }
 0xd2c   :  { %3386 = vmatmul.msk.f32.vlgmr.msrb.gmra.mxu0 %vm921_vm4, %v3385_v3  ;;  %3387 = vmatmul.msk.f32.vlgmr.msrb.gmra.mxu1 %vm921_vm4, %v3385_v3 }
 0xd2d   :  { %2884 = vmatpush.msra.mxu0 %v2863_v39  ;;  %2904 = vmatpush.msra.mxu1 %v2864_v59 }
 0xd2f   :  { %v2912_v22 = vpop.permute.xlu0 %2911 }
 0xd34   :  { %3392 = vmatmul.msk.f32.vlgmr.msra.gmra.mxu0 %vm921_vm4, %v3391_v32  ;;  %3393 = vmatmul.msk.f32.vlgmr.msra.gmra.mxu1 %vm921_vm4, %v3391_v32 }
 0xd37   :  { %v2914_v24 = vpop.permute.xlu0 %2913 }
 0xd38   :  { %v2915_v44 = vsel %vm4498_vm12, %v2912_v22, %v2914_v24  ;;  %v2919_v63 = vsel %vm4499_vm13, %v2914_v24, %v2912_v22 }
 0xd39   :  { %v2920_v1 = vmul.f32 %v2915_v44, %v2198_v54  ;;  %v2921_v17 = vmul.f32 %v2919_v63, %v2199_v57 }
 0xd3b   :  { %2941 = vmatpush.msra.mxu2 %v2920_v1  ;;  %2961 = vmatpush.msra.mxu3 %v2921_v17 }
 0xd3c   :  { %3395 = vmatmul.msk.f32.vlgmr.msra.gmra.mxu2 %vm921_vm4, %v3394_v6  ;;  %3396 = vmatmul.msk.f32.vlgmr.msra.gmra.mxu3 %vm921_vm4, %v3394_v6 }
 0xd3d   :  { %3055 = vmatpush.msrb.mxu2 %v3034_v7  ;;  %3075 = vmatpush.msrb.mxu3 %v3035_v14 }
 0xd3f   :  { %3406 = vmatpush.msk.msra.mxu2 %vm46_vm0, %v3143_v8  ;;  %3408 = vmatpush.msk.msra.mxu3 %vm46_vm0, %v3144_v18  ;;  %v2969_v0 = vpop.permute.xlu0 %2968  ;;  %vm4500_vm0 = vcmask 31744  }
 0xd40   :  { %v2972_v54 = vsel %vm684_vm15, %v2969_v0, %v4325_v45  ;;  %v2976_v57 = vsel %vm684_vm15, %v4325_v45, %v2969_v0  ;;  %vm4501_vm15 = vmmov %vm4500_vm0 }
 0xd41   :  { %v2977_v23 = vmul.f32 %v2972_v54, %v2274_v62  ;;  %v2978_v27 = vmul.f32 %v2976_v57, %v2275_v12 }
 0xd43   :  { %2998 = vmatpush.msrb.mxu0 %v2977_v23  ;;  %3018 = vmatpush.msrb.mxu1 %v2978_v27 }
 0xd44   :  { %3398 = vmatmul.msk.f32.vlgmr.msrb.gmra.mxu0 %vm921_vm4, %v3397_v31  ;;  %3399 = vmatmul.msk.f32.vlgmr.msrb.gmra.mxu1 %vm921_vm4, %v3397_v31 }
 0xd45   :  { %3401 = vmatmul.msk.f32.vlgmr.msrb.gmra.mxu2 %vm921_vm4, %v3400_v16  ;;  %3402 = vmatmul.msk.f32.vlgmr.msrb.gmra.mxu3 %vm921_vm4, %v3400_v16 }
 0xd47   :  { %v3085_v53 = vpop.permute.xlu0 %3084 }
 0xd48   :  { %v3086_v62 = vsel %vm842_vm3, %v4329_v10, %v3085_v53  ;;  %v3090_v12 = vsel %vm842_vm3, %v3085_v53, %v4329_v10 }
 0xd49   :  { %v3091_v49 = vmul.f32 %v3086_v62, %v2426_v21  ;;  %v3092_v33 = vmul.f32 %v3090_v12, %v2427_v37 }
 0xd4b   :  { %3112 = vmatpush.msra.mxu0 %v3091_v49  ;;  %3132 = vmatpush.msra.mxu1 %v3092_v33 }
 0xd4c   :  { %3404 = vmatmul.msk.f32.vlgmr.msra.gmra.mxu0 %vm921_vm4, %v3403_v42  ;;  %3405 = vmatmul.msk.f32.vlgmr.msra.gmra.mxu1 %vm921_vm4, %v3403_v42 }
 0xd4d   :  { %3407 = vmatmul.msk.f32.vlgmr.msra.gmra.mxu2 %vm4500_vm0, %v4006_v36  ;;  %3409 = vmatmul.msk.f32.vlgmr.msra.gmra.mxu3 %vm4501_vm15, %v4006_v36 }
 0xd8f   :  { %v2724_v48 = vpop.f32.mrf.mxu2  ;;  %v2744_v37 = vpop.f32.mrf.mxu3 }
 0xd99   :  { %v2681_v21 = vpop.f32.mrf.mxu0  ;;  %v2701_v43 = vpop.f32.mrf.mxu1 }
 0xd9a   :  { %v2725_v10 = vadd.f32 %v2724_v48, %v2681_v21  ;;  %v2745_v26 = vadd.f32 %v2744_v37, %v2701_v43 }
 0xda7   :  { %v2836_v61 = vpop.f32.mrf.mxu2  ;;  %v2856_v56 = vpop.f32.mrf.mxu3 }
 0xda9   :  { %v2779_v9 = vpop.f32.mrf.mxu0  ;;  %v2799_v45 = vpop.f32.mrf.mxu1 }
 0xdaa   :  { %v2802_v40 = vadd.f32 %v2779_v9, %v2725_v10  ;;  %v2803_v47 = vadd.f32 %v2799_v45, %v2745_v26 }
 0xdac   :  { %v2859_v15 = vadd.f32 %v2836_v61, %v2802_v40  ;;  %v2860_v55 = vadd.f32 %v2856_v56, %v2803_v47 }
 0xdb1   :  { %v2886_v50 = vpop.f32.mrf.mxu0  ;;  %v2906_v11 = vpop.f32.mrf.mxu1 }
 0xdb2   :  { %v2909_v30 = vadd.f32 %v2886_v50, %v2859_v15  ;;  %v2910_v36 = vadd.f32 %v2906_v11, %v2860_v55 }
 0xdbf   :  { %v2943_v20 = vpop.f32.mrf.mxu2  ;;  %v2963_v34 = vpop.f32.mrf.mxu3 }
 0xdc0   :  { %v2966_v46 = vadd.f32 %v2943_v20, %v2909_v30  ;;  %v2967_v5 = vadd.f32 %v2963_v34, %v2910_v36 }
 0xdc1   :  { %v3000_v60 = vpop.f32.mrf.mxu0  ;;  %v3020_v41 = vpop.f32.mrf.mxu1 }
 0xdc2   :  { %v3023_v52 = vadd.f32 %v3000_v60, %v2966_v46  ;;  %v3024_v13 = vadd.f32 %v3020_v41, %v2967_v5 }
 0xdc8   :  { %v3057_v2 = vpop.f32.mrf.mxu2  ;;  %v3077_v29 = vpop.f32.mrf.mxu3 }
 0xdc9   :  { %v3080_v58 = vadd.f32 %v3057_v2, %v3023_v52  ;;  %v3081_v51 = vadd.f32 %v3077_v29, %v3024_v13  ;;  %v3114_v38 = vpop.f32.mrf.mxu0  ;;  %v3134_v19 = vpop.f32.mrf.mxu1 }
 0xdcb   :  { %v3137_v39 = vadd.f32 %v3114_v38, %v3080_v58  ;;  %v3138_v59 = vadd.f32 %v3134_v19, %v3081_v51 }
 0xdcd   :  { %v3139_v32 = vadd.f32 %v3137_v39, %v4331_v28  ;;  %v3140_v24 = vadd.f32 %v3138_v59, %v4331_v28 }
 0xdd0   :  { %v3169_v3 = vpop.f32.mrf.mxu2  ;;  %v3189_v22 = vpop.f32.mrf.mxu3 }
 0xdd1   :  { %v3170_v25 = vadd.f32 %v3169_v3, %v4337_v4  ;;  %v3190_v35 = vadd.f32 %v3189_v22, %v4337_v4 }
 0xdd3   :  { %v3192_v44 = vadd.f32 %v3170_v25, %v3139_v32  ;;  %v3193_v63 = vadd.f32 %v3190_v35, %v3140_v24 }
 0xdd5   :  { %3195 = vst [vmem:[#allocation2 + $0x10] sm:$0xff] %v3192_v44 }
 0xdd6   :  { %3196 = vst [vmem:[#allocation2 + $0x18] sm:$0xff] %v3193_v63 }
 0xdd7   :  { %3209 = dma.vmem_to_hbm [thread:$0]  %s3202_s23, 512, %s3204_s26, [#allocation3], %s3514_s1, %s3514_s1, %s3503_s15  }
 0xdd8   :  { %3496 = dma.done.wait [#allocation3], 512  }
 0xdd9   :  { %3497 = vsyncadd [#allocation3], 4294966784 }
 0xdda   :  { %3214 = vsyncpa [#allocation3], 1 }

</bundles_post_ra>
